<compile_context>
chip_gen: v5e
topology: v5e:2x2
jax: 0.10.0
libtpu: 0.0.40
codegen_flags: <defaults>
</compile_context>

<pallas_src>
import functools

import jax
import jax.numpy as jnp
from jax.experimental import pallas as pl
from jax.experimental.pallas import tpu as pltpu


# ----------------------------------------------------------------------------
# Fused Pallas kernel: all transformer blocks, Bt batch elements per grid step
# ----------------------------------------------------------------------------
def _layernorm(x, g, b, eps=1e-5):
    mu = jnp.mean(x, axis=-1, keepdims=True)
    var = jnp.mean((x - mu) ** 2, axis=-1, keepdims=True)
    return (x - mu) * jax.lax.rsqrt(var + eps) * g + b


def _situation_transformer_kernel(
        x_ref, dm_ref, aux_ref, hp_ref,
        wqkv_ref, bqkv_ref, wo_ref, bo_ref, ln1g_ref, ln1b_ref,
        w1_ref, b1_ref, w2_ref, b2_ref, ln2g_ref, ln2b_ref,
        out_ref, attn_scr,
        *, num_layers, num_heads, head_dim, batch_tile):
    Bt = batch_tile
    H = num_heads
    dh = head_dim
    n_pad = x_ref.shape[1]
    D = x_ref.shape[2]

    x2d = x_ref[...].reshape(Bt * n_pad, D)            # row-wise ops batch for free
    dm = dm_ref[...]                                    # (Bt, n, n)
    aux = aux_ref[...]                                  # (Bt, 2, n)
    neg = aux[:, 0:1, :] * (-1e9)                       # (Bt, 1, n): 1.0 == padded key
    end_gate = aux[:, 1:2, 0:1] > 0.5                   # (Bt, 1, 1): end-lookup present

    # --- loop-invariant per-head additive attention bias (built ONCE) -------
    # hp_ref (SMEM): row 0 dist_w, row 1 dist_b, rows 2..4 global-token dists,
    # rows 5..6 start/end dists.  Override masks rebuilt from iota (no code DMA).
    ii = jax.lax.broadcasted_iota(jnp.int32, (n_pad, n_pad), 0)
    jj = jax.lax.broadcasted_iota(jnp.int32, (n_pad, n_pad), 1)
    mn = jnp.minimum(ii, jj)
    offd = ii != jj
    g_cond = [(offd & (mn == c))[None] for c in range(3)]             # (1, n, n)
    se_cond = [((((ii == r) & (jj >= 5)) | ((jj == r) & (ii >= 5)))[None] & end_gate)
               for r in (3, 4)]                                        # (Bt, n, n)

    biases = []                                         # H x (Bt, n, n), live across layers
    for h in range(H):
        b_h = dm * hp_ref[0, h] + hp_ref[1, h]
        for c in range(3):
            b_h = jnp.where(g_cond[c], hp_ref[2 + c, h], b_h)
        b_h = jnp.where(se_cond[0], hp_ref[5, h], b_h)
        b_h = jnp.where(se_cond[1], hp_ref[6, h], b_h)
        biases.append(b_h + neg)                        # key-padding mask folded in

    def layer(l, x):
        # One lane-dense (Bt*n, D) @ (D, 3D) projection; Q columns pre-scaled.
        qkv = (jnp.dot(x, wqkv_ref[l], preferred_element_type=jnp.float32)
               + bqkv_ref[l]).reshape(Bt, n_pad, 3 * D)
        for h in range(H):                              # static head loop
            q_h = qkv[:, :, h * dh:(h + 1) * dh]
            k_h = qkv[:, :, D + h * dh:D + (h + 1) * dh]
            v_h = qkv[:, :, 2 * D + h * dh:2 * D + (h + 1) * dh]
            s = jnp.einsum('bqd,bkd->bqk', q_h, k_h,
                           preferred_element_type=jnp.float32) + biases[h]
            s = s - jnp.max(s, axis=-1, keepdims=True)
            p = jnp.exp(s)
            p = p * pl.reciprocal(jnp.sum(p, axis=-1, keepdims=True), approx=True)
            # head output -> lane slice of VMEM scratch (replaces lane concat)
            attn_scr[:, :, h * dh:(h + 1) * dh] = jnp.einsum(
                'bqk,bkd->bqd', p, v_h, preferred_element_type=jnp.float32)
        attn = attn_scr[...].reshape(Bt * n_pad, D)
        attn = jnp.dot(attn, wo_ref[l], preferred_element_type=jnp.float32) + bo_ref[l]
        h1 = _layernorm(x + attn, ln1g_ref[l], ln1b_ref[l])
        ff = jnp.maximum(jnp.dot(h1, w1_ref[l],
                                 preferred_element_type=jnp.float32) + b1_ref[l], 0.0)
        ff = jnp.dot(ff, w2_ref[l], preferred_element_type=jnp.float32) + b2_ref[l]
        return _layernorm(h1 + ff, ln2g_ref[l], ln2b_ref[l])

    y = jax.lax.fori_loop(0, num_layers, layer, x2d, unroll=True)
    out_ref[...] = y.reshape(Bt, n_pad, D).astype(out_ref.dtype)


def _pick_batch_tile(B):
    """Batch elements packed (sublane-stacked) into one grid step."""
    try:
        kind = jax.devices()[0].device_kind.lower()
    except Exception:
        kind = ""
    # 2-TensorCore parts: keep >= 2 grid blocks so both cores stay busy; single-TC
    # parts (v5e / v6e): collapse to as few grid steps as possible.
    min_steps = 2 if any(t in kind for t in ("v7", "v4", "v5p")) else 1
    max_tile = 8                                        # vreg / VMEM headroom per step
    bt = max(1, min(max_tile, B // min_steps if B >= min_steps else B))
    while B % bt:
        bt -= 1
    return bt


def fused_situation_transformer(x, dm, aux, hp, sp, *, batch_tile=None):
    """x: (B, n_pad, D); dm: (B, n_pad, n_pad); aux: (B, 2, n_pad) [pad mask; end flag];
    hp: (7, H) scalar table (SMEM); sp: stacked per-layer block params."""
    B, n_pad, D = x.shape
    L = sp['wqkv'].shape[0]
    H = hp.shape[1]
    FF = sp['w1'].shape[2]
    dh = D // H
    Bt = _pick_batch_tile(B) if batch_tile is None else batch_tile
    assert B % Bt == 0

    kernel = functools.partial(_situation_transformer_kernel,
                               num_layers=L, num_heads=H, head_dim=dh,
                               batch_tile=Bt)
    w3 = lambda i: (0, 0, 0)
    return pl.pallas_call(
        kernel,
        out_shape=jax.ShapeDtypeStruct((B, n_pad, D), jnp.float32),
        grid=(B // Bt,),
        in_specs=[
            pl.BlockSpec((Bt, n_pad, D), lambda i: (i, 0, 0)),       # x
            pl.BlockSpec((Bt, n_pad, n_pad), lambda i: (i, 0, 0)),   # distance matrix
            pl.BlockSpec((Bt, 2, n_pad), lambda i: (i, 0, 0)),       # [pad mask; end flag]
            pl.BlockSpec(memory_space=pltpu.MemorySpace.SMEM),       # head-param table
            # Per-layer weights: all layers resident, constant index map (DMA'd once).
            # TODO(synk): for scaled configs on v7x (64 MiB VMEM) stream weights per
            # layer (grid axis over L) or mark these pipeline_mode=pl.Buffered(1).
            pl.BlockSpec((L, D, 3 * D), w3),                         # Wqkv (Q pre-scaled)
            pl.BlockSpec((L, 1, 3 * D), w3),                         # bqkv
            pl.BlockSpec((L, D, D), w3),                             # Wo
            pl.BlockSpec((L, 1, D), w3),                             # bo
            pl.BlockSpec((L, 1, D), w3),                             # ln1 gamma
            pl.BlockSpec((L, 1, D), w3),                             # ln1 beta
            pl.BlockSpec((L, D, FF), w3),                            # W1
            pl.BlockSpec((L, 1, FF), w3),                            # b1
            pl.BlockSpec((L, FF, D), w3),                            # W2
            pl.BlockSpec((L, 1, D), w3),                             # b2
            pl.BlockSpec((L, 1, D), w3),                             # ln2 gamma
            pl.BlockSpec((L, 1, D), w3),                             # ln2 beta
        ],
        out_specs=pl.BlockSpec((Bt, n_pad, D), lambda i: (i, 0, 0)),
        scratch_shapes=[pltpu.VMEM((Bt, n_pad, D), jnp.float32)],    # head-output assembly
        compiler_params=pltpu.CompilerParams(dimension_semantics=("parallel",)),
    )(x, dm, aux, hp,
      sp['wqkv'], sp['bqkv'], sp['wo'], sp['bo'], sp['ln1_g'], sp['ln1_b'],
      sp['w1'], sp['b1'], sp['w2'], sp['b2'], sp['ln2_g'], sp['ln2_b'])


# ----------------------------------------------------------------------------
# Parameter init (deterministic, synthetic — mirrors nn.Module __init__ shapes)
# ----------------------------------------------------------------------------
def _dense(k, fi, fo):
    return jax.random.normal(k, (fi, fo), jnp.float32) / jnp.sqrt(float(fi))


def _emb(k, rows, dim):
    return jax.random.normal(k, (rows, dim), jnp.float32) * 0.1


def init_block_params(key, D, FF):
    ks = jax.random.split(key, 4)
    return dict(
        wqkv=_dense(ks[0], D, 3 * D), bqkv=jnp.zeros((1, 3 * D), jnp.float32),
        wo=_dense(ks[1], D, D), bo=jnp.zeros((1, D), jnp.float32),
        ln1_g=jnp.ones((1, D), jnp.float32), ln1_b=jnp.zeros((1, D), jnp.float32),
        w1=_dense(ks[2], D, FF), b1=jnp.zeros((1, FF), jnp.float32),
        w2=_dense(ks[3], FF, D), b2=jnp.zeros((1, D), jnp.float32),
        ln2_g=jnp.ones((1, D), jnp.float32), ln2_b=jnp.zeros((1, D), jnp.float32),
    )


def init_params(key, D, H, num_blocks, ff_mult=4):
    ks = jax.random.split(key, 10 + num_blocks)
    p = dict(
        node_w=_dense(ks[0], 2, D), node_b=jnp.zeros((D,), jnp.float32),
        tour_w=_dense(ks[1], 1, D), tour_b=jnp.zeros((D,), jnp.float32),
        num_w=_dense(ks[2], 1, D), num_b=jnp.zeros((D,), jnp.float32),
        se_lookup=_emb(ks[3], 2, D),        # start_end_node_lookup
        se_indicator=_emb(ks[4], 2, D),     # start_end_node_indicator_lookup
        sit_token=_emb(ks[5], 1, D),        # situation_token_lookup
        dist_w=jax.random.normal(ks[6], (H,), jnp.float32),   # Linear(1 -> H)
        dist_b=jnp.zeros((H,), jnp.float32),
        dist_se=_emb(ks[7], 2, H),          # distance_start_end_node_lookup
        dist_global=_emb(ks[8], 3, H),      # distance_global_token_lookup
    )
    p['blocks'] = [init_block_params(ks[10 + i], D, ff_mult * D)
                   for i in range(num_blocks)]
    return p


def stack_block_params(blocks, D, H):
    """Stack per-layer params with leading L axis; fold 1/sqrt(dh) into Q columns."""
    dh = D // H
    scale = jnp.float32(1.0 / float(dh) ** 0.5)

    def q_scaled(m):                                    # scale Q columns only
        return jnp.concatenate([m[..., :D] * scale, m[..., D:]], axis=-1)

    st = lambda f: jnp.stack([f(bp) for bp in blocks], axis=0)
    return dict(
        wqkv=st(lambda bp: q_scaled(bp['wqkv'])),       # (L, D, 3D)
        bqkv=st(lambda bp: q_scaled(bp['bqkv'])),       # (L, 1, 3D)
        wo=st(lambda bp: bp['wo']), bo=st(lambda bp: bp['bo']),
        ln1_g=st(lambda bp: bp['ln1_g']), ln1_b=st(lambda bp: bp['ln1_b']),
        w1=st(lambda bp: bp['w1']), b1=st(lambda bp: bp['b1']),
        w2=st(lambda bp: bp['w2']), b2=st(lambda bp: bp['b2']),
        ln2_g=st(lambda bp: bp['ln2_g']), ln2_b=st(lambda bp: bp['ln2_b']),
    )


# ----------------------------------------------------------------------------
# Forward pass (tiny embedding glue in plain JAX; transformer stack in Pallas)
# ----------------------------------------------------------------------------
def situation_network_forward(board, params):
    B = board['start_nodes_batch'].shape[0]
    D = params['node_w'].shape[1]
    H = params['dist_w'].shape[0]

    # --- start node embedding (optionally replaced by learned lookup) --------
    start_emb = board['start_nodes_batch'] @ params['node_w'] + params['node_b']
    start_idcs = board['start_nodes_lookup_embedding_idcs']
    if start_idcs.shape[0] > 0:
        is_start_lu = jnp.zeros((B,), bool).at[start_idcs].set(True)
        start_emb = jnp.where(is_start_lu[:, None],
                              params['se_lookup'][0][None, :], start_emb)
    start_emb = start_emb + params['se_indicator'][0][None, :]

    # --- end node embedding --------------------------------------------------
    end_emb = board['end_nodes_batch'] @ params['node_w'] + params['node_b']
    end_idcs = board['end_nodes_lookup_embedding_idcs']
    num_end_lookups = end_idcs.shape[0]
    is_end_lu = jnp.zeros((B,), bool)
    if num_end_lookups > 0:
        is_end_lu = is_end_lu.at[end_idcs].set(True)
        end_emb = jnp.where(is_end_lu[:, None],
                            params['se_lookup'][1][None, :], end_emb)
    end_emb = end_emb + params['se_indicator'][1][None, :]

    # --- remaining nodes / scalar embeddings / situation token ---------------
    rem_emb = board['remaining_nodes_batch'] @ params['node_w'] + params['node_b']
    tour_emb = board['tour_length_batch'] @ params['tour_w'] + params['tour_b']
    num_emb = (board['num_remaining_nodes_embedding_batch'] @ params['num_w']
               + params['num_b'])
    sit_tok = jnp.broadcast_to(params['sit_token'][0][None, :], (B, D))

    # --- graph node sequence: [sit, tour, num, start, end, remaining] --------
    graph_nodes = jnp.concatenate(
        [sit_tok[:, None, :], tour_emb[:, None, :], num_emb[:, None, :],
         start_emb[:, None, :], end_emb[:, None, :], rem_emb],
        axis=1).astype(jnp.float32)

    dm = board['distance_matrix'].astype(jnp.float32)
    n = dm.shape[1]
    R = n - 5
    n_pad = ((n + 7) // 8) * 8          # pad sequence to a sublane multiple
    pad = n_pad - n

    x = jnp.pad(graph_nodes, ((0, 0), (0, pad), (0, 0)))
    dm_p = jnp.pad(dm, ((0, 0), (0, pad), (0, pad)))

    # aux row 0: key-padding mask (1.0 == masked, padded columns masked too);
    # aux row 1: per-batch "end-node lookup present" flag (gates the SE bias override)
    mask_pad = jnp.pad(board['self_attention_masks_batch'].astype(jnp.float32),
                       ((0, 0), (0, pad)), constant_values=1.0)
    end_flag = jnp.broadcast_to(is_end_lu.astype(jnp.float32)[:, None], (B, n_pad))
    aux = jnp.stack([mask_pad, end_flag], axis=1)                     # (B, 2, n_pad)

    # per-head scalar table (SMEM in-kernel): [dist_w; dist_b; global(3); se(2)]
    hp = jnp.concatenate([params['dist_w'][None, :], params['dist_b'][None, :],
                          params['dist_global'], params['dist_se']],
                         axis=0).astype(jnp.float32)

    sp = stack_block_params(params['blocks'], D, H)
    h = fused_situation_transformer(x, dm_p, aux, hp, sp)

    situation_token_transformed = h[:, 0, :]
    remaining_nodes_transformed = h[:, 5:5 + R, :]
    return situation_token_transformed, remaining_nodes_transformed


# ----------------------------------------------------------------------------
if __name__ == "__main__":
    B, R, D, H, NUM_BLOCKS = 2, 8, 32, 4, 2
    n = R + 5

    key = jax.random.PRNGKey(0)
    k_param, k_data = jax.random.split(key)
    params = init_params(k_param, D, H, NUM_BLOCKS)

    dk = jax.random.split(k_data, 6)
    dm = jax.random.uniform(dk[4], (B, n, n), jnp.float32)
    dm = 0.5 * (dm + jnp.swapaxes(dm, 1, 2))
    mask = jnp.zeros((B, n), jnp.float32).at[1, n - 2:].set(1.0)

    board = dict(
        start_nodes_batch=jax.random.uniform(dk[0], (B, 2), jnp.float32),
        end_nodes_batch=jax.random.uniform(dk[1], (B, 2), jnp.float32),
        remaining_nodes_batch=jax.random.uniform(dk[2], (B, R, 2), jnp.float32),
        tour_length_batch=jax.random.uniform(dk[3], (B, 1), jnp.float32),
        num_remaining_nodes_embedding_batch=jnp.full((B, 1), R / 20.0, jnp.float32),
        distance_matrix=dm,
        self_attention_masks_batch=mask,
        start_nodes_lookup_embedding_idcs=jnp.array([1], jnp.int32),
        end_nodes_lookup_embedding_idcs=jnp.array([1], jnp.int32),
    )

    sit, rem_t = situation_network_forward(board, params)
    jax.block_until_ready((sit, rem_t))
    assert sit.shape == (B, D)
    assert rem_t.shape == (B, R, D)
    print("KERNEL_OK")
</pallas_src>

<mosaic_0001>
module attributes {stable_mosaic.version = 11 : i64} {
  func.func @_situation_transformer_kernel(%arg0: i32, %arg1: memref<2x16x32xf32, #tpu.memory_space<vmem>>, %arg2: memref<2x16x16xf32, #tpu.memory_space<vmem>>, %arg3: memref<2x2x16xf32, #tpu.memory_space<vmem>>, %arg4: memref<7x4xf32, #tpu.memory_space<smem>>, %arg5: memref<2x32x96xf32, #tpu.memory_space<vmem>>, %arg6: memref<2x1x96xf32, #tpu.memory_space<vmem>>, %arg7: memref<2x32x32xf32, #tpu.memory_space<vmem>>, %arg8: memref<2x1x32xf32, #tpu.memory_space<vmem>>, %arg9: memref<2x1x32xf32, #tpu.memory_space<vmem>>, %arg10: memref<2x1x32xf32, #tpu.memory_space<vmem>>, %arg11: memref<2x32x128xf32, #tpu.memory_space<vmem>>, %arg12: memref<2x1x128xf32, #tpu.memory_space<vmem>>, %arg13: memref<2x128x32xf32, #tpu.memory_space<vmem>>, %arg14: memref<2x1x32xf32, #tpu.memory_space<vmem>>, %arg15: memref<2x1x32xf32, #tpu.memory_space<vmem>>, %arg16: memref<2x1x32xf32, #tpu.memory_space<vmem>>, %arg17: memref<2x16x32xf32, #tpu.memory_space<vmem>>, %arg18: memref<2x16x32xf32, #tpu.memory_space<vmem>>) attributes {dimension_semantics = [#tpu.dimension_semantics<parallel>], iteration_bounds = array<i64: 1>, scalar_prefetch = 0 : i64, scratch_operands = 1 : i64, tpu.core_type = #tpu.core_type<tc>, window_params = [{transform_indices = @transform_0, window_bounds = array<i64: 2, 16, 32>}, {transform_indices = @transform_1, window_bounds = array<i64: 2, 16, 16>}, {transform_indices = @transform_2, window_bounds = array<i64: 2, 2, 16>}, {transform_indices = @transform_3, window_bounds = array<i64: 7, 4>}, {pipeline_mode = #tpu.pipeline_mode<synchronous>, transform_indices = @transform_4, window_bounds = array<i64: 2, 32, 96>}, {pipeline_mode = #tpu.pipeline_mode<synchronous>, transform_indices = @transform_5, window_bounds = array<i64: 2, 1, 96>}, {pipeline_mode = #tpu.pipeline_mode<synchronous>, transform_indices = @transform_6, window_bounds = array<i64: 2, 32, 32>}, {pipeline_mode = #tpu.pipeline_mode<synchronous>, transform_indices = @transform_7, window_bounds = array<i64: 2, 1, 32>}, {pipeline_mode = #tpu.pipeline_mode<synchronous>, transform_indices = @transform_8, window_bounds = array<i64: 2, 1, 32>}, {pipeline_mode = #tpu.pipeline_mode<synchronous>, transform_indices = @transform_9, window_bounds = array<i64: 2, 1, 32>}, {pipeline_mode = #tpu.pipeline_mode<synchronous>, transform_indices = @transform_10, window_bounds = array<i64: 2, 32, 128>}, {pipeline_mode = #tpu.pipeline_mode<synchronous>, transform_indices = @transform_11, window_bounds = array<i64: 2, 1, 128>}, {pipeline_mode = #tpu.pipeline_mode<synchronous>, transform_indices = @transform_12, window_bounds = array<i64: 2, 128, 32>}, {pipeline_mode = #tpu.pipeline_mode<synchronous>, transform_indices = @transform_13, window_bounds = array<i64: 2, 1, 32>}, {pipeline_mode = #tpu.pipeline_mode<synchronous>, transform_indices = @transform_14, window_bounds = array<i64: 2, 1, 32>}, {pipeline_mode = #tpu.pipeline_mode<synchronous>, transform_indices = @transform_15, window_bounds = array<i64: 2, 1, 32>}, {transform_indices = @transform_16, window_bounds = array<i64: 2, 16, 32>}]} {
    %c0 = arith.constant 0 : index
    %c0_0 = arith.constant 0 : index
    %c0_1 = arith.constant 0 : index
    %0 = vector.load %arg1[%c0, %c0_0, %c0_1] : memref<2x16x32xf32, #tpu.memory_space<vmem>>, vector<2x16x32xf32>
    %1 = vector.shape_cast %0 : vector<2x16x32xf32> to vector<32x32xf32>
    %c0_2 = arith.constant 0 : index
    %c0_3 = arith.constant 0 : index
    %c0_4 = arith.constant 0 : index
    %2 = vector.load %arg2[%c0_2, %c0_3, %c0_4] : memref<2x16x16xf32, #tpu.memory_space<vmem>>, vector<2x16x16xf32>
    %c0_5 = arith.constant 0 : index
    %c0_6 = arith.constant 0 : index
    %c0_7 = arith.constant 0 : index
    %3 = vector.load %arg3[%c0_5, %c0_6, %c0_7] : memref<2x2x16xf32, #tpu.memory_space<vmem>>, vector<2x2x16xf32>
    %4 = vector.extract_strided_slice %3 {offsets = [0, 0, 0], sizes = [2, 1, 16], strides = [1, 1, 1]} : vector<2x2x16xf32> to vector<2x1x16xf32>
    %cst = arith.constant -1.000000e+09 : f32
    %5 = vector.broadcast %cst : f32 to vector<2x1x16xf32>
    %6 = arith.mulf %4, %5 : vector<2x1x16xf32>
    %7 = vector.extract_strided_slice %3 {offsets = [0, 1, 0], sizes = [2, 1, 1], strides = [1, 1, 1]} : vector<2x2x16xf32> to vector<2x1x1xf32>
    %cst_8 = arith.constant 5.000000e-01 : f32
    %8 = vector.broadcast %cst_8 : f32 to vector<2x1x1xf32>
    %9 = arith.cmpf ogt, %7, %8 : vector<2x1x1xf32>
    %10 = tpu.iota {dimensions = array<i32: 0>} : vector<16x16xi32>
    %11 = tpu.iota {dimensions = array<i32: 1>} : vector<16x16xi32>
    %12 = arith.minsi %10, %11 : vector<16x16xi32>
    %13 = arith.cmpi ne, %10, %11 : vector<16x16xi32>
    %c0_i32 = arith.constant 0 : i32
    %14 = vector.broadcast %c0_i32 : i32 to vector<16x16xi32>
    %15 = arith.cmpi eq, %12, %14 : vector<16x16xi32>
    %16 = arith.andi %13, %15 : vector<16x16xi1>
    %17 = vector.shape_cast %16 : vector<16x16xi1> to vector<1x16x16xi1>
    %c1_i32 = arith.constant 1 : i32
    %18 = vector.broadcast %c1_i32 : i32 to vector<16x16xi32>
    %19 = arith.cmpi eq, %12, %18 : vector<16x16xi32>
    %20 = arith.andi %13, %19 : vector<16x16xi1>
    %21 = vector.shape_cast %20 : vector<16x16xi1> to vector<1x16x16xi1>
    %c2_i32 = arith.constant 2 : i32
    %22 = vector.broadcast %c2_i32 : i32 to vector<16x16xi32>
    %23 = arith.cmpi eq, %12, %22 : vector<16x16xi32>
    %24 = arith.andi %13, %23 : vector<16x16xi1>
    %25 = vector.shape_cast %24 : vector<16x16xi1> to vector<1x16x16xi1>
    %c3_i32 = arith.constant 3 : i32
    %26 = vector.broadcast %c3_i32 : i32 to vector<16x16xi32>
    %27 = arith.cmpi eq, %10, %26 : vector<16x16xi32>
    %c5_i32 = arith.constant 5 : i32
    %28 = vector.broadcast %c5_i32 : i32 to vector<16x16xi32>
    %29 = arith.cmpi sge, %11, %28 : vector<16x16xi32>
    %30 = arith.andi %27, %29 : vector<16x16xi1>
    %c3_i32_9 = arith.constant 3 : i32
    %31 = vector.broadcast %c3_i32_9 : i32 to vector<16x16xi32>
    %32 = arith.cmpi eq, %11, %31 : vector<16x16xi32>
    %c5_i32_10 = arith.constant 5 : i32
    %33 = vector.broadcast %c5_i32_10 : i32 to vector<16x16xi32>
    %34 = arith.cmpi sge, %10, %33 : vector<16x16xi32>
    %35 = arith.andi %32, %34 : vector<16x16xi1>
    %36 = arith.ori %30, %35 : vector<16x16xi1>
    %37 = vector.shape_cast %36 : vector<16x16xi1> to vector<1x16x16xi1>
    %38 = vector.broadcast %37 : vector<1x16x16xi1> to vector<2x16x16xi1>
    %39 = vector.broadcast %9 : vector<2x1x1xi1> to vector<2x16x16xi1>
    %40 = arith.andi %38, %39 : vector<2x16x16xi1>
    %c4_i32 = arith.constant 4 : i32
    %41 = vector.broadcast %c4_i32 : i32 to vector<16x16xi32>
    %42 = arith.cmpi eq, %10, %41 : vector<16x16xi32>
    %c5_i32_11 = arith.constant 5 : i32
    %43 = vector.broadcast %c5_i32_11 : i32 to vector<16x16xi32>
    %44 = arith.cmpi sge, %11, %43 : vector<16x16xi32>
    %45 = arith.andi %42, %44 : vector<16x16xi1>
    %c4_i32_12 = arith.constant 4 : i32
    %46 = vector.broadcast %c4_i32_12 : i32 to vector<16x16xi32>
    %47 = arith.cmpi eq, %11, %46 : vector<16x16xi32>
    %c5_i32_13 = arith.constant 5 : i32
    %48 = vector.broadcast %c5_i32_13 : i32 to vector<16x16xi32>
    %49 = arith.cmpi sge, %10, %48 : vector<16x16xi32>
    %50 = arith.andi %47, %49 : vector<16x16xi1>
    %51 = arith.ori %45, %50 : vector<16x16xi1>
    %52 = vector.shape_cast %51 : vector<16x16xi1> to vector<1x16x16xi1>
    %53 = vector.broadcast %52 : vector<1x16x16xi1> to vector<2x16x16xi1>
    %54 = vector.broadcast %9 : vector<2x1x1xi1> to vector<2x16x16xi1>
    %55 = arith.andi %53, %54 : vector<2x16x16xi1>
    %c0_14 = arith.constant 0 : index
    %c0_15 = arith.constant 0 : index
    %56 = memref.load %arg4[%c0_14, %c0_15] : memref<7x4xf32, #tpu.memory_space<smem>>
    %57 = vector.broadcast %56 : f32 to vector<2x16x16xf32>
    %58 = arith.mulf %2, %57 : vector<2x16x16xf32>
    %c1 = arith.constant 1 : index
    %c0_16 = arith.constant 0 : index
    %59 = memref.load %arg4[%c1, %c0_16] : memref<7x4xf32, #tpu.memory_space<smem>>
    %60 = vector.broadcast %59 : f32 to vector<2x16x16xf32>
    %61 = arith.addf %58, %60 : vector<2x16x16xf32>
    %c2 = arith.constant 2 : index
    %c0_17 = arith.constant 0 : index
    %62 = memref.load %arg4[%c2, %c0_17] : memref<7x4xf32, #tpu.memory_space<smem>>
    %63 = vector.shape_cast %17 : vector<1x16x16xi1> to vector<1x16x16xi1>
    %64 = vector.broadcast %63 : vector<1x16x16xi1> to vector<2x16x16xi1>
    %65 = vector.broadcast %62 : f32 to vector<2x16x16xf32>
    %66 = arith.select %64, %65, %61 : vector<2x16x16xi1>, vector<2x16x16xf32>
    %c3 = arith.constant 3 : index
    %c0_18 = arith.constant 0 : index
    %67 = memref.load %arg4[%c3, %c0_18] : memref<7x4xf32, #tpu.memory_space<smem>>
    %68 = vector.shape_cast %21 : vector<1x16x16xi1> to vector<1x16x16xi1>
    %69 = vector.broadcast %68 : vector<1x16x16xi1> to vector<2x16x16xi1>
    %70 = vector.broadcast %67 : f32 to vector<2x16x16xf32>
    %71 = arith.select %69, %70, %66 : vector<2x16x16xi1>, vector<2x16x16xf32>
    %c4 = arith.constant 4 : index
    %c0_19 = arith.constant 0 : index
    %72 = memref.load %arg4[%c4, %c0_19] : memref<7x4xf32, #tpu.memory_space<smem>>
    %73 = vector.shape_cast %25 : vector<1x16x16xi1> to vector<1x16x16xi1>
    %74 = vector.broadcast %73 : vector<1x16x16xi1> to vector<2x16x16xi1>
    %75 = vector.broadcast %72 : f32 to vector<2x16x16xf32>
    %76 = arith.select %74, %75, %71 : vector<2x16x16xi1>, vector<2x16x16xf32>
    %c5 = arith.constant 5 : index
    %c0_20 = arith.constant 0 : index
    %77 = memref.load %arg4[%c5, %c0_20] : memref<7x4xf32, #tpu.memory_space<smem>>
    %78 = vector.broadcast %77 : f32 to vector<2x16x16xf32>
    %79 = arith.select %40, %78, %76 : vector<2x16x16xi1>, vector<2x16x16xf32>
    %c6 = arith.constant 6 : index
    %c0_21 = arith.constant 0 : index
    %80 = memref.load %arg4[%c6, %c0_21] : memref<7x4xf32, #tpu.memory_space<smem>>
    %81 = vector.broadcast %80 : f32 to vector<2x16x16xf32>
    %82 = arith.select %55, %81, %79 : vector<2x16x16xi1>, vector<2x16x16xf32>
    %83 = vector.broadcast %6 : vector<2x1x16xf32> to vector<2x16x16xf32>
    %84 = arith.addf %82, %83 : vector<2x16x16xf32>
    %c0_22 = arith.constant 0 : index
    %c1_23 = arith.constant 1 : index
    %85 = memref.load %arg4[%c0_22, %c1_23] : memref<7x4xf32, #tpu.memory_space<smem>>
    %86 = vector.broadcast %85 : f32 to vector<2x16x16xf32>
    %87 = arith.mulf %2, %86 : vector<2x16x16xf32>
    %c1_24 = arith.constant 1 : index
    %c1_25 = arith.constant 1 : index
    %88 = memref.load %arg4[%c1_24, %c1_25] : memref<7x4xf32, #tpu.memory_space<smem>>
    %89 = vector.broadcast %88 : f32 to vector<2x16x16xf32>
    %90 = arith.addf %87, %89 : vector<2x16x16xf32>
    %c2_26 = arith.constant 2 : index
    %c1_27 = arith.constant 1 : index
    %91 = memref.load %arg4[%c2_26, %c1_27] : memref<7x4xf32, #tpu.memory_space<smem>>
    %92 = vector.shape_cast %17 : vector<1x16x16xi1> to vector<1x16x16xi1>
    %93 = vector.broadcast %92 : vector<1x16x16xi1> to vector<2x16x16xi1>
    %94 = vector.broadcast %91 : f32 to vector<2x16x16xf32>
    %95 = arith.select %93, %94, %90 : vector<2x16x16xi1>, vector<2x16x16xf32>
    %c3_28 = arith.constant 3 : index
    %c1_29 = arith.constant 1 : index
    %96 = memref.load %arg4[%c3_28, %c1_29] : memref<7x4xf32, #tpu.memory_space<smem>>
    %97 = vector.shape_cast %21 : vector<1x16x16xi1> to vector<1x16x16xi1>
    %98 = vector.broadcast %97 : vector<1x16x16xi1> to vector<2x16x16xi1>
    %99 = vector.broadcast %96 : f32 to vector<2x16x16xf32>
    %100 = arith.select %98, %99, %95 : vector<2x16x16xi1>, vector<2x16x16xf32>
    %c4_30 = arith.constant 4 : index
    %c1_31 = arith.constant 1 : index
    %101 = memref.load %arg4[%c4_30, %c1_31] : memref<7x4xf32, #tpu.memory_space<smem>>
    %102 = vector.shape_cast %25 : vector<1x16x16xi1> to vector<1x16x16xi1>
    %103 = vector.broadcast %102 : vector<1x16x16xi1> to vector<2x16x16xi1>
    %104 = vector.broadcast %101 : f32 to vector<2x16x16xf32>
    %105 = arith.select %103, %104, %100 : vector<2x16x16xi1>, vector<2x16x16xf32>
    %c5_32 = arith.constant 5 : index
    %c1_33 = arith.constant 1 : index
    %106 = memref.load %arg4[%c5_32, %c1_33] : memref<7x4xf32, #tpu.memory_space<smem>>
    %107 = vector.broadcast %106 : f32 to vector<2x16x16xf32>
    %108 = arith.select %40, %107, %105 : vector<2x16x16xi1>, vector<2x16x16xf32>
    %c6_34 = arith.constant 6 : index
    %c1_35 = arith.constant 1 : index
    %109 = memref.load %arg4[%c6_34, %c1_35] : memref<7x4xf32, #tpu.memory_space<smem>>
    %110 = vector.broadcast %109 : f32 to vector<2x16x16xf32>
    %111 = arith.select %55, %110, %108 : vector<2x16x16xi1>, vector<2x16x16xf32>
    %112 = vector.broadcast %6 : vector<2x1x16xf32> to vector<2x16x16xf32>
    %113 = arith.addf %111, %112 : vector<2x16x16xf32>
    %c0_36 = arith.constant 0 : index
    %c2_37 = arith.constant 2 : index
    %114 = memref.load %arg4[%c0_36, %c2_37] : memref<7x4xf32, #tpu.memory_space<smem>>
    %115 = vector.broadcast %114 : f32 to vector<2x16x16xf32>
    %116 = arith.mulf %2, %115 : vector<2x16x16xf32>
    %c1_38 = arith.constant 1 : index
    %c2_39 = arith.constant 2 : index
    %117 = memref.load %arg4[%c1_38, %c2_39] : memref<7x4xf32, #tpu.memory_space<smem>>
    %118 = vector.broadcast %117 : f32 to vector<2x16x16xf32>
    %119 = arith.addf %116, %118 : vector<2x16x16xf32>
    %c2_40 = arith.constant 2 : index
    %c2_41 = arith.constant 2 : index
    %120 = memref.load %arg4[%c2_40, %c2_41] : memref<7x4xf32, #tpu.memory_space<smem>>
    %121 = vector.shape_cast %17 : vector<1x16x16xi1> to vector<1x16x16xi1>
    %122 = vector.broadcast %121 : vector<1x16x16xi1> to vector<2x16x16xi1>
    %123 = vector.broadcast %120 : f32 to vector<2x16x16xf32>
    %124 = arith.select %122, %123, %119 : vector<2x16x16xi1>, vector<2x16x16xf32>
    %c3_42 = arith.constant 3 : index
    %c2_43 = arith.constant 2 : index
    %125 = memref.load %arg4[%c3_42, %c2_43] : memref<7x4xf32, #tpu.memory_space<smem>>
    %126 = vector.shape_cast %21 : vector<1x16x16xi1> to vector<1x16x16xi1>
    %127 = vector.broadcast %126 : vector<1x16x16xi1> to vector<2x16x16xi1>
    %128 = vector.broadcast %125 : f32 to vector<2x16x16xf32>
    %129 = arith.select %127, %128, %124 : vector<2x16x16xi1>, vector<2x16x16xf32>
    %c4_44 = arith.constant 4 : index
    %c2_45 = arith.constant 2 : index
    %130 = memref.load %arg4[%c4_44, %c2_45] : memref<7x4xf32, #tpu.memory_space<smem>>
    %131 = vector.shape_cast %25 : vector<1x16x16xi1> to vector<1x16x16xi1>
    %132 = vector.broadcast %131 : vector<1x16x16xi1> to vector<2x16x16xi1>
    %133 = vector.broadcast %130 : f32 to vector<2x16x16xf32>
    %134 = arith.select %132, %133, %129 : vector<2x16x16xi1>, vector<2x16x16xf32>
    %c5_46 = arith.constant 5 : index
    %c2_47 = arith.constant 2 : index
    %135 = memref.load %arg4[%c5_46, %c2_47] : memref<7x4xf32, #tpu.memory_space<smem>>
    %136 = vector.broadcast %135 : f32 to vector<2x16x16xf32>
    %137 = arith.select %40, %136, %134 : vector<2x16x16xi1>, vector<2x16x16xf32>
    %c6_48 = arith.constant 6 : index
    %c2_49 = arith.constant 2 : index
    %138 = memref.load %arg4[%c6_48, %c2_49] : memref<7x4xf32, #tpu.memory_space<smem>>
    %139 = vector.broadcast %138 : f32 to vector<2x16x16xf32>
    %140 = arith.select %55, %139, %137 : vector<2x16x16xi1>, vector<2x16x16xf32>
    %141 = vector.broadcast %6 : vector<2x1x16xf32> to vector<2x16x16xf32>
    %142 = arith.addf %140, %141 : vector<2x16x16xf32>
    %c0_50 = arith.constant 0 : index
    %c3_51 = arith.constant 3 : index
    %143 = memref.load %arg4[%c0_50, %c3_51] : memref<7x4xf32, #tpu.memory_space<smem>>
    %144 = vector.broadcast %143 : f32 to vector<2x16x16xf32>
    %145 = arith.mulf %2, %144 : vector<2x16x16xf32>
    %c1_52 = arith.constant 1 : index
    %c3_53 = arith.constant 3 : index
    %146 = memref.load %arg4[%c1_52, %c3_53] : memref<7x4xf32, #tpu.memory_space<smem>>
    %147 = vector.broadcast %146 : f32 to vector<2x16x16xf32>
    %148 = arith.addf %145, %147 : vector<2x16x16xf32>
    %c2_54 = arith.constant 2 : index
    %c3_55 = arith.constant 3 : index
    %149 = memref.load %arg4[%c2_54, %c3_55] : memref<7x4xf32, #tpu.memory_space<smem>>
    %150 = vector.shape_cast %17 : vector<1x16x16xi1> to vector<1x16x16xi1>
    %151 = vector.broadcast %150 : vector<1x16x16xi1> to vector<2x16x16xi1>
    %152 = vector.broadcast %149 : f32 to vector<2x16x16xf32>
    %153 = arith.select %151, %152, %148 : vector<2x16x16xi1>, vector<2x16x16xf32>
    %c3_56 = arith.constant 3 : index
    %c3_57 = arith.constant 3 : index
    %154 = memref.load %arg4[%c3_56, %c3_57] : memref<7x4xf32, #tpu.memory_space<smem>>
    %155 = vector.shape_cast %21 : vector<1x16x16xi1> to vector<1x16x16xi1>
    %156 = vector.broadcast %155 : vector<1x16x16xi1> to vector<2x16x16xi1>
    %157 = vector.broadcast %154 : f32 to vector<2x16x16xf32>
    %158 = arith.select %156, %157, %153 : vector<2x16x16xi1>, vector<2x16x16xf32>
    %c4_58 = arith.constant 4 : index
    %c3_59 = arith.constant 3 : index
    %159 = memref.load %arg4[%c4_58, %c3_59] : memref<7x4xf32, #tpu.memory_space<smem>>
    %160 = vector.shape_cast %25 : vector<1x16x16xi1> to vector<1x16x16xi1>
    %161 = vector.broadcast %160 : vector<1x16x16xi1> to vector<2x16x16xi1>
    %162 = vector.broadcast %159 : f32 to vector<2x16x16xf32>
    %163 = arith.select %161, %162, %158 : vector<2x16x16xi1>, vector<2x16x16xf32>
    %c5_60 = arith.constant 5 : index
    %c3_61 = arith.constant 3 : index
    %164 = memref.load %arg4[%c5_60, %c3_61] : memref<7x4xf32, #tpu.memory_space<smem>>
    %165 = vector.broadcast %164 : f32 to vector<2x16x16xf32>
    %166 = arith.select %40, %165, %163 : vector<2x16x16xi1>, vector<2x16x16xf32>
    %c6_62 = arith.constant 6 : index
    %c3_63 = arith.constant 3 : index
    %167 = memref.load %arg4[%c6_62, %c3_63] : memref<7x4xf32, #tpu.memory_space<smem>>
    %168 = vector.broadcast %167 : f32 to vector<2x16x16xf32>
    %169 = arith.select %55, %168, %166 : vector<2x16x16xi1>, vector<2x16x16xf32>
    %170 = vector.broadcast %6 : vector<2x1x16xf32> to vector<2x16x16xf32>
    %171 = arith.addf %169, %170 : vector<2x16x16xf32>
    %c0_i32_64 = arith.constant 0 : i32
    %172 = arith.index_cast %c0_i32_64 : i32 to index
    %c0_65 = arith.constant 0 : index
    %c0_66 = arith.constant 0 : index
    %173 = vector.load %arg5[%172, %c0_65, %c0_66] : memref<2x32x96xf32, #tpu.memory_space<vmem>>, vector<1x32x96xf32>
    %174 = vector.shape_cast %173 : vector<1x32x96xf32> to vector<32x96xf32>
    %cst_67 = arith.constant dense<0.000000e+00> : vector<32x96xf32>
    %175 = tpu.matmul %1, %174, %cst_67 {dimension_numbers = #tpu.dot_dimension_numbers<[1], [0], [0], [1], [0, 0, 1, 1], [], []>} : vector<32x32xf32>, vector<32x96xf32>, vector<32x96xf32> -> vector<32x96xf32>
    %176 = arith.index_cast %c0_i32_64 : i32 to index
    %c0_68 = arith.constant 0 : index
    %c0_69 = arith.constant 0 : index
    %177 = vector.load %arg6[%176, %c0_68, %c0_69] : memref<2x1x96xf32, #tpu.memory_space<vmem>>, vector<1x1x96xf32>
    %178 = vector.shape_cast %177 : vector<1x1x96xf32> to vector<1x96xf32>
    %179 = vector.broadcast %178 : vector<1x96xf32> to vector<32x96xf32>
    %180 = arith.addf %175, %179 : vector<32x96xf32>
    %181 = vector.shape_cast %180 : vector<32x96xf32> to vector<2x16x96xf32>
    %182 = vector.extract_strided_slice %181 {offsets = [0, 0, 0], sizes = [2, 16, 8], strides = [1, 1, 1]} : vector<2x16x96xf32> to vector<2x16x8xf32>
    %183 = vector.extract_strided_slice %181 {offsets = [0, 0, 32], sizes = [2, 16, 8], strides = [1, 1, 1]} : vector<2x16x96xf32> to vector<2x16x8xf32>
    %184 = vector.extract_strided_slice %181 {offsets = [0, 0, 64], sizes = [2, 16, 8], strides = [1, 1, 1]} : vector<2x16x96xf32> to vector<2x16x8xf32>
    "tpu.trace_start"() <{level = 10 : i32, message = "bqd,bkd->bqk"}> : () -> ()
    %cst_70 = arith.constant dense<0.000000e+00> : vector<2x16x16xf32>
    %185 = tpu.matmul %182, %183, %cst_70 {dimension_numbers = #tpu.dot_dimension_numbers<[2], [2], [1], [1], [0, 0, 0, 1, 1, 1], [0], [0]>} : vector<2x16x8xf32>, vector<2x16x8xf32>, vector<2x16x16xf32> -> vector<2x16x16xf32>
    "tpu.trace_stop"() : () -> ()
    %186 = arith.addf %185, %84 : vector<2x16x16xf32>
    %cst_71 = arith.constant dense<0xFF800000> : vector<2x16xf32>
    %187 = vector.multi_reduction <maximumf>, %186, %cst_71 [2] : vector<2x16x16xf32> to vector<2x16xf32>
    %188 = vector.shape_cast %187 : vector<2x16xf32> to vector<2x16x1xf32>
    %189 = vector.broadcast %188 : vector<2x16x1xf32> to vector<2x16x16xf32>
    %190 = arith.subf %186, %189 : vector<2x16x16xf32>
    %191 = math.exp %190 : vector<2x16x16xf32>
    %cst_72 = arith.constant dense<0.000000e+00> : vector<2x16xf32>
    %192 = vector.multi_reduction <add>, %191, %cst_72 [2] : vector<2x16x16xf32> to vector<2x16xf32>
    %193 = vector.shape_cast %192 : vector<2x16xf32> to vector<2x16x1xf32>
    %194 = tpu.reciprocal %193 {approx = true} : vector<2x16x1xf32> -> vector<2x16x1xf32>
    %195 = vector.broadcast %194 : vector<2x16x1xf32> to vector<2x16x16xf32>
    %196 = arith.mulf %191, %195 : vector<2x16x16xf32>
    "tpu.trace_start"() <{level = 10 : i32, message = "bqk,bkd->bqd"}> : () -> ()
    %cst_73 = arith.constant dense<0.000000e+00> : vector<2x16x8xf32>
    %197 = tpu.matmul %196, %184, %cst_73 {dimension_numbers = #tpu.dot_dimension_numbers<[2], [1], [1], [2], [0, 0, 0, 1, 1, 2], [0], [0]>} : vector<2x16x16xf32>, vector<2x16x8xf32>, vector<2x16x8xf32> -> vector<2x16x8xf32>
    "tpu.trace_stop"() : () -> ()
    %c0_74 = arith.constant 0 : index
    %c0_75 = arith.constant 0 : index
    %c0_76 = arith.constant 0 : index
    %198 = vector.load %arg18[%c0_74, %c0_75, %c0_76] : memref<2x16x32xf32, #tpu.memory_space<vmem>>, vector<2x16x8xf32>
    tpu.vector_store %arg18[%c0_74, %c0_75, %c0_76], %197 {strides = array<i32>} : memref<2x16x32xf32, #tpu.memory_space<vmem>>, vector<2x16x8xf32>,
    %199 = vector.extract_strided_slice %181 {offsets = [0, 0, 8], sizes = [2, 16, 8], strides = [1, 1, 1]} : vector<2x16x96xf32> to vector<2x16x8xf32>
    %200 = vector.extract_strided_slice %181 {offsets = [0, 0, 40], sizes = [2, 16, 8], strides = [1, 1, 1]} : vector<2x16x96xf32> to vector<2x16x8xf32>
    %201 = vector.extract_strided_slice %181 {offsets = [0, 0, 72], sizes = [2, 16, 8], strides = [1, 1, 1]} : vector<2x16x96xf32> to vector<2x16x8xf32>
    "tpu.trace_start"() <{level = 10 : i32, message = "bqd,bkd->bqk"}> : () -> ()
    %cst_77 = arith.constant dense<0.000000e+00> : vector<2x16x16xf32>
    %202 = tpu.matmul %199, %200, %cst_77 {dimension_numbers = #tpu.dot_dimension_numbers<[2], [2], [1], [1], [0, 0, 0, 1, 1, 1], [0], [0]>} : vector<2x16x8xf32>, vector<2x16x8xf32>, vector<2x16x16xf32> -> vector<2x16x16xf32>
    "tpu.trace_stop"() : () -> ()
    %203 = arith.addf %202, %113 : vector<2x16x16xf32>
    %cst_78 = arith.constant dense<0xFF800000> : vector<2x16xf32>
    %204 = vector.multi_reduction <maximumf>, %203, %cst_78 [2] : vector<2x16x16xf32> to vector<2x16xf32>
    %205 = vector.shape_cast %204 : vector<2x16xf32> to vector<2x16x1xf32>
    %206 = vector.broadcast %205 : vector<2x16x1xf32> to vector<2x16x16xf32>
    %207 = arith.subf %203, %206 : vector<2x16x16xf32>
    %208 = math.exp %207 : vector<2x16x16xf32>
    %cst_79 = arith.constant dense<0.000000e+00> : vector<2x16xf32>
    %209 = vector.multi_reduction <add>, %208, %cst_79 [2] : vector<2x16x16xf32> to vector<2x16xf32>
    %210 = vector.shape_cast %209 : vector<2x16xf32> to vector<2x16x1xf32>
    %211 = tpu.reciprocal %210 {approx = true} : vector<2x16x1xf32> -> vector<2x16x1xf32>
    %212 = vector.broadcast %211 : vector<2x16x1xf32> to vector<2x16x16xf32>
    %213 = arith.mulf %208, %212 : vector<2x16x16xf32>
    "tpu.trace_start"() <{level = 10 : i32, message = "bqk,bkd->bqd"}> : () -> ()
    %cst_80 = arith.constant dense<0.000000e+00> : vector<2x16x8xf32>
    %214 = tpu.matmul %213, %201, %cst_80 {dimension_numbers = #tpu.dot_dimension_numbers<[2], [1], [1], [2], [0, 0, 0, 1, 1, 2], [0], [0]>} : vector<2x16x16xf32>, vector<2x16x8xf32>, vector<2x16x8xf32> -> vector<2x16x8xf32>
    "tpu.trace_stop"() : () -> ()
    %c0_81 = arith.constant 0 : index
    %c0_82 = arith.constant 0 : index
    %c8 = arith.constant 8 : index
    %215 = vector.load %arg18[%c0_81, %c0_82, %c8] : memref<2x16x32xf32, #tpu.memory_space<vmem>>, vector<2x16x8xf32>
    tpu.vector_store %arg18[%c0_81, %c0_82, %c8], %214 {strides = array<i32>} : memref<2x16x32xf32, #tpu.memory_space<vmem>>, vector<2x16x8xf32>,
    %216 = vector.extract_strided_slice %181 {offsets = [0, 0, 16], sizes = [2, 16, 8], strides = [1, 1, 1]} : vector<2x16x96xf32> to vector<2x16x8xf32>
    %217 = vector.extract_strided_slice %181 {offsets = [0, 0, 48], sizes = [2, 16, 8], strides = [1, 1, 1]} : vector<2x16x96xf32> to vector<2x16x8xf32>
    %218 = vector.extract_strided_slice %181 {offsets = [0, 0, 80], sizes = [2, 16, 8], strides = [1, 1, 1]} : vector<2x16x96xf32> to vector<2x16x8xf32>
    "tpu.trace_start"() <{level = 10 : i32, message = "bqd,bkd->bqk"}> : () -> ()
    %cst_83 = arith.constant dense<0.000000e+00> : vector<2x16x16xf32>
    %219 = tpu.matmul %216, %217, %cst_83 {dimension_numbers = #tpu.dot_dimension_numbers<[2], [2], [1], [1], [0, 0, 0, 1, 1, 1], [0], [0]>} : vector<2x16x8xf32>, vector<2x16x8xf32>, vector<2x16x16xf32> -> vector<2x16x16xf32>
    "tpu.trace_stop"() : () -> ()
    %220 = arith.addf %219, %142 : vector<2x16x16xf32>
    %cst_84 = arith.constant dense<0xFF800000> : vector<2x16xf32>
    %221 = vector.multi_reduction <maximumf>, %220, %cst_84 [2] : vector<2x16x16xf32> to vector<2x16xf32>
    %222 = vector.shape_cast %221 : vector<2x16xf32> to vector<2x16x1xf32>
    %223 = vector.broadcast %222 : vector<2x16x1xf32> to vector<2x16x16xf32>
    %224 = arith.subf %220, %223 : vector<2x16x16xf32>
    %225 = math.exp %224 : vector<2x16x16xf32>
    %cst_85 = arith.constant dense<0.000000e+00> : vector<2x16xf32>
    %226 = vector.multi_reduction <add>, %225, %cst_85 [2] : vector<2x16x16xf32> to vector<2x16xf32>
    %227 = vector.shape_cast %226 : vector<2x16xf32> to vector<2x16x1xf32>
    %228 = tpu.reciprocal %227 {approx = true} : vector<2x16x1xf32> -> vector<2x16x1xf32>
    %229 = vector.broadcast %228 : vector<2x16x1xf32> to vector<2x16x16xf32>
    %230 = arith.mulf %225, %229 : vector<2x16x16xf32>
    "tpu.trace_start"() <{level = 10 : i32, message = "bqk,bkd->bqd"}> : () -> ()
    %cst_86 = arith.constant dense<0.000000e+00> : vector<2x16x8xf32>
    %231 = tpu.matmul %230, %218, %cst_86 {dimension_numbers = #tpu.dot_dimension_numbers<[2], [1], [1], [2], [0, 0, 0, 1, 1, 2], [0], [0]>} : vector<2x16x16xf32>, vector<2x16x8xf32>, vector<2x16x8xf32> -> vector<2x16x8xf32>
    "tpu.trace_stop"() : () -> ()
    %c0_87 = arith.constant 0 : index
    %c0_88 = arith.constant 0 : index
    %c16 = arith.constant 16 : index
    %232 = vector.load %arg18[%c0_87, %c0_88, %c16] : memref<2x16x32xf32, #tpu.memory_space<vmem>>, vector<2x16x8xf32>
    tpu.vector_store %arg18[%c0_87, %c0_88, %c16], %231 {strides = array<i32>} : memref<2x16x32xf32, #tpu.memory_space<vmem>>, vector<2x16x8xf32>,
    %233 = vector.extract_strided_slice %181 {offsets = [0, 0, 24], sizes = [2, 16, 8], strides = [1, 1, 1]} : vector<2x16x96xf32> to vector<2x16x8xf32>
    %234 = vector.extract_strided_slice %181 {offsets = [0, 0, 56], sizes = [2, 16, 8], strides = [1, 1, 1]} : vector<2x16x96xf32> to vector<2x16x8xf32>
    %235 = vector.extract_strided_slice %181 {offsets = [0, 0, 88], sizes = [2, 16, 8], strides = [1, 1, 1]} : vector<2x16x96xf32> to vector<2x16x8xf32>
    "tpu.trace_start"() <{level = 10 : i32, message = "bqd,bkd->bqk"}> : () -> ()
    %cst_89 = arith.constant dense<0.000000e+00> : vector<2x16x16xf32>
    %236 = tpu.matmul %233, %234, %cst_89 {dimension_numbers = #tpu.dot_dimension_numbers<[2], [2], [1], [1], [0, 0, 0, 1, 1, 1], [0], [0]>} : vector<2x16x8xf32>, vector<2x16x8xf32>, vector<2x16x16xf32> -> vector<2x16x16xf32>
    "tpu.trace_stop"() : () -> ()
    %237 = arith.addf %236, %171 : vector<2x16x16xf32>
    %cst_90 = arith.constant dense<0xFF800000> : vector<2x16xf32>
    %238 = vector.multi_reduction <maximumf>, %237, %cst_90 [2] : vector<2x16x16xf32> to vector<2x16xf32>
    %239 = vector.shape_cast %238 : vector<2x16xf32> to vector<2x16x1xf32>
    %240 = vector.broadcast %239 : vector<2x16x1xf32> to vector<2x16x16xf32>
    %241 = arith.subf %237, %240 : vector<2x16x16xf32>
    %242 = math.exp %241 : vector<2x16x16xf32>
    %cst_91 = arith.constant dense<0.000000e+00> : vector<2x16xf32>
    %243 = vector.multi_reduction <add>, %242, %cst_91 [2] : vector<2x16x16xf32> to vector<2x16xf32>
    %244 = vector.shape_cast %243 : vector<2x16xf32> to vector<2x16x1xf32>
    %245 = tpu.reciprocal %244 {approx = true} : vector<2x16x1xf32> -> vector<2x16x1xf32>
    %246 = vector.broadcast %245 : vector<2x16x1xf32> to vector<2x16x16xf32>
    %247 = arith.mulf %242, %246 : vector<2x16x16xf32>
    "tpu.trace_start"() <{level = 10 : i32, message = "bqk,bkd->bqd"}> : () -> ()
    %cst_92 = arith.constant dense<0.000000e+00> : vector<2x16x8xf32>
    %248 = tpu.matmul %247, %235, %cst_92 {dimension_numbers = #tpu.dot_dimension_numbers<[2], [1], [1], [2], [0, 0, 0, 1, 1, 2], [0], [0]>} : vector<2x16x16xf32>, vector<2x16x8xf32>, vector<2x16x8xf32> -> vector<2x16x8xf32>
    "tpu.trace_stop"() : () -> ()
    %c0_93 = arith.constant 0 : index
    %c0_94 = arith.constant 0 : index
    %c24 = arith.constant 24 : index
    %249 = vector.load %arg18[%c0_93, %c0_94, %c24] : memref<2x16x32xf32, #tpu.memory_space<vmem>>, vector<2x16x8xf32>
    tpu.vector_store %arg18[%c0_93, %c0_94, %c24], %248 {strides = array<i32>} : memref<2x16x32xf32, #tpu.memory_space<vmem>>, vector<2x16x8xf32>,
    %c0_95 = arith.constant 0 : index
    %c0_96 = arith.constant 0 : index
    %c0_97 = arith.constant 0 : index
    %250 = vector.load %arg18[%c0_95, %c0_96, %c0_97] : memref<2x16x32xf32, #tpu.memory_space<vmem>>, vector<2x16x32xf32>
    %251 = vector.shape_cast %250 : vector<2x16x32xf32> to vector<32x32xf32>
    %252 = arith.index_cast %c0_i32_64 : i32 to index
    %c0_98 = arith.constant 0 : index
    %c0_99 = arith.constant 0 : index
    %253 = vector.load %arg7[%252, %c0_98, %c0_99] : memref<2x32x32xf32, #tpu.memory_space<vmem>>, vector<1x32x32xf32>
    %254 = vector.shape_cast %253 : vector<1x32x32xf32> to vector<32x32xf32>
    %cst_100 = arith.constant dense<0.000000e+00> : vector<32x32xf32>
    %255 = tpu.matmul %251, %254, %cst_100 {dimension_numbers = #tpu.dot_dimension_numbers<[1], [0], [0], [1], [0, 0, 1, 1], [], []>} : vector<32x32xf32>, vector<32x32xf32>, vector<32x32xf32> -> vector<32x32xf32>
    %256 = arith.index_cast %c0_i32_64 : i32 to index
    %c0_101 = arith.constant 0 : index
    %c0_102 = arith.constant 0 : index
    %257 = vector.load %arg8[%256, %c0_101, %c0_102] : memref<2x1x32xf32, #tpu.memory_space<vmem>>, vector<1x1x32xf32>
    %258 = vector.shape_cast %257 : vector<1x1x32xf32> to vector<1x32xf32>
    %259 = vector.broadcast %258 : vector<1x32xf32> to vector<32x32xf32>
    %260 = arith.addf %255, %259 : vector<32x32xf32>
    %261 = arith.addf %1, %260 : vector<32x32xf32>
    %262 = arith.index_cast %c0_i32_64 : i32 to index
    %c0_103 = arith.constant 0 : index
    %c0_104 = arith.constant 0 : index
    %263 = vector.load %arg9[%262, %c0_103, %c0_104] : memref<2x1x32xf32, #tpu.memory_space<vmem>>, vector<1x1x32xf32>
    %264 = vector.shape_cast %263 : vector<1x1x32xf32> to vector<1x32xf32>
    %265 = arith.index_cast %c0_i32_64 : i32 to index
    %c0_105 = arith.constant 0 : index
    %c0_106 = arith.constant 0 : index
    %266 = vector.load %arg10[%265, %c0_105, %c0_106] : memref<2x1x32xf32, #tpu.memory_space<vmem>>, vector<1x1x32xf32>
    %267 = vector.shape_cast %266 : vector<1x1x32xf32> to vector<1x32xf32>
    %cst_107 = arith.constant dense<0.000000e+00> : vector<32xf32>
    %268 = vector.multi_reduction <add>, %261, %cst_107 [1] : vector<32x32xf32> to vector<32xf32>
    %269 = vector.shape_cast %268 : vector<32xf32> to vector<32x1xf32>
    %cst_108 = arith.constant 3.200000e+01 : f32
    %270 = vector.broadcast %cst_108 : f32 to vector<32x1xf32>
    %271 = arith.divf %269, %270 : vector<32x1xf32>
    %272 = vector.broadcast %271 : vector<32x1xf32> to vector<32x32xf32>
    %273 = arith.subf %261, %272 : vector<32x32xf32>
    %274 = arith.mulf %273, %273 : vector<32x32xf32>
    %cst_109 = arith.constant dense<0.000000e+00> : vector<32xf32>
    %275 = vector.multi_reduction <add>, %274, %cst_109 [1] : vector<32x32xf32> to vector<32xf32>
    %276 = vector.shape_cast %275 : vector<32xf32> to vector<32x1xf32>
    %cst_110 = arith.constant 3.200000e+01 : f32
    %277 = vector.broadcast %cst_110 : f32 to vector<32x1xf32>
    %278 = arith.divf %276, %277 : vector<32x1xf32>
    %279 = vector.broadcast %271 : vector<32x1xf32> to vector<32x32xf32>
    %280 = arith.subf %261, %279 : vector<32x32xf32>
    %cst_111 = arith.constant 9.99999974E-6 : f32
    %281 = vector.broadcast %cst_111 : f32 to vector<32x1xf32>
    %282 = arith.addf %278, %281 : vector<32x1xf32>
    %283 = math.rsqrt %282 : vector<32x1xf32>
    %284 = vector.broadcast %283 : vector<32x1xf32> to vector<32x32xf32>
    %285 = arith.mulf %280, %284 : vector<32x32xf32>
    %286 = vector.broadcast %264 : vector<1x32xf32> to vector<32x32xf32>
    %287 = arith.mulf %285, %286 : vector<32x32xf32>
    %288 = vector.broadcast %267 : vector<1x32xf32> to vector<32x32xf32>
    %289 = arith.addf %287, %288 : vector<32x32xf32>
    %290 = arith.index_cast %c0_i32_64 : i32 to index
    %c0_112 = arith.constant 0 : index
    %c0_113 = arith.constant 0 : index
    %291 = vector.load %arg11[%290, %c0_112, %c0_113] : memref<2x32x128xf32, #tpu.memory_space<vmem>>, vector<1x32x128xf32>
    %292 = vector.shape_cast %291 : vector<1x32x128xf32> to vector<32x128xf32>
    %cst_114 = arith.constant dense<0.000000e+00> : vector<32x128xf32>
    %293 = tpu.matmul %289, %292, %cst_114 {dimension_numbers = #tpu.dot_dimension_numbers<[1], [0], [0], [1], [0, 0, 1, 1], [], []>} : vector<32x32xf32>, vector<32x128xf32>, vector<32x128xf32> -> vector<32x128xf32>
    %294 = arith.index_cast %c0_i32_64 : i32 to index
    %c0_115 = arith.constant 0 : index
    %c0_116 = arith.constant 0 : index
    %295 = vector.load %arg12[%294, %c0_115, %c0_116] : memref<2x1x128xf32, #tpu.memory_space<vmem>>, vector<1x1x128xf32>
    %296 = vector.shape_cast %295 : vector<1x1x128xf32> to vector<1x128xf32>
    %297 = vector.broadcast %296 : vector<1x128xf32> to vector<32x128xf32>
    %298 = arith.addf %293, %297 : vector<32x128xf32>
    %cst_117 = arith.constant 0.000000e+00 : f32
    %299 = vector.broadcast %cst_117 : f32 to vector<32x128xf32>
    %300 = arith.maximumf %298, %299 : vector<32x128xf32>
    %301 = arith.index_cast %c0_i32_64 : i32 to index
    %c0_118 = arith.constant 0 : index
    %c0_119 = arith.constant 0 : index
    %302 = vector.load %arg13[%301, %c0_118, %c0_119] : memref<2x128x32xf32, #tpu.memory_space<vmem>>, vector<1x128x32xf32>
    %303 = vector.shape_cast %302 : vector<1x128x32xf32> to vector<128x32xf32>
    %cst_120 = arith.constant dense<0.000000e+00> : vector<32x32xf32>
    %304 = tpu.matmul %300, %303, %cst_120 {dimension_numbers = #tpu.dot_dimension_numbers<[1], [0], [0], [1], [0, 0, 1, 1], [], []>} : vector<32x128xf32>, vector<128x32xf32>, vector<32x32xf32> -> vector<32x32xf32>
    %305 = arith.index_cast %c0_i32_64 : i32 to index
    %c0_121 = arith.constant 0 : index
    %c0_122 = arith.constant 0 : index
    %306 = vector.load %arg14[%305, %c0_121, %c0_122] : memref<2x1x32xf32, #tpu.memory_space<vmem>>, vector<1x1x32xf32>
    %307 = vector.shape_cast %306 : vector<1x1x32xf32> to vector<1x32xf32>
    %308 = vector.broadcast %307 : vector<1x32xf32> to vector<32x32xf32>
    %309 = arith.addf %304, %308 : vector<32x32xf32>
    %310 = arith.addf %289, %309 : vector<32x32xf32>
    %311 = arith.index_cast %c0_i32_64 : i32 to index
    %c0_123 = arith.constant 0 : index
    %c0_124 = arith.constant 0 : index
    %312 = vector.load %arg15[%311, %c0_123, %c0_124] : memref<2x1x32xf32, #tpu.memory_space<vmem>>, vector<1x1x32xf32>
    %313 = vector.shape_cast %312 : vector<1x1x32xf32> to vector<1x32xf32>
    %314 = arith.index_cast %c0_i32_64 : i32 to index
    %c0_125 = arith.constant 0 : index
    %c0_126 = arith.constant 0 : index
    %315 = vector.load %arg16[%314, %c0_125, %c0_126] : memref<2x1x32xf32, #tpu.memory_space<vmem>>, vector<1x1x32xf32>
    %316 = vector.shape_cast %315 : vector<1x1x32xf32> to vector<1x32xf32>
    %cst_127 = arith.constant dense<0.000000e+00> : vector<32xf32>
    %317 = vector.multi_reduction <add>, %310, %cst_127 [1] : vector<32x32xf32> to vector<32xf32>
    %318 = vector.shape_cast %317 : vector<32xf32> to vector<32x1xf32>
    %cst_128 = arith.constant 3.200000e+01 : f32
    %319 = vector.broadcast %cst_128 : f32 to vector<32x1xf32>
    %320 = arith.divf %318, %319 : vector<32x1xf32>
    %321 = vector.broadcast %320 : vector<32x1xf32> to vector<32x32xf32>
    %322 = arith.subf %310, %321 : vector<32x32xf32>
    %323 = arith.mulf %322, %322 : vector<32x32xf32>
    %cst_129 = arith.constant dense<0.000000e+00> : vector<32xf32>
    %324 = vector.multi_reduction <add>, %323, %cst_129 [1] : vector<32x32xf32> to vector<32xf32>
    %325 = vector.shape_cast %324 : vector<32xf32> to vector<32x1xf32>
    %cst_130 = arith.constant 3.200000e+01 : f32
    %326 = vector.broadcast %cst_130 : f32 to vector<32x1xf32>
    %327 = arith.divf %325, %326 : vector<32x1xf32>
    %328 = vector.broadcast %320 : vector<32x1xf32> to vector<32x32xf32>
    %329 = arith.subf %310, %328 : vector<32x32xf32>
    %cst_131 = arith.constant 9.99999974E-6 : f32
    %330 = vector.broadcast %cst_131 : f32 to vector<32x1xf32>
    %331 = arith.addf %327, %330 : vector<32x1xf32>
    %332 = math.rsqrt %331 : vector<32x1xf32>
    %333 = vector.broadcast %332 : vector<32x1xf32> to vector<32x32xf32>
    %334 = arith.mulf %329, %333 : vector<32x32xf32>
    %335 = vector.broadcast %313 : vector<1x32xf32> to vector<32x32xf32>
    %336 = arith.mulf %334, %335 : vector<32x32xf32>
    %337 = vector.broadcast %316 : vector<1x32xf32> to vector<32x32xf32>
    %338 = arith.addf %336, %337 : vector<32x32xf32>
    %c1_i32_132 = arith.constant 1 : i32
    %339 = arith.index_cast %c1_i32_132 : i32 to index
    %c0_133 = arith.constant 0 : index
    %c0_134 = arith.constant 0 : index
    %340 = vector.load %arg5[%339, %c0_133, %c0_134] : memref<2x32x96xf32, #tpu.memory_space<vmem>>, vector<1x32x96xf32>
    %341 = vector.shape_cast %340 : vector<1x32x96xf32> to vector<32x96xf32>
    %cst_135 = arith.constant dense<0.000000e+00> : vector<32x96xf32>
    %342 = tpu.matmul %338, %341, %cst_135 {dimension_numbers = #tpu.dot_dimension_numbers<[1], [0], [0], [1], [0, 0, 1, 1], [], []>} : vector<32x32xf32>, vector<32x96xf32>, vector<32x96xf32> -> vector<32x96xf32>
    %343 = arith.index_cast %c1_i32_132 : i32 to index
    %c0_136 = arith.constant 0 : index
    %c0_137 = arith.constant 0 : index
    %344 = vector.load %arg6[%343, %c0_136, %c0_137] : memref<2x1x96xf32, #tpu.memory_space<vmem>>, vector<1x1x96xf32>
    %345 = vector.shape_cast %344 : vector<1x1x96xf32> to vector<1x96xf32>
    %346 = vector.broadcast %345 : vector<1x96xf32> to vector<32x96xf32>
    %347 = arith.addf %342, %346 : vector<32x96xf32>
    %348 = vector.shape_cast %347 : vector<32x96xf32> to vector<2x16x96xf32>
    %349 = vector.extract_strided_slice %348 {offsets = [0, 0, 0], sizes = [2, 16, 8], strides = [1, 1, 1]} : vector<2x16x96xf32> to vector<2x16x8xf32>
    %350 = vector.extract_strided_slice %348 {offsets = [0, 0, 32], sizes = [2, 16, 8], strides = [1, 1, 1]} : vector<2x16x96xf32> to vector<2x16x8xf32>
    %351 = vector.extract_strided_slice %348 {offsets = [0, 0, 64], sizes = [2, 16, 8], strides = [1, 1, 1]} : vector<2x16x96xf32> to vector<2x16x8xf32>
    "tpu.trace_start"() <{level = 10 : i32, message = "bqd,bkd->bqk"}> : () -> ()
    %cst_138 = arith.constant dense<0.000000e+00> : vector<2x16x16xf32>
    %352 = tpu.matmul %349, %350, %cst_138 {dimension_numbers = #tpu.dot_dimension_numbers<[2], [2], [1], [1], [0, 0, 0, 1, 1, 1], [0], [0]>} : vector<2x16x8xf32>, vector<2x16x8xf32>, vector<2x16x16xf32> -> vector<2x16x16xf32>
    "tpu.trace_stop"() : () -> ()
    %353 = arith.addf %352, %84 : vector<2x16x16xf32>
    %cst_139 = arith.constant dense<0xFF800000> : vector<2x16xf32>
    %354 = vector.multi_reduction <maximumf>, %353, %cst_139 [2] : vector<2x16x16xf32> to vector<2x16xf32>
    %355 = vector.shape_cast %354 : vector<2x16xf32> to vector<2x16x1xf32>
    %356 = vector.broadcast %355 : vector<2x16x1xf32> to vector<2x16x16xf32>
    %357 = arith.subf %353, %356 : vector<2x16x16xf32>
    %358 = math.exp %357 : vector<2x16x16xf32>
    %cst_140 = arith.constant dense<0.000000e+00> : vector<2x16xf32>
    %359 = vector.multi_reduction <add>, %358, %cst_140 [2] : vector<2x16x16xf32> to vector<2x16xf32>
    %360 = vector.shape_cast %359 : vector<2x16xf32> to vector<2x16x1xf32>
    %361 = tpu.reciprocal %360 {approx = true} : vector<2x16x1xf32> -> vector<2x16x1xf32>
    %362 = vector.broadcast %361 : vector<2x16x1xf32> to vector<2x16x16xf32>
    %363 = arith.mulf %358, %362 : vector<2x16x16xf32>
    "tpu.trace_start"() <{level = 10 : i32, message = "bqk,bkd->bqd"}> : () -> ()
    %cst_141 = arith.constant dense<0.000000e+00> : vector<2x16x8xf32>
    %364 = tpu.matmul %363, %351, %cst_141 {dimension_numbers = #tpu.dot_dimension_numbers<[2], [1], [1], [2], [0, 0, 0, 1, 1, 2], [0], [0]>} : vector<2x16x16xf32>, vector<2x16x8xf32>, vector<2x16x8xf32> -> vector<2x16x8xf32>
    "tpu.trace_stop"() : () -> ()
    %c0_142 = arith.constant 0 : index
    %c0_143 = arith.constant 0 : index
    %c0_144 = arith.constant 0 : index
    %365 = vector.load %arg18[%c0_142, %c0_143, %c0_144] : memref<2x16x32xf32, #tpu.memory_space<vmem>>, vector<2x16x8xf32>
    tpu.vector_store %arg18[%c0_142, %c0_143, %c0_144], %364 {strides = array<i32>} : memref<2x16x32xf32, #tpu.memory_space<vmem>>, vector<2x16x8xf32>,
    %366 = vector.extract_strided_slice %348 {offsets = [0, 0, 8], sizes = [2, 16, 8], strides = [1, 1, 1]} : vector<2x16x96xf32> to vector<2x16x8xf32>
    %367 = vector.extract_strided_slice %348 {offsets = [0, 0, 40], sizes = [2, 16, 8], strides = [1, 1, 1]} : vector<2x16x96xf32> to vector<2x16x8xf32>
    %368 = vector.extract_strided_slice %348 {offsets = [0, 0, 72], sizes = [2, 16, 8], strides = [1, 1, 1]} : vector<2x16x96xf32> to vector<2x16x8xf32>
    "tpu.trace_start"() <{level = 10 : i32, message = "bqd,bkd->bqk"}> : () -> ()
    %cst_145 = arith.constant dense<0.000000e+00> : vector<2x16x16xf32>
    %369 = tpu.matmul %366, %367, %cst_145 {dimension_numbers = #tpu.dot_dimension_numbers<[2], [2], [1], [1], [0, 0, 0, 1, 1, 1], [0], [0]>} : vector<2x16x8xf32>, vector<2x16x8xf32>, vector<2x16x16xf32> -> vector<2x16x16xf32>
    "tpu.trace_stop"() : () -> ()
    %370 = arith.addf %369, %113 : vector<2x16x16xf32>
    %cst_146 = arith.constant dense<0xFF800000> : vector<2x16xf32>
    %371 = vector.multi_reduction <maximumf>, %370, %cst_146 [2] : vector<2x16x16xf32> to vector<2x16xf32>
    %372 = vector.shape_cast %371 : vector<2x16xf32> to vector<2x16x1xf32>
    %373 = vector.broadcast %372 : vector<2x16x1xf32> to vector<2x16x16xf32>
    %374 = arith.subf %370, %373 : vector<2x16x16xf32>
    %375 = math.exp %374 : vector<2x16x16xf32>
    %cst_147 = arith.constant dense<0.000000e+00> : vector<2x16xf32>
    %376 = vector.multi_reduction <add>, %375, %cst_147 [2] : vector<2x16x16xf32> to vector<2x16xf32>
    %377 = vector.shape_cast %376 : vector<2x16xf32> to vector<2x16x1xf32>
    %378 = tpu.reciprocal %377 {approx = true} : vector<2x16x1xf32> -> vector<2x16x1xf32>
    %379 = vector.broadcast %378 : vector<2x16x1xf32> to vector<2x16x16xf32>
    %380 = arith.mulf %375, %379 : vector<2x16x16xf32>
    "tpu.trace_start"() <{level = 10 : i32, message = "bqk,bkd->bqd"}> : () -> ()
    %cst_148 = arith.constant dense<0.000000e+00> : vector<2x16x8xf32>
    %381 = tpu.matmul %380, %368, %cst_148 {dimension_numbers = #tpu.dot_dimension_numbers<[2], [1], [1], [2], [0, 0, 0, 1, 1, 2], [0], [0]>} : vector<2x16x16xf32>, vector<2x16x8xf32>, vector<2x16x8xf32> -> vector<2x16x8xf32>
    "tpu.trace_stop"() : () -> ()
    %c0_149 = arith.constant 0 : index
    %c0_150 = arith.constant 0 : index
    %c8_151 = arith.constant 8 : index
    %382 = vector.load %arg18[%c0_149, %c0_150, %c8_151] : memref<2x16x32xf32, #tpu.memory_space<vmem>>, vector<2x16x8xf32>
    tpu.vector_store %arg18[%c0_149, %c0_150, %c8_151], %381 {strides = array<i32>} : memref<2x16x32xf32, #tpu.memory_space<vmem>>, vector<2x16x8xf32>,
    %383 = vector.extract_strided_slice %348 {offsets = [0, 0, 16], sizes = [2, 16, 8], strides = [1, 1, 1]} : vector<2x16x96xf32> to vector<2x16x8xf32>
    %384 = vector.extract_strided_slice %348 {offsets = [0, 0, 48], sizes = [2, 16, 8], strides = [1, 1, 1]} : vector<2x16x96xf32> to vector<2x16x8xf32>
    %385 = vector.extract_strided_slice %348 {offsets = [0, 0, 80], sizes = [2, 16, 8], strides = [1, 1, 1]} : vector<2x16x96xf32> to vector<2x16x8xf32>
    "tpu.trace_start"() <{level = 10 : i32, message = "bqd,bkd->bqk"}> : () -> ()
    %cst_152 = arith.constant dense<0.000000e+00> : vector<2x16x16xf32>
    %386 = tpu.matmul %383, %384, %cst_152 {dimension_numbers = #tpu.dot_dimension_numbers<[2], [2], [1], [1], [0, 0, 0, 1, 1, 1], [0], [0]>} : vector<2x16x8xf32>, vector<2x16x8xf32>, vector<2x16x16xf32> -> vector<2x16x16xf32>
    "tpu.trace_stop"() : () -> ()
    %387 = arith.addf %386, %142 : vector<2x16x16xf32>
    %cst_153 = arith.constant dense<0xFF800000> : vector<2x16xf32>
    %388 = vector.multi_reduction <maximumf>, %387, %cst_153 [2] : vector<2x16x16xf32> to vector<2x16xf32>
    %389 = vector.shape_cast %388 : vector<2x16xf32> to vector<2x16x1xf32>
    %390 = vector.broadcast %389 : vector<2x16x1xf32> to vector<2x16x16xf32>
    %391 = arith.subf %387, %390 : vector<2x16x16xf32>
    %392 = math.exp %391 : vector<2x16x16xf32>
    %cst_154 = arith.constant dense<0.000000e+00> : vector<2x16xf32>
    %393 = vector.multi_reduction <add>, %392, %cst_154 [2] : vector<2x16x16xf32> to vector<2x16xf32>
    %394 = vector.shape_cast %393 : vector<2x16xf32> to vector<2x16x1xf32>
    %395 = tpu.reciprocal %394 {approx = true} : vector<2x16x1xf32> -> vector<2x16x1xf32>
    %396 = vector.broadcast %395 : vector<2x16x1xf32> to vector<2x16x16xf32>
    %397 = arith.mulf %392, %396 : vector<2x16x16xf32>
    "tpu.trace_start"() <{level = 10 : i32, message = "bqk,bkd->bqd"}> : () -> ()
    %cst_155 = arith.constant dense<0.000000e+00> : vector<2x16x8xf32>
    %398 = tpu.matmul %397, %385, %cst_155 {dimension_numbers = #tpu.dot_dimension_numbers<[2], [1], [1], [2], [0, 0, 0, 1, 1, 2], [0], [0]>} : vector<2x16x16xf32>, vector<2x16x8xf32>, vector<2x16x8xf32> -> vector<2x16x8xf32>
    "tpu.trace_stop"() : () -> ()
    %c0_156 = arith.constant 0 : index
    %c0_157 = arith.constant 0 : index
    %c16_158 = arith.constant 16 : index
    %399 = vector.load %arg18[%c0_156, %c0_157, %c16_158] : memref<2x16x32xf32, #tpu.memory_space<vmem>>, vector<2x16x8xf32>
    tpu.vector_store %arg18[%c0_156, %c0_157, %c16_158], %398 {strides = array<i32>} : memref<2x16x32xf32, #tpu.memory_space<vmem>>, vector<2x16x8xf32>,
    %400 = vector.extract_strided_slice %348 {offsets = [0, 0, 24], sizes = [2, 16, 8], strides = [1, 1, 1]} : vector<2x16x96xf32> to vector<2x16x8xf32>
    %401 = vector.extract_strided_slice %348 {offsets = [0, 0, 56], sizes = [2, 16, 8], strides = [1, 1, 1]} : vector<2x16x96xf32> to vector<2x16x8xf32>
    %402 = vector.extract_strided_slice %348 {offsets = [0, 0, 88], sizes = [2, 16, 8], strides = [1, 1, 1]} : vector<2x16x96xf32> to vector<2x16x8xf32>
    "tpu.trace_start"() <{level = 10 : i32, message = "bqd,bkd->bqk"}> : () -> ()
    %cst_159 = arith.constant dense<0.000000e+00> : vector<2x16x16xf32>
    %403 = tpu.matmul %400, %401, %cst_159 {dimension_numbers = #tpu.dot_dimension_numbers<[2], [2], [1], [1], [0, 0, 0, 1, 1, 1], [0], [0]>} : vector<2x16x8xf32>, vector<2x16x8xf32>, vector<2x16x16xf32> -> vector<2x16x16xf32>
    "tpu.trace_stop"() : () -> ()
    %404 = arith.addf %403, %171 : vector<2x16x16xf32>
    %cst_160 = arith.constant dense<0xFF800000> : vector<2x16xf32>
    %405 = vector.multi_reduction <maximumf>, %404, %cst_160 [2] : vector<2x16x16xf32> to vector<2x16xf32>
    %406 = vector.shape_cast %405 : vector<2x16xf32> to vector<2x16x1xf32>
    %407 = vector.broadcast %406 : vector<2x16x1xf32> to vector<2x16x16xf32>
    %408 = arith.subf %404, %407 : vector<2x16x16xf32>
    %409 = math.exp %408 : vector<2x16x16xf32>
    %cst_161 = arith.constant dense<0.000000e+00> : vector<2x16xf32>
    %410 = vector.multi_reduction <add>, %409, %cst_161 [2] : vector<2x16x16xf32> to vector<2x16xf32>
    %411 = vector.shape_cast %410 : vector<2x16xf32> to vector<2x16x1xf32>
    %412 = tpu.reciprocal %411 {approx = true} : vector<2x16x1xf32> -> vector<2x16x1xf32>
    %413 = vector.broadcast %412 : vector<2x16x1xf32> to vector<2x16x16xf32>
    %414 = arith.mulf %409, %413 : vector<2x16x16xf32>
    "tpu.trace_start"() <{level = 10 : i32, message = "bqk,bkd->bqd"}> : () -> ()
    %cst_162 = arith.constant dense<0.000000e+00> : vector<2x16x8xf32>
    %415 = tpu.matmul %414, %402, %cst_162 {dimension_numbers = #tpu.dot_dimension_numbers<[2], [1], [1], [2], [0, 0, 0, 1, 1, 2], [0], [0]>} : vector<2x16x16xf32>, vector<2x16x8xf32>, vector<2x16x8xf32> -> vector<2x16x8xf32>
    "tpu.trace_stop"() : () -> ()
    %c0_163 = arith.constant 0 : index
    %c0_164 = arith.constant 0 : index
    %c24_165 = arith.constant 24 : index
    %416 = vector.load %arg18[%c0_163, %c0_164, %c24_165] : memref<2x16x32xf32, #tpu.memory_space<vmem>>, vector<2x16x8xf32>
    tpu.vector_store %arg18[%c0_163, %c0_164, %c24_165], %415 {strides = array<i32>} : memref<2x16x32xf32, #tpu.memory_space<vmem>>, vector<2x16x8xf32>,
    %c0_166 = arith.constant 0 : index
    %c0_167 = arith.constant 0 : index
    %c0_168 = arith.constant 0 : index
    %417 = vector.load %arg18[%c0_166, %c0_167, %c0_168] : memref<2x16x32xf32, #tpu.memory_space<vmem>>, vector<2x16x32xf32>
    %418 = vector.shape_cast %417 : vector<2x16x32xf32> to vector<32x32xf32>
    %419 = arith.index_cast %c1_i32_132 : i32 to index
    %c0_169 = arith.constant 0 : index
    %c0_170 = arith.constant 0 : index
    %420 = vector.load %arg7[%419, %c0_169, %c0_170] : memref<2x32x32xf32, #tpu.memory_space<vmem>>, vector<1x32x32xf32>
    %421 = vector.shape_cast %420 : vector<1x32x32xf32> to vector<32x32xf32>
    %cst_171 = arith.constant dense<0.000000e+00> : vector<32x32xf32>
    %422 = tpu.matmul %418, %421, %cst_171 {dimension_numbers = #tpu.dot_dimension_numbers<[1], [0], [0], [1], [0, 0, 1, 1], [], []>} : vector<32x32xf32>, vector<32x32xf32>, vector<32x32xf32> -> vector<32x32xf32>
    %423 = arith.index_cast %c1_i32_132 : i32 to index
    %c0_172 = arith.constant 0 : index
    %c0_173 = arith.constant 0 : index
    %424 = vector.load %arg8[%423, %c0_172, %c0_173] : memref<2x1x32xf32, #tpu.memory_space<vmem>>, vector<1x1x32xf32>
    %425 = vector.shape_cast %424 : vector<1x1x32xf32> to vector<1x32xf32>
    %426 = vector.broadcast %425 : vector<1x32xf32> to vector<32x32xf32>
    %427 = arith.addf %422, %426 : vector<32x32xf32>
    %428 = arith.addf %338, %427 : vector<32x32xf32>
    %429 = arith.index_cast %c1_i32_132 : i32 to index
    %c0_174 = arith.constant 0 : index
    %c0_175 = arith.constant 0 : index
    %430 = vector.load %arg9[%429, %c0_174, %c0_175] : memref<2x1x32xf32, #tpu.memory_space<vmem>>, vector<1x1x32xf32>
    %431 = vector.shape_cast %430 : vector<1x1x32xf32> to vector<1x32xf32>
    %432 = arith.index_cast %c1_i32_132 : i32 to index
    %c0_176 = arith.constant 0 : index
    %c0_177 = arith.constant 0 : index
    %433 = vector.load %arg10[%432, %c0_176, %c0_177] : memref<2x1x32xf32, #tpu.memory_space<vmem>>, vector<1x1x32xf32>
    %434 = vector.shape_cast %433 : vector<1x1x32xf32> to vector<1x32xf32>
    %cst_178 = arith.constant dense<0.000000e+00> : vector<32xf32>
    %435 = vector.multi_reduction <add>, %428, %cst_178 [1] : vector<32x32xf32> to vector<32xf32>
    %436 = vector.shape_cast %435 : vector<32xf32> to vector<32x1xf32>
    %cst_179 = arith.constant 3.200000e+01 : f32
    %437 = vector.broadcast %cst_179 : f32 to vector<32x1xf32>
    %438 = arith.divf %436, %437 : vector<32x1xf32>
    %439 = vector.broadcast %438 : vector<32x1xf32> to vector<32x32xf32>
    %440 = arith.subf %428, %439 : vector<32x32xf32>
    %441 = arith.mulf %440, %440 : vector<32x32xf32>
    %cst_180 = arith.constant dense<0.000000e+00> : vector<32xf32>
    %442 = vector.multi_reduction <add>, %441, %cst_180 [1] : vector<32x32xf32> to vector<32xf32>
    %443 = vector.shape_cast %442 : vector<32xf32> to vector<32x1xf32>
    %cst_181 = arith.constant 3.200000e+01 : f32
    %444 = vector.broadcast %cst_181 : f32 to vector<32x1xf32>
    %445 = arith.divf %443, %444 : vector<32x1xf32>
    %446 = vector.broadcast %438 : vector<32x1xf32> to vector<32x32xf32>
    %447 = arith.subf %428, %446 : vector<32x32xf32>
    %cst_182 = arith.constant 9.99999974E-6 : f32
    %448 = vector.broadcast %cst_182 : f32 to vector<32x1xf32>
    %449 = arith.addf %445, %448 : vector<32x1xf32>
    %450 = math.rsqrt %449 : vector<32x1xf32>
    %451 = vector.broadcast %450 : vector<32x1xf32> to vector<32x32xf32>
    %452 = arith.mulf %447, %451 : vector<32x32xf32>
    %453 = vector.broadcast %431 : vector<1x32xf32> to vector<32x32xf32>
    %454 = arith.mulf %452, %453 : vector<32x32xf32>
    %455 = vector.broadcast %434 : vector<1x32xf32> to vector<32x32xf32>
    %456 = arith.addf %454, %455 : vector<32x32xf32>
    %457 = arith.index_cast %c1_i32_132 : i32 to index
    %c0_183 = arith.constant 0 : index
    %c0_184 = arith.constant 0 : index
    %458 = vector.load %arg11[%457, %c0_183, %c0_184] : memref<2x32x128xf32, #tpu.memory_space<vmem>>, vector<1x32x128xf32>
    %459 = vector.shape_cast %458 : vector<1x32x128xf32> to vector<32x128xf32>
    %cst_185 = arith.constant dense<0.000000e+00> : vector<32x128xf32>
    %460 = tpu.matmul %456, %459, %cst_185 {dimension_numbers = #tpu.dot_dimension_numbers<[1], [0], [0], [1], [0, 0, 1, 1], [], []>} : vector<32x32xf32>, vector<32x128xf32>, vector<32x128xf32> -> vector<32x128xf32>
    %461 = arith.index_cast %c1_i32_132 : i32 to index
    %c0_186 = arith.constant 0 : index
    %c0_187 = arith.constant 0 : index
    %462 = vector.load %arg12[%461, %c0_186, %c0_187] : memref<2x1x128xf32, #tpu.memory_space<vmem>>, vector<1x1x128xf32>
    %463 = vector.shape_cast %462 : vector<1x1x128xf32> to vector<1x128xf32>
    %464 = vector.broadcast %463 : vector<1x128xf32> to vector<32x128xf32>
    %465 = arith.addf %460, %464 : vector<32x128xf32>
    %cst_188 = arith.constant 0.000000e+00 : f32
    %466 = vector.broadcast %cst_188 : f32 to vector<32x128xf32>
    %467 = arith.maximumf %465, %466 : vector<32x128xf32>
    %468 = arith.index_cast %c1_i32_132 : i32 to index
    %c0_189 = arith.constant 0 : index
    %c0_190 = arith.constant 0 : index
    %469 = vector.load %arg13[%468, %c0_189, %c0_190] : memref<2x128x32xf32, #tpu.memory_space<vmem>>, vector<1x128x32xf32>
    %470 = vector.shape_cast %469 : vector<1x128x32xf32> to vector<128x32xf32>
    %cst_191 = arith.constant dense<0.000000e+00> : vector<32x32xf32>
    %471 = tpu.matmul %467, %470, %cst_191 {dimension_numbers = #tpu.dot_dimension_numbers<[1], [0], [0], [1], [0, 0, 1, 1], [], []>} : vector<32x128xf32>, vector<128x32xf32>, vector<32x32xf32> -> vector<32x32xf32>
    %472 = arith.index_cast %c1_i32_132 : i32 to index
    %c0_192 = arith.constant 0 : index
    %c0_193 = arith.constant 0 : index
    %473 = vector.load %arg14[%472, %c0_192, %c0_193] : memref<2x1x32xf32, #tpu.memory_space<vmem>>, vector<1x1x32xf32>
    %474 = vector.shape_cast %473 : vector<1x1x32xf32> to vector<1x32xf32>
    %475 = vector.broadcast %474 : vector<1x32xf32> to vector<32x32xf32>
    %476 = arith.addf %471, %475 : vector<32x32xf32>
    %477 = arith.addf %456, %476 : vector<32x32xf32>
    %478 = arith.index_cast %c1_i32_132 : i32 to index
    %c0_194 = arith.constant 0 : index
    %c0_195 = arith.constant 0 : index
    %479 = vector.load %arg15[%478, %c0_194, %c0_195] : memref<2x1x32xf32, #tpu.memory_space<vmem>>, vector<1x1x32xf32>
    %480 = vector.shape_cast %479 : vector<1x1x32xf32> to vector<1x32xf32>
    %481 = arith.index_cast %c1_i32_132 : i32 to index
    %c0_196 = arith.constant 0 : index
    %c0_197 = arith.constant 0 : index
    %482 = vector.load %arg16[%481, %c0_196, %c0_197] : memref<2x1x32xf32, #tpu.memory_space<vmem>>, vector<1x1x32xf32>
    %483 = vector.shape_cast %482 : vector<1x1x32xf32> to vector<1x32xf32>
    %cst_198 = arith.constant dense<0.000000e+00> : vector<32xf32>
    %484 = vector.multi_reduction <add>, %477, %cst_198 [1] : vector<32x32xf32> to vector<32xf32>
    %485 = vector.shape_cast %484 : vector<32xf32> to vector<32x1xf32>
    %cst_199 = arith.constant 3.200000e+01 : f32
    %486 = vector.broadcast %cst_199 : f32 to vector<32x1xf32>
    %487 = arith.divf %485, %486 : vector<32x1xf32>
    %488 = vector.broadcast %487 : vector<32x1xf32> to vector<32x32xf32>
    %489 = arith.subf %477, %488 : vector<32x32xf32>
    %490 = arith.mulf %489, %489 : vector<32x32xf32>
    %cst_200 = arith.constant dense<0.000000e+00> : vector<32xf32>
    %491 = vector.multi_reduction <add>, %490, %cst_200 [1] : vector<32x32xf32> to vector<32xf32>
    %492 = vector.shape_cast %491 : vector<32xf32> to vector<32x1xf32>
    %cst_201 = arith.constant 3.200000e+01 : f32
    %493 = vector.broadcast %cst_201 : f32 to vector<32x1xf32>
    %494 = arith.divf %492, %493 : vector<32x1xf32>
    %495 = vector.broadcast %487 : vector<32x1xf32> to vector<32x32xf32>
    %496 = arith.subf %477, %495 : vector<32x32xf32>
    %cst_202 = arith.constant 9.99999974E-6 : f32
    %497 = vector.broadcast %cst_202 : f32 to vector<32x1xf32>
    %498 = arith.addf %494, %497 : vector<32x1xf32>
    %499 = math.rsqrt %498 : vector<32x1xf32>
    %500 = vector.broadcast %499 : vector<32x1xf32> to vector<32x32xf32>
    %501 = arith.mulf %496, %500 : vector<32x32xf32>
    %502 = vector.broadcast %480 : vector<1x32xf32> to vector<32x32xf32>
    %503 = arith.mulf %501, %502 : vector<32x32xf32>
    %504 = vector.broadcast %483 : vector<1x32xf32> to vector<32x32xf32>
    %505 = arith.addf %503, %504 : vector<32x32xf32>
    %c2_i32_203 = arith.constant 2 : i32
    %506 = vector.shape_cast %505 : vector<32x32xf32> to vector<2x16x32xf32>
    %c0_204 = arith.constant 0 : index
    %c0_205 = arith.constant 0 : index
    %c0_206 = arith.constant 0 : index
    %507 = vector.load %arg17[%c0_204, %c0_205, %c0_206] : memref<2x16x32xf32, #tpu.memory_space<vmem>>, vector<2x16x32xf32>
    tpu.vector_store %arg17[%c0_204, %c0_205, %c0_206], %506 {strides = array<i32>} : memref<2x16x32xf32, #tpu.memory_space<vmem>>, vector<2x16x32xf32>,
    return
  }
  func.func @transform_0(%arg0: i32) -> (i32, i32, i32) {
    %c0_i32 = arith.constant 0 : i32
    %c0_i32_0 = arith.constant 0 : i32
    %c0_i32_1 = arith.constant 0 : i32
    return %arg0, %c0_i32, %c0_i32_0 : i32, i32, i32
  }
  func.func @transform_1(%arg0: i32) -> (i32, i32, i32) {
    %c0_i32 = arith.constant 0 : i32
    %c0_i32_0 = arith.constant 0 : i32
    %c0_i32_1 = arith.constant 0 : i32
    return %arg0, %c0_i32, %c0_i32_0 : i32, i32, i32
  }
  func.func @transform_2(%arg0: i32) -> (i32, i32, i32) {
    %c0_i32 = arith.constant 0 : i32
    %c0_i32_0 = arith.constant 0 : i32
    %c0_i32_1 = arith.constant 0 : i32
    return %arg0, %c0_i32, %c0_i32_0 : i32, i32, i32
  }
  func.func @transform_3(%arg0: i32) -> (i32, i32) {
    %c0_i32 = arith.constant 0 : i32
    %c0_i32_0 = arith.constant 0 : i32
    %c0_i32_1 = arith.constant 0 : i32
    return %c0_i32, %c0_i32_0 : i32, i32
  }
  func.func @transform_4(%arg0: i32) -> (i32, i32, i32) {
    %c0_i32 = arith.constant 0 : i32
    %c0_i32_0 = arith.constant 0 : i32
    %c0_i32_1 = arith.constant 0 : i32
    %c0_i32_2 = arith.constant 0 : i32
    return %c0_i32, %c0_i32_0, %c0_i32_1 : i32, i32, i32
  }
  func.func @transform_5(%arg0: i32) -> (i32, i32, i32) {
    %c0_i32 = arith.constant 0 : i32
    %c0_i32_0 = arith.constant 0 : i32
    %c0_i32_1 = arith.constant 0 : i32
    %c0_i32_2 = arith.constant 0 : i32
    return %c0_i32, %c0_i32_0, %c0_i32_1 : i32, i32, i32
  }
  func.func @transform_6(%arg0: i32) -> (i32, i32, i32) {
    %c0_i32 = arith.constant 0 : i32
    %c0_i32_0 = arith.constant 0 : i32
    %c0_i32_1 = arith.constant 0 : i32
    %c0_i32_2 = arith.constant 0 : i32
    return %c0_i32, %c0_i32_0, %c0_i32_1 : i32, i32, i32
  }
  func.func @transform_7(%arg0: i32) -> (i32, i32, i32) {
    %c0_i32 = arith.constant 0 : i32
    %c0_i32_0 = arith.constant 0 : i32
    %c0_i32_1 = arith.constant 0 : i32
    %c0_i32_2 = arith.constant 0 : i32
    return %c0_i32, %c0_i32_0, %c0_i32_1 : i32, i32, i32
  }
  func.func @transform_8(%arg0: i32) -> (i32, i32, i32) {
    %c0_i32 = arith.constant 0 : i32
    %c0_i32_0 = arith.constant 0 : i32
    %c0_i32_1 = arith.constant 0 : i32
    %c0_i32_2 = arith.constant 0 : i32
    return %c0_i32, %c0_i32_0, %c0_i32_1 : i32, i32, i32
  }
  func.func @transform_9(%arg0: i32) -> (i32, i32, i32) {
    %c0_i32 = arith.constant 0 : i32
    %c0_i32_0 = arith.constant 0 : i32
    %c0_i32_1 = arith.constant 0 : i32
    %c0_i32_2 = arith.constant 0 : i32
    return %c0_i32, %c0_i32_0, %c0_i32_1 : i32, i32, i32
  }
  func.func @transform_10(%arg0: i32) -> (i32, i32, i32) {
    %c0_i32 = arith.constant 0 : i32
    %c0_i32_0 = arith.constant 0 : i32
    %c0_i32_1 = arith.constant 0 : i32
    %c0_i32_2 = arith.constant 0 : i32
    return %c0_i32, %c0_i32_0, %c0_i32_1 : i32, i32, i32
  }
  func.func @transform_11(%arg0: i32) -> (i32, i32, i32) {
    %c0_i32 = arith.constant 0 : i32
    %c0_i32_0 = arith.constant 0 : i32
    %c0_i32_1 = arith.constant 0 : i32
    %c0_i32_2 = arith.constant 0 : i32
    return %c0_i32, %c0_i32_0, %c0_i32_1 : i32, i32, i32
  }
  func.func @transform_12(%arg0: i32) -> (i32, i32, i32) {
    %c0_i32 = arith.constant 0 : i32
    %c0_i32_0 = arith.constant 0 : i32
    %c0_i32_1 = arith.constant 0 : i32
    %c0_i32_2 = arith.constant 0 : i32
    return %c0_i32, %c0_i32_0, %c0_i32_1 : i32, i32, i32
  }
  func.func @transform_13(%arg0: i32) -> (i32, i32, i32) {
    %c0_i32 = arith.constant 0 : i32
    %c0_i32_0 = arith.constant 0 : i32
    %c0_i32_1 = arith.constant 0 : i32
    %c0_i32_2 = arith.constant 0 : i32
    return %c0_i32, %c0_i32_0, %c0_i32_1 : i32, i32, i32
  }
  func.func @transform_14(%arg0: i32) -> (i32, i32, i32) {
    %c0_i32 = arith.constant 0 : i32
    %c0_i32_0 = arith.constant 0 : i32
    %c0_i32_1 = arith.constant 0 : i32
    %c0_i32_2 = arith.constant 0 : i32
    return %c0_i32, %c0_i32_0, %c0_i32_1 : i32, i32, i32
  }
  func.func @transform_15(%arg0: i32) -> (i32, i32, i32) {
    %c0_i32 = arith.constant 0 : i32
    %c0_i32_0 = arith.constant 0 : i32
    %c0_i32_1 = arith.constant 0 : i32
    %c0_i32_2 = arith.constant 0 : i32
    return %c0_i32, %c0_i32_0, %c0_i32_1 : i32, i32, i32
  }
  func.func @transform_16(%arg0: i32) -> (i32, i32, i32) {
    %c0_i32 = arith.constant 0 : i32
    %c0_i32_0 = arith.constant 0 : i32
    %c0_i32_1 = arith.constant 0 : i32
    return %arg0, %c0_i32, %c0_i32_0 : i32, i32, i32
  }
}

</mosaic_0001>

<bundles_post_ra>
// kernel: tpu_custom_call.1
= control target key start
LH: loop header
LB: loop body
LE: loop exit
PB: predicated region body
PF: predicated region fallthrough
CT: control target
= control target key end

     0   :  { %s5244_s0 = inlined_call_operand.vmem [shape: f32[2,16,32], index: 0, kind: input, shape index: {}]   ;;  %s5245_s1 = inlined_call_operand.vmem [shape: f32[2,16,16], index: 1, kind: input, shape index: {}]   ;;  %s5246_s2 = inlined_call_operand.vmem [shape: f32[2,2,16], index: 2, kind: input, shape index: {}]   ;;  %s5247_s3 = inlined_call_operand.vmem [shape: f32[7,4], index: 3, kind: input, shape index: {}]   ;;  %s5248_s4 = inlined_call_operand.vmem [shape: f32[2,32,96], index: 4, kind: input, shape index: {}]   ;;  %s5249_s5 = inlined_call_operand.vmem [shape: f32[2,1,96], index: 5, kind: input, shape index: {}]   ;;  %s5250_s6 = inlined_call_operand.vmem [shape: f32[2,32,32], index: 6, kind: input, shape index: {}]   ;;  %s5251_s7 = inlined_call_operand.vmem [shape: f32[2,1,32], index: 7, kind: input, shape index: {}]   ;;  %s5252_s8 = inlined_call_operand.vmem [shape: f32[2,1,32], index: 8, kind: input, shape index: {}]   ;;  %s5253_s9 = inlined_call_operand.vmem [shape: f32[2,1,32], index: 9, kind: input, shape index: {}]   ;;  %s5254_s10 = inlined_call_operand.vmem [shape: f32[2,32,128], index: 10, kind: input, shape index: {}]   ;;  %s5255_s11 = inlined_call_operand.vmem [shape: f32[2,1,128], index: 11, kind: input, shape index: {}]   ;;  %s5256_s12 = inlined_call_operand.vmem [shape: f32[2,128,32], index: 12, kind: input, shape index: {}]   ;;  %s5257_s13 = inlined_call_operand.vmem [shape: f32[2,1,32], index: 13, kind: input, shape index: {}]   ;;  %s5258_s14 = inlined_call_operand.vmem [shape: f32[2,1,32], index: 14, kind: input, shape index: {}]   ;;  %s5259_s15 = inlined_call_operand.vmem [shape: f32[2,1,32], index: 15, kind: input, shape index: {}]   ;;  %s5260_s16 = inlined_call_operand.hbm [shape: f32[2,16,32], index: 16, kind: output, shape index: {}]  }
   0x1   :  { %5302 = sst [smem:[#allocation18_spill]] %s5244_s0 }
   0x2   :  { %21 = vsyncpa [#allocation5], 0 }
   0x3   :  { %22 = vsyncpa [#allocation4], 0  ;;  %s34_s23 = sshll.u32 %s5247_s3, 4  ;;  %s3407_s24 = smov [#allocation3]   ;;  %s35_s23 = int_to_ptr.vmem [resolvable:$true] %s34_s23 }
   0x4   :  { %37 = dma.vmem_to_smem %s35_s23, 128, %s3407_s24, [#allocation5]  }
   0x5   :  { %3403 = dma.done.wait [#allocation5], 128  }
   0x6   :  { %3404 = vsyncadd [#allocation5], 4294967168 }
   0x7   :  { %66 = sfence }
   0x8   :  { %v352_v0 = vld [vmem:[%s5248_s4 + $0x18] sm:$0xff]  ;;  %v351_v1 = vld [vmem:[%s5248_s4 + $0x10] sm:$0xff]  ;;  %v350_v2 = vld [vmem:[%s5248_s4 + $0x8] sm:$0xff]  ;;  %s5303_s19 = sld [smem:[#allocation18_spill]]  ;;  %vm5272_vm0 = vcmask 261120   ;;  %s5262_s28 = smov 88   ;;  %v81_v34 = vlaneseq }
   0x9   :  { %382 = vmatpush.msra.mxu0 %v352_v0  ;;  %3076 = vmatpush.msra.mxu1 %v352_v0  ;;  %v349_v3 = vld [vmem:[%s5248_s4] sm:$0xff]  ;;  %s5264_s29 = smov 96   ;;  %s3410_s30 = smov 120   ;;  %vm5273_vm1 = vcmask 64512   ;;  %v3414_v30 = vmov 0   ;;  %v5307_v38 = vmov 0 }
   0xa   :  { %v3185_v8 = vld [vmem:[%s5249_s5] ss:$0 sm:$0xff]  ;;  %s5266_s3 = smov 64   ;;  %s5270_s0 = smov 112   ;;  %v3612_v35 = vand.u32 127, %v81_v34  ;;  %v82_v36 = vshrl.u32 %v81_v34, 7 }
   0xb   :  { %383 = vmatpush.msra.mxu0 %v351_v1  ;;  %3077 = vmatpush.msra.mxu1 %v351_v1  ;;  %s5268_s17 = smov 72   ;;  %v75_v29 = vld [vmem:[%s5246_s2] sm:$0x3]  ;;  %s3614_s21 = sld [smem:[#allocation3]]  ;;  %v3659_v43 = vld [vmem:[%s5245_s1 + $0x8] sm:$0xff] }
   0xc   :  { %vm79_vm2 = vcmp.gt.f32.partialorder %v75_v29, 0.5  ;;  %vm104_vm3 = vcmp.eq.s32.totalorder %v82_v36, 3  ;;  %vm106_vm4 = vcmp.ge.s32.totalorder %v3612_v35, 5  ;;  %s2899_s22 = sld [smem:[#allocation3 + $0x1]]  ;;  %vm5275_vm5 = vcmp.eq.s32.totalorder %v3612_v35, 3  ;;  %v3677_v47 = vld [vmem:[%s5245_s1] sm:$0xff] }
   0xd   :  { %384 = vmatpush.msra.mxu0 %v350_v2  ;;  %3078 = vmatpush.msra.mxu1 %v350_v2  ;;  %v120_v31 = vsel %vm79_vm2, 1, %v3414_v30  ;;  %vm110_vm6 = vcmp.ge.s32.totalorder %v82_v36, 5  ;;  %vm86_vm7 = vcmp.lt.s32.totalorder %v82_v36, %v3612_v35  ;;  %s2906_s23 = sld [smem:[#allocation3 + $0x2]]  ;;  %vm134_vm8 = vcmp.eq.s32.totalorder %v82_v36, 4  ;;  %vm3619_vm9 = vmand %vm104_vm3, %vm106_vm4 }
   0xe   :  { %v67_v4 = vld [vmem:[%s5303_s19] sm:$0xff]  ;;  %v68_v5 = vld [vmem:[%s5303_s19 + $0x8] sm:$0xff]  ;;  %v69_v6 = vld [vmem:[%s5303_s19 + $0x10] sm:$0xff]  ;;  %v122_v32 = vrot.slane %v120_v31, 1  ;;  %s2900_s24 = sld [smem:[#allocation3 + $0x81]]  ;;  %vm5277_vm10 = vcmp.eq.s32.totalorder %v3612_v35, 4  ;;  %v87_v39 = vsel %vm86_vm7, %v82_v36, %v3612_v35  ;;  %vm90_vm14 = vcmp.ne.s32.totalorder %v82_v36, %v3612_v35 }
   0xf   :  { %385 = vmatpush.msra.mxu0 %v349_v3  ;;  %3079 = vmatpush.msra.mxu1 %v349_v3  ;;  %v70_v7 = vld [vmem:[%s5303_s19 + $0x18] sm:$0xff]  ;;  %s3624_s25 = sld [smem:[#allocation3 + $0x82]]  ;;  %vm3628_vm11 = vmand %vm5275_vm5, %vm110_vm6  ;;  %vm92_vm15 = vcmp.eq.s32.totalorder %v87_v39, 0  ;;  %v83_v42 = vadd.s32 8, %v82_v36  ;;  %vm96_vm3 = vcmp.eq.s32.totalorder %v87_v39, 1 }
  0x10   :  { %2920 = vmatmul.msk.f32.vlgmr.msra.gmra.mxu0 %vm5272_vm0, %v67_v4  ;;  %2921 = vmatmul.msk.f32.vlgmr.msra.gmra.mxu1 %vm5272_vm0, %v68_v5  ;;  %3082 = vpush %v122_v32  ;;  %v5308_v38 = vsel %vm3628_vm11, 4294967295, %v5307_v38  ;;  %s3633_s26 = sld [smem:[#allocation3 + $0x101]]  ;;  %vm3635_vm12 = vmand %vm134_vm8, %vm106_vm4  ;;  %v77_v54 = vmul.f32 -1e+09, %v75_v29 }
  0x11   :  { %s3639_s27 = sld [smem:[#allocation3 + $0x181]]  ;;  %vm3643_vm13 = vmand %vm5277_vm10, %vm110_vm6  ;;  %vm100_vm6 = vcmp.eq.s32.totalorder %v87_v39, 2  ;;  %vm88_vm7 = vcmp.lt.s32.totalorder %v83_v42, %v3612_v35  ;;  %v3853_v31 = vstv %s3614_s21 }
  0x12   :  { %s3647_s18 = sld [smem:[#allocation3 + $0x102]]  ;;  %vm5274_vm2 = vmor %vm3619_vm9, %vm3628_vm11  ;;  %v3661_v44 = vstv %s2899_s22  ;;  %v89_v49 = vsel %vm88_vm7, %v83_v42, %v3612_v35 }
  0x13   :  { %s3650_s20 = sld [smem:[#allocation3 + $0x201]]  ;;  %v3672_v45 = vstv %s2906_s23  ;;  %vm3682_vm8 = vmand %vm90_vm14, %vm92_vm15  ;;  %v214_v51 = vmul.f32 %v3661_v44, %v3659_v43 }
  0x14   :  { %v3687_v50 = vstv %s2900_s24  ;;  %s3689_s22 = sld [smem:[#allocation3 + $0x301]]  ;;  %vm3700_vm15 = vmand %vm90_vm14, %vm96_vm3  ;;  %v259_v58 = vmul.f32 %v3672_v45, %v3677_v47  ;;  %v260_v29 = vmul.f32 %v3672_v45, %v3659_v43 }
  0x15   :  { %vm3709_vm7 = vmand %vm90_vm14, %vm100_vm6  ;;  %s3713_s23 = sld [smem:[#allocation3 + $0x282]]  ;;  %vm93_vm14 = vcmp.eq.s32.totalorder %v89_v49, 0  ;;  %v220_v57 = vadd.f32 %v3687_v50, %v214_v51  ;;  %v3744_v61 = vstv %s3624_s25  ;;  %v153_v51 = vmul.f32 %v3853_v31, %v3677_v47 }
  0x16   :  { %s3730_s24 = sld [smem:[#allocation3 + $0x302]]  ;;  %v3741_v60 = vstv %s3633_s26  ;;  %v265_v1 = vadd.f32 %v3744_v61, %v259_v58  ;;  %v266_v39 = vadd.f32 %v3744_v61, %v260_v29 }
  0x17   :  { %v3760_v0 = vstv %s3639_s27  ;;  %s3763_s25 = sld [smem:[#allocation3 + $0x83]] }
  0x18   :  { %2922 = vmatmul.msk.f32.gmra.mxu1 %vm5272_vm0, %v69_v6  ;;  %v3747_v62 = vstv %s3647_s18  ;;  %s3765_s26 = sld [smem:[#allocation3 + $0x80]] }
  0x19   :  { %5325 = vst [vmem:[#allocation10_spill] sm:$0xff] %v3747_v62  ;;  %v3775_v3 = vstv %s3650_s20  ;;  %s2915_s27 = sld [smem:[#allocation3 + $0x103]] }
  0x1a   :  { %s2918_s18 = sld [smem:[#allocation3 + $0x283]] }
  0x1b   :  { %s2919_s20 = sld [smem:[#allocation3 + $0x303]] }
  0x1c   :  { %s2895_s21 = sld [smem:[#allocation3 + $0x180]] }
  0x1d   :  { %v3862_v34 = vstv %s3763_s25  ;;  %s5298_s25 = smov 56  }
  0x1e   :  { %v3883_v58 = vstv %s3765_s26  ;;  %s5296_s26 = smov 48  }
  0x1f   :  { %v159_v29 = vadd.f32 %v3883_v58, %v153_v51 }
  0x20   :  { %2923 = vmatmul.msk.f32.gmra.mxu1 %vm5272_vm0, %v70_v7 }
  0x8d   :  { %v390_v9 = vpop.f32.mrf.mxu1  ;;  %v387_v11 = vpop.f32.mrf.mxu0 }
  0x8e   :  { %v3545_v10 = vadd.f32 %v3185_v8, %v390_v9  ;;  %v3551_v13 = vadd.f32 %v3185_v8, %v387_v11  ;;  %v3795_v9 = vperm.slane %v77_v54, 0 }
  0x90   :  { %599 = vrot.lane.b32.xlu2 %v3545_v10, %s5262_s28  ;;  %403 = vrot.lane.b32.xlu0 %v3545_v10, %s5264_s29  ;;  %v3571_v17 = vpack.i.bf16 %v3551_v13, %v3545_v10 }
  0x92   :  { %5304 = vst [vmem:[#allocation9_spill] sm:$0xff] %v3571_v17 }
  0x95   :  { %v393_v12 = vpop.f32.mrf.mxu1 }
  0x96   :  { %v3553_v14 = vadd.f32 %v3185_v8, %v393_v12  ;;  %v3804_v12 = vstv %s3689_s22  ;;  %s2896_s22 = sld [smem:[#allocation3 + $0x200]] }
  0x98   :  { %401 = vrot.lane.b32.xlu0 %v3551_v13, %s5264_s29  ;;  %439 = vrot.lane.b32.xlu2 %v3553_v14, %s5264_s29 }
  0x9d   :  { %v396_v15 = vpop.f32.mrf.mxu1 }
  0x9e   :  { %v3559_v16 = vadd.f32 %v3185_v8, %v396_v15  ;;  %v271_v8 = vsel %vm3682_vm8, %v3747_v62, %v265_v1 }
  0xa0   :  { %597 = vrot.lane.b32.xlu0 %v3551_v13, %s5262_s28  ;;  %441 = vrot.lane.b32.xlu1 %v3559_v16, %s5264_s29  ;;  %s2894_s29 = sld [smem:[#allocation3 + $0x100]] }
  0xa1   :  { %634 = vrot.lane.b32.xlu2 %v3559_v16, %s3410_s30 }
  0xa8   :  { %593 = vrot.lane.b32.xlu0 %v3551_v13, %s3410_s30 }
  0xb0   :  { %3106 = vrot.lane.b32.xlu0 %v3571_v17, %s5266_s3  ;;  %s3663_s3 = sld [smem:[#allocation3 + $0x182]] }
  0xb6   :  { %v3778_v4 = vstv %s3663_s3  ;;  %s2916_s3 = sld [smem:[#allocation3 + $0x183]] }
  0xb7   :  { %5330 = vst [vmem:[#allocation11_spill] sm:$0xff] %v3778_v4 }
  0xb8   :  { %638 = vrot.lane.b32.xlu0 %v3559_v16, %s5262_s28 }
  0xc0   :  { %636 = vrot.lane.b32.xlu0 %v3553_v14, %s5262_s28  ;;  %s3749_s28 = sld [smem:[#allocation3 + $0x3]] }
  0xc8   :  { %632 = vrot.lane.b32.xlu0 %v3553_v14, %s3410_s30 }
  0xd0   :  { %808 = vrot.lane.b32.xlu0 %v3545_v10, %s5270_s0 }
  0xd8   :  { %1025 = vrot.lane.b32.xlu0 %v3545_v10, %s5268_s17 }
  0xe0   :  { %1023 = vrot.lane.b32.xlu0 %v3551_v13, %s5268_s17 }
  0xe8   :  { %847 = vrot.lane.b32.xlu0 %v3559_v16, %s5270_s0  ;;  %s3670_s0 = sld [smem:[#allocation3 + $0x281]] }
  0xea   :  { %v600_v20 = vpop.permute.xlu2 %599 }
  0xee   :  { %v3787_v6 = vstv %s3670_s0  ;;  %s2917_s0 = sld [smem:[#allocation3 + $0x203]] }
  0xf0   :  { %1062 = vrot.lane.b32.xlu0 %v3553_v14, %s5268_s17  ;;  %s3083_s17 = spop %3082 }
  0xf1   :  { %v125_v46 = vstv %s3083_s17  ;;  %s3704_s17 = sld [smem:[#allocation3 + $0x202]] }
  0xf2   :  { %v440_v23 = vpop.permute.xlu2 %439  ;;  %vm3693_vm0 = vcmp.eq.s32.totalorder %v125_v46, 1  ;;  %v3870_v46 = vstv %s2915_s27  ;;  %s5344_s27 = smov 112  }
  0xf3   :  { %vm3722_vm3 = vmand %vm5274_vm2, %vm3693_vm0  ;;  %vm97_vm2 = vcmp.eq.s32.totalorder %v89_v49, 1 }
  0xf4   :  { %vm3736_vm6 = vmand %vm5275_vm5, %vm3693_vm0  ;;  %vm101_vm5 = vcmp.eq.s32.totalorder %v89_v49, 2 }
  0xf5   :  { %vm3755_vm4 = vmand %vm5277_vm10, %vm3693_vm0 }
 0x102   :  { %v404_v18 = vpop.permute.xlu0 %403 }
 0x103   :  { %2924 = vmatpush.xpose.msk.msrb.mxu1 %vm5273_vm1, %v404_v18  ;;  %v277_v18 = vsel %vm3700_vm15, %v3778_v4, %v271_v8 }
 0x10a   :  { %v402_v19 = vpop.permute.xlu0 %401 }
 0x10b   :  { %2925 = vmatpush.xpose.msk.msrb.mxu1 %vm5273_vm1, %v402_v19 }
 0x10e   :  { %2926 = vmatmul.msk.f32.vlgmr.msrb.gmra.mxu1 %vm5273_vm1, %v3551_v13 }
 0x10f   :  { %2936 = vmatpush.xpose.msk.msra.mxu1 %vm5273_vm1, %v600_v20  ;;  %v3816_v20 = vstv %s3704_s17  ;;  %s2897_s17 = sld [smem:[#allocation3 + $0x280]] }
 0x110   :  { %5335 = vst [vmem:[#allocation12_spill] sm:$0xff] %v3816_v20 }
 0x112   :  { %v598_v21 = vpop.permute.xlu0 %597  ;;  %v442_v22 = vpop.permute.xlu1 %441 }
 0x113   :  { %2937 = vmatpush.xpose.msk.msra.mxu1 %vm5273_vm1, %v598_v21  ;;  %2928 = vmatpush.xpose.msk.msra.mxu2 %vm5273_vm1, %v442_v22 }
 0x116   :  { %2927 = vmatmul.msk.f32.gmra.mxu1 %vm5273_vm1, %v3545_v10 }
 0x117   :  { %2929 = vmatpush.xpose.msk.msra.mxu2 %vm5273_vm1, %v440_v23  ;;  %v283_v23 = vsel %vm3709_vm7, %v3816_v20, %v277_v18 }
 0x11a   :  { %v594_v24 = vpop.permute.xlu0 %593  ;;  %2930 = vmatmul.msk.f32.vlgmr.msra.gmra.mxu2 %vm5273_vm1, %v3553_v14 }
 0x11e   :  { %2938 = vmatmul.msk.f32.vlgmr.msra.gmra.mxu1 %vm5273_vm1, %v594_v24  ;;  %v3836_v24 = vstv %s3713_s23  ;;  %s2898_s23 = sld [smem:[#allocation3 + $0x300]] }
 0x11f   :  { %5339 = vst [vmem:[#allocation13_spill] sm:$0xff] %v3836_v24 }
 0x122   :  { %v3107_v25 = vpop.permute.xlu0 %3106  ;;  %2931 = vmatmul.msk.f32.gmra.mxu2 %vm5273_vm1, %v3559_v16 }
 0x123   :  { %v3108_v26 = vunpack.i.l.bf16 %v3107_v25  ;;  %v3109_v27 = vunpack.i.h.bf16 %v3107_v25 }
 0x125   :  { %545 = vmatpush.msrb.mxu2 %v3108_v26  ;;  %3080 = vmatpush.msra.mxu3 %v3108_v26  ;;  %v289_v26 = vsel %vm3722_vm3, %v3836_v24, %v283_v23 }
 0x127   :  { %546 = vmatpush.msrb.mxu2 %v3109_v27  ;;  %3081 = vmatpush.msra.mxu3 %v3109_v27 }
 0x12a   :  { %v639_v28 = vpop.permute.xlu0 %638 }
 0x12b   :  { %2940 = vmatpush.xpose.msk.msra.mxu2 %vm5273_vm1, %v639_v28  ;;  %v3848_v28 = vstv %s3730_s24  ;;  %s3421_s24 = smov 16  }
 0x12c   :  { %5340 = vst [vmem:[#allocation14_spill] sm:$0xff] %v3848_v28 }
 0x132   :  { %v637_v33 = vpop.permute.xlu0 %636 }
 0x133   :  { %2941 = vmatpush.xpose.msk.msra.mxu2 %vm5273_vm1, %v637_v33  ;;  %vm91_vm1 = vcmp.ne.s32.totalorder %v83_v42, %v3612_v35  ;;  %v3859_v33 = vstv %s3749_s28  ;;  %s5300_s28 = smov 24  }
 0x134   :  { %vm3770_vm11 = vmand %vm91_vm1, %vm93_vm14  ;;  %v305_v42 = vmul.f32 %v3859_v33, %v3677_v47  ;;  %v306_v49 = vmul.f32 %v3859_v33, %v3659_v43  ;;  %vm474_vm14 = vcmask 130048  }
 0x135   :  { %vm3782_vm10 = vmand %vm91_vm1, %vm97_vm2  ;;  %v226_v7 = vsel %vm3770_vm11, %v3741_v60, %v220_v57  ;;  %v272_v52 = vsel %vm3770_vm11, %v3747_v62, %v266_v39  ;;  %v3880_v57 = vstv %s2916_s3  ;;  %s3418_s3 = smov 104  }
 0x136   :  { %vm3799_vm2 = vmand %vm91_vm1, %vm101_vm5  ;;  %v232_v15 = vsel %vm3782_vm10, %v3760_v0, %v226_v7  ;;  %v311_v54 = vadd.f32 %v3862_v34, %v305_v42  ;;  %v278_v1 = vsel %vm3782_vm10, %v3778_v4, %v272_v52  ;;  %v3888_v7 = vstv %s2917_s0 }
 0x137   :  { %v238_v19 = vsel %vm3799_vm2, %v3775_v3, %v232_v15  ;;  %vm5336_vm1 = vmor %vm3635_vm12, %vm3643_vm13  ;;  %v312_v8 = vadd.f32 %v3862_v34, %v306_v49  ;;  %v284_v15 = vsel %vm3799_vm2, %v3816_v20, %v278_v1  ;;  %v3920_v49 = vstv %s2894_s29  ;;  %s5358_s29 = smov 72  }
 0x138   :  { %vm3825_vm5 = vmand %vm5336_vm1, %vm3693_vm0  ;;  %v244_v22 = vsel %vm3736_vm6, %v3787_v6, %v238_v19  ;;  %v317_v18 = vsel %vm3682_vm8, %v3870_v46, %v311_v54  ;;  %v3897_v19 = vstv %s2918_s18  ;;  %s5417_s18 = smov 96  }
 0x139   :  { %v250_v25 = vsel %vm3755_vm4, %v3804_v12, %v244_v22  ;;  %v295_v32 = vsel %vm3825_vm5, %v3848_v28, %v289_v26  ;;  %v290_v22 = vsel %vm3736_vm6, %v3836_v24, %v284_v15  ;;  %v323_v23 = vsel %vm3700_vm15, %v3880_v57, %v317_v18 }
 0x13a   :  { %v3845_v27 = vadd.f32 %v250_v25, %v3795_v9  ;;  %v3865_v36 = vadd.f32 %v295_v32, %v3795_v9  ;;  %v3905_v25 = vstv %s2919_s20  ;;  %v318_v26 = vsel %vm3770_vm11, %v3870_v46, %v312_v8  ;;  %v4046_v56 = vpop.permute.xlu0 %632 }
 0x13b   :  { %v296_v32 = vsel %vm3755_vm4, %v3848_v28, %v290_v22  ;;  %v329_v39 = vsel %vm3709_vm7, %v3888_v7, %v323_v23  ;;  %v324_v42 = vsel %vm3782_vm10, %v3880_v57, %v318_v26  ;;  %v169_v22 = vsel %vm3682_vm8, %v3920_v49, %v159_v29 }
 0x13c   :  { %v3923_v52 = vadd.f32 %v296_v32, %v3795_v9  ;;  %v335_v51 = vsel %vm3722_vm3, %v3897_v19, %v329_v39  ;;  %v330_v54 = vsel %vm3799_vm2, %v3888_v7, %v324_v42  ;;  %v3946_v23 = vstv %s2895_s21 }
 0x13d   :  { %v341_v1 = vsel %vm3825_vm5, %v3905_v25, %v335_v51  ;;  %v336_v8 = vsel %vm3736_vm6, %v3897_v19, %v330_v54  ;;  %v154_v32 = vmul.f32 %v3853_v31, %v3659_v43  ;;  %v179_v39 = vsel %vm3700_vm15, %v3946_v23, %v169_v22 }
 0x13e   :  { %v3938_v15 = vadd.f32 %v341_v1, %v3795_v9  ;;  %v342_v18 = vsel %vm3755_vm4, %v3905_v25, %v336_v8  ;;  %v3956_v42 = vstv %s2896_s22  ;;  %v3961_v29 = vstv %s2897_s17  ;;  %v3967_v1 = vld [vmem:[%s5246_s2 + $0x2] sm:$0x3]  ;;  %s3415_s2 = smov 80   ;;  %s5294_s17 = smov 40  }
 0x13f   :  { %v3949_v26 = vadd.f32 %v342_v18, %v3795_v9  ;;  %v189_v51 = vsel %vm3709_vm7, %v3956_v42, %v179_v39  ;;  %v160_v54 = vadd.f32 %v3883_v58, %v154_v32  ;;  %vm80_vm0 = vcmp.gt.f32.partialorder %v3967_v1, 0.5 }
 0x140   :  { %v121_v43 = vsel %vm80_vm0, 1, %v3414_v30  ;;  %v195_v8 = vsel %vm3722_vm3, %v3961_v29, %v189_v51  ;;  %v3974_v18 = vstv %s2898_s23  ;;  %v213_v39 = vmul.f32 %v3661_v44, %v3677_v47  ;;  %s3420_s23 = smov 8  }
 0x141   :  { %v123_v22 = vrot.slane %v121_v43, 1  ;;  %v170_v32 = vsel %vm3770_vm11, %v3920_v49, %v160_v54  ;;  %v201_v28 = vsel %vm3825_vm5, %v3974_v18, %v195_v8 }
 0x142   :  { %v180_v30 = vsel %vm3782_vm10, %v3946_v23, %v170_v32  ;;  %v219_v51 = vadd.f32 %v3687_v50, %v213_v39  ;;  %v3989_v43 = vadd.f32 %v3795_v9, %v201_v28 }
 0x143   :  { %3084 = vpush %v123_v22  ;;  %v190_v54 = vsel %vm3799_vm2, %v3956_v42, %v180_v30 }
 0x144   :  { %5341 = vst [vmem:[#allocation15_spill] sm:$0xff] %v3989_v43  ;;  %v225_v47 = vsel %vm3682_vm8, %v3741_v60, %v219_v51  ;;  %v196_v22 = vsel %vm3736_vm6, %v3961_v29, %v190_v54 }
 0x145   :  { %v231_v28 = vsel %vm3700_vm15, %v3760_v0, %v225_v47  ;;  %v202_v39 = vsel %vm3755_vm4, %v3974_v18, %v196_v22 }
 0x146   :  { %v237_v30 = vsel %vm3709_vm7, %v3775_v3, %v231_v28 }
 0x147   :  { %v243_v54 = vsel %vm3722_vm3, %v3787_v6, %v237_v30  ;;  %v4057_v30 = vld [vmem:[%s5245_s1 + $0x10] sm:$0xff]  ;;  %vm5347_vm3 = vnez %v5308_v38 }
 0x148   :  { %v249_v63 = vsel %vm3825_vm5, %v3804_v12, %v243_v54  ;;  %v155_v54 = vmul.f32 %v3853_v31, %v4057_v30  ;;  %vm5348_vm6 = vmor %vm3619_vm9, %vm5347_vm3 }
 0x149   :  { %v4026_v22 = vadd.f32 %v249_v63, %v3795_v9  ;;  %vm5351_vm9 = vmor %vm3635_vm12, %vm3643_vm13  ;;  %vm5354_vm12 = vcmask 64512  }
 0x14a   :  { %vm5355_vm13 = vmmov %vm5354_vm12 }
 0x14b   :  { %5343 = vst [vmem:[#allocation17_spill] sm:$0xff] %v4026_v22  ;;  %vm5356_vm0 = vmmov %vm5354_vm12 }
 0x14c   :  { %vm5357_vm3 = vmmov %vm5356_vm0 }
 0x174   :  { %s3085_s20 = spop %3084 }
 0x18b   :  { %v431_v24 = vpop.f32.mrf.mxu1 }
 0x18c   :  { %v432_v8 = vadd.f32 %v431_v24, %v3989_v43  ;;  %v4012_v24 = vadd.f32 %v3795_v9, %v202_v39  ;;  %v809_v9 = vpop.permute.xlu0 %808 }
 0x18e   :  { %v475_v32 = vsel %vm474_vm14, %v432_v8, -inf  ;;  %5342 = vst [vmem:[#allocation16_spill] sm:$0xff] %v4012_v24 }
 0x18f   :  { %476 = vmax.xlane.f32.xlu1 %v475_v32 }
 0x193   :  { %v434_v59 = vpop.f32.mrf.mxu1 }
 0x194   :  { %v4015_v51 = vadd.f32 %v434_v59, %v4012_v24  ;;  %v1026_v21 = vpop.permute.xlu0 %1025 }
 0x196   :  { %v478_v47 = vsel %vm474_vm14, %v4015_v51, -inf }
 0x197   :  { %479 = vmax.xlane.f32.xlu0 %v478_v47  ;;  %v161_v47 = vadd.f32 %v3883_v58, %v155_v54 }
 0x19b   :  { %v626_v32 = vpop.f32.mrf.mxu1 }
 0x19c   :  { %v627_v28 = vadd.f32 %v626_v32, %v4026_v22  ;;  %v1024_v59 = vpop.permute.xlu0 %1023  ;;  %v127_v32 = vstv %s3085_s20  ;;  %s5420_s20 = smov 56  }
 0x19d   :  { %vm4067_vm4 = vcmp.eq.s32.totalorder %v127_v32, 1  ;;  %v78_v32 = vmul.f32 -1e+09, %v3967_v1  ;;  %v468_v41 = vpop.f32.mrf.mxu2 }
 0x19e   :  { %v671_v39 = vsel %vm474_vm14, %v627_v28, -inf  ;;  %vm4081_vm1 = vmand %vm5348_vm6, %vm4067_vm4 }
 0x19f   :  { %672 = vmax.xlane.f32.xlu0 %v671_v39  ;;  %vm4098_vm5 = vmand %vm5351_vm9, %vm4067_vm4  ;;  %v4105_v1 = vperm.slane %v78_v32, 0 }
 0x1a0   :  { %vm5359_vm6 = vmmov %vm5356_vm0 }
 0x1a1   :  { %vm5360_vm9 = vmmov %vm5356_vm0 }
 0x1a4   :  { %v4062_v63 = vpop.permute.xlu0 %847 }
 0x1a8   :  { %595 = vrot.lane.b32.xlu1 %v3545_v10, %s3410_s30 }
 0x1ac   :  { %v4089_v24 = vpop.permute.xlu0 %1062 }
 0x1b0   :  { %812 = vrot.lane.b32.xlu1 %v3545_v10, %s3415_s2 }
 0x1b3   :  { %3116 = vrot.lane.b32.xlu0 %v3571_v17, %s5298_s25 }
 0x1b8   :  { %810 = vrot.lane.b32.xlu1 %v3551_v13, %s3415_s2 }
 0x1bb   :  { %3121 = vrot.lane.b32.xlu0 %v3571_v17, %s5296_s26 }
 0x1c0   :  { %806 = vrot.lane.b32.xlu1 %v3551_v13, %s5344_s27 }
 0x1c8   :  { %851 = vrot.lane.b32.xlu1 %v3559_v16, %s3415_s2 }
 0x1d0   :  { %849 = vrot.lane.b32.xlu1 %v3553_v14, %s3415_s2 }
 0x1d8   :  { %845 = vrot.lane.b32.xlu1 %v3553_v14, %s5344_s27 }
 0x1e0   :  { %1021 = vrot.lane.b32.xlu1 %v3545_v10, %s3418_s3  ;;  %v171_v10 = vsel %vm3682_vm8, %v3920_v49, %v161_v47 }
 0x1e1   :  { %v181_v22 = vsel %vm3700_vm15, %v3946_v23, %v171_v10 }
 0x1e2   :  { %v191_v47 = vsel %vm3709_vm7, %v3956_v42, %v181_v22 }
 0x1e3   :  { %v197_v38 = vsel %vm4081_vm1, %v3961_v29, %v191_v47 }
 0x1e4   :  { %v203_v17 = vsel %vm4098_vm5, %v3974_v18, %v197_v38 }
 0x1e5   :  { %v4111_v40 = vadd.f32 %v4105_v1, %v203_v17 }
 0x1e7   :  { %v4116_v62 = vadd.f32 %v468_v41, %v4111_v40 }
 0x1e8   :  { %1058 = vrot.lane.b32.xlu1 %v3553_v14, %s3418_s3 }
 0x1e9   :  { %v481_v47 = vsel %vm474_vm14, %v4116_v62, -inf }
 0x202   :  { %v477_v10 = vpop.xlane.xlu1 %476 }
 0x203   :  { %v487_v22 = vsub.f32 %v432_v8, %v477_v10 }
 0x205   :  { %v491_v43 = vmul.f32 1.442695, %v487_v22 }
 0x207   :  { %3201 = vpow2.f32 %v491_v43 }
 0x20a   :  { %v4113_v20 = vpop.xlane.xlu0 %479 }
 0x20d   :  { %v3202_v4 = vpop.eup %3201 }
 0x20e   :  { %v499_v8 = vsel %vm474_vm14, %v3202_v4, 0.0 }
 0x20f   :  { %500 = vadd.xlane.f32.xlu2 %v499_v8 }
 0x212   :  { %482 = vmax.xlane.f32.xlu1 %v481_v47  ;;  %v673_v32 = vpop.xlane.xlu0 %672 }
 0x213   :  { %v683_v10 = vsub.f32 %v627_v28, %v673_v32 }
 0x215   :  { %v687_v43 = vmul.f32 1.442695, %v683_v10 }
 0x217   :  { %3203 = vpow2.f32 %v687_v43 }
 0x21a   :  { %v596_v17 = vpop.permute.xlu1 %595 }
 0x21b   :  { %2939 = vmatmul.msk.f32.gmra.mxu1 %vm5354_vm12, %v596_v17  ;;  %vm5361_vm12 = vmmov %vm5356_vm0  ;;  %v635_v17 = vpop.permute.xlu2 %634 }
 0x21d   :  { %v4122_v38 = vpop.eup %3203 }
 0x21e   :  { %v695_v22 = vsel %vm474_vm14, %v4122_v38, 0.0 }
 0x21f   :  { %696 = vadd.xlane.f32.xlu0 %v695_v22 }
 0x222   :  { %v813_v41 = vpop.permute.xlu1 %812 }
 0x223   :  { %2948 = vmatpush.xpose.msk.msrb.mxu1 %vm5355_vm13, %v813_v41  ;;  %vm5362_vm13 = vcmp.eq.s32.totalorder %v3612_v35, 3 }
 0x227   :  { %1019 = vrot.lane.b32.xlu2 %v3551_v13, %s3418_s3  ;;  %v4141_v13 = vld [vmem:[%s5245_s1 + $0x18] sm:$0xff]  ;;  %s5379_s1 = smov 64  }
 0x228   :  { %v308_v54 = vmul.f32 %v3859_v33, %v4141_v13 }
 0x22a   :  { %v811_v8 = vpop.permute.xlu1 %810 }
 0x22b   :  { %2949 = vmatpush.xpose.msk.msrb.mxu1 %vm5356_vm0, %v811_v8  ;;  %vm4156_vm0 = vmand %vm5362_vm13, %vm4067_vm4 }
 0x22f   :  { %2960 = vmatpush.xpose.msk.msra.mxu1 %vm5357_vm3, %v1026_v21  ;;  %1064 = vrot.lane.b32.xlu2 %v3559_v16, %s5358_s29  ;;  %v156_v21 = vmul.f32 %v3853_v31, %v4141_v13  ;;  %vm5365_vm3 = vcmp.eq.s32.totalorder %v3612_v35, 4 }
 0x231   :  { %v162_v47 = vadd.f32 %v3883_v58, %v156_v21  ;;  %v5366_v58 = vmov 0 }
 0x232   :  { %v807_v28 = vpop.permute.xlu1 %806 }
 0x233   :  { %2961 = vmatpush.xpose.msk.msra.mxu1 %vm5359_vm6, %v1024_v59  ;;  %v172_v59 = vsel %vm3770_vm11, %v3920_v49, %v162_v47  ;;  %vm4167_vm6 = vmand %vm5365_vm3, %vm4067_vm4 }
 0x234   :  { %2950 = vmatmul.msk.f32.vlgmr.msrb.gmra.mxu1 %vm5360_vm9, %v807_v28  ;;  %v182_v32 = vsel %vm3782_vm10, %v3946_v23, %v172_v59  ;;  %v5367_v58 = vsel %vm4167_vm6, 4294967295, %v5366_v58  ;;  %vm5368_vm4 = vmmov %vm5360_vm9 }
 0x235   :  { %v192_v31 = vsel %vm3799_vm2, %v3956_v42, %v182_v32  ;;  %v471_v42 = vpop.f32.mrf.mxu2  ;;  %vm5369_vm9 = vmmov %vm5368_vm4 }
 0x236   :  { %v198_v49 = vsel %vm4156_vm0, %v3961_v29, %v192_v31  ;;  %vm5371_vm13 = vmmov %vm5368_vm4  ;;  %v307_v31 = vmul.f32 %v3859_v33, %v4057_v30 }
 0x237   :  { %1060 = vrot.lane.b32.xlu2 %v3559_v16, %s3418_s3  ;;  %v204_v23 = vsel %vm4167_vm6, %v3974_v18, %v198_v49  ;;  %vm5372_vm3 = vmmov %vm5368_vm4 }
 0x238   :  { %v4178_v10 = vadd.f32 %v4105_v1, %v204_v23  ;;  %vm5373_vm6 = vmmov %vm5372_vm3 }
 0x23a   :  { %v472_v39 = vadd.f32 %v471_v42, %v4178_v10  ;;  %v852_v43 = vpop.permute.xlu1 %851 }
 0x23c   :  { %2951 = vmatmul.msk.f32.gmra.mxu1 %vm5361_vm12, %v809_v9  ;;  %v484_v35 = vsel %vm474_vm14, %v472_v39, -inf  ;;  %vm5370_vm12 = vmmov %vm5368_vm4 }
 0x242   :  { %v850_v22 = vpop.permute.xlu1 %849 }
 0x24a   :  { %v846_v8 = vpop.permute.xlu1 %845 }
 0x252   :  { %v1022_v18 = vpop.permute.xlu1 %1021 }
 0x260   :  { %485 = vmax.xlane.f32.xlu2 %v484_v35 }
 0x282   :  { %v501_v41 = vpop.xlane.xlu2 %500 }
 0x283   :  { %3205 = vrcp.f32 %v501_v41 }
 0x289   :  { %v3206_v29 = vpop.eup %3205 }
 0x28a   :  { %v1020_v28 = vpop.permute.xlu2 %1019  ;;  %v515_v21 = vmul.f32 %v3206_v29, %v3202_v4 }
 0x28b   :  { %2962 = vmatmul.msk.f32.vlgmr.msra.gmra.mxu1 %vm5368_vm4, %v1020_v28  ;;  %vm5374_vm4 = vmmov %vm5372_vm3 }
 0x28c   :  { %2932 = vmatmul.msk.f32.vlgmr.msrb.gmra.mxu2 %vm474_vm14, %v515_v21  ;;  %v4236_v21 = vpack.i.bf16 %v3553_v14, %v3559_v16 }
 0x28d   :  { %2952 = vmatpush.xpose.msk.msrb.mxu2 %vm5369_vm9, %v852_v43  ;;  %vm5375_vm9 = vmmov %vm5372_vm3 }
 0x291   :  { %2953 = vmatpush.xpose.msk.msrb.mxu2 %vm5370_vm12, %v850_v22  ;;  %vm5376_vm12 = vmmov %vm5372_vm3  ;;  %v1059_v22 = vpop.permute.xlu1 %1058 }
 0x292   :  { %v1065_v47 = vpop.permute.xlu2 %1064 }
 0x293   :  { %2963 = vmatmul.msk.f32.gmra.mxu1 %vm5371_vm13, %v1022_v18  ;;  %vm5378_vm13 = vmmov %vm5372_vm3 }
 0x294   :  { %2942 = vmatmul.msk.f32.vlgmr.msra.gmra.mxu2 %vm5372_vm3, %v4046_v56  ;;  %v313_v56 = vadd.f32 %v3862_v34, %v307_v31 }
 0x295   :  { %2964 = vmatpush.xpose.msk.msra.mxu2 %vm5373_vm6, %v1065_v47  ;;  %vm5377_vm6 = vmmov %vm5372_vm3 }
 0x296   :  { %v319_v49 = vsel %vm3682_vm8, %v3870_v46, %v313_v56  ;;  %v488_v56 = vsub.f32 %v4015_v51, %v4113_v20  ;;  %v215_v20 = vmul.f32 %v3661_v44, %v4057_v30 }
 0x298   :  { %v629_v59 = vpop.f32.mrf.mxu1  ;;  %v221_v51 = vadd.f32 %v3687_v50, %v215_v20 }
 0x299   :  { %v4191_v4 = vadd.f32 %v629_v59, %v3845_v27  ;;  %2965 = vmatpush.xpose.msk.msra.mxu2 %vm5374_vm4, %v4089_v24  ;;  %v325_v24 = vsel %vm3700_vm15, %v3880_v57, %v319_v49  ;;  %v493_v49 = vmul.f32 1.442695, %v488_v56  ;;  %vm5380_vm4 = vmmov %vm5372_vm3 }
 0x29a   :  { %v331_v23 = vsel %vm3709_vm7, %v3888_v7, %v325_v24  ;;  %v1061_v29 = vpop.permute.xlu2 %1060  ;;  %v483_v24 = vpop.xlane.xlu1 %482 }
 0x29b   :  { %v674_v32 = vsel %vm474_vm14, %v4191_v4, -inf  ;;  %v4216_v42 = vsel %vm4081_vm1, %v3897_v19, %v331_v23  ;;  %v489_v14 = vsub.f32 %v4116_v62, %v483_v24  ;;  %v227_v62 = vsel %vm3682_vm8, %v3741_v60, %v221_v51 }
 0x29c   :  { %675 = vmax.xlane.f32.xlu2 %v674_v32  ;;  %2943 = vmatmul.msk.f32.gmra.mxu2 %vm5375_vm9, %v635_v17  ;;  %v343_v35 = vsel %vm4098_vm5, %v3905_v25, %v4216_v42 }
 0x29d   :  { %v495_v16 = vmul.f32 1.442695, %v489_v14 }
 0x2a4   :  { %2954 = vmatmul.msk.f32.vlgmr.msrb.gmra.mxu2 %vm5376_vm12, %v846_v8 }
 0x2ac   :  { %2955 = vmatmul.msk.f32.gmra.mxu2 %vm5377_vm6, %v4062_v63 }
 0x2b1   :  { %v839_v43 = vpop.f32.mrf.mxu1 }
 0x2b2   :  { %v4223_v17 = vadd.f32 %v839_v43, %v3865_v36 }
 0x2b4   :  { %v884_v41 = vsel %vm474_vm14, %v4223_v17, -inf  ;;  %2966 = vmatmul.msk.f32.vlgmr.msra.gmra.mxu2 %vm5378_vm13, %v1059_v22 }
 0x2b5   :  { %885 = vmax.xlane.f32.xlu1 %v884_v41  ;;  %v216_v41 = vmul.f32 %v3661_v44, %v4141_v13 }
 0x2b9   :  { %v842_v63 = vpop.f32.mrf.mxu1 }
 0x2ba   :  { %v4229_v8 = vadd.f32 %v842_v63, %v3923_v52 }
 0x2bc   :  { %v887_v28 = vsel %vm474_vm14, %v4229_v8, -inf  ;;  %2967 = vmatmul.msk.f32.gmra.mxu2 %vm5372_vm3, %v1061_v29 }
 0x2bd   :  { %888 = vmax.xlane.f32.xlu2 %v887_v28  ;;  %v233_v28 = vsel %vm3700_vm15, %v3760_v0, %v227_v62 }
 0x2ce   :  { %3111 = vrot.lane.b32.xlu1 %v4236_v21, %s5379_s1 }
 0x2d3   :  { %v486_v18 = vpop.xlane.xlu2 %485 }
 0x2d4   :  { %v490_v47 = vsub.f32 %v472_v39, %v486_v18 }
 0x2d6   :  { %v497_v59 = vmul.f32 1.442695, %v490_v47  ;;  %v222_v47 = vadd.f32 %v3687_v50, %v216_v41 }
 0x2d8   :  { %3207 = vpow2.f32 %v497_v59  ;;  %v239_v59 = vsel %vm3709_vm7, %v3775_v3, %v233_v28  ;;  %v228_v56 = vsel %vm3770_vm11, %v3741_v60, %v222_v47  ;;  %v5382_v47 = vld [vmem:[#allocation11_spill] sm:$0xff] }
 0x2d9   :  { %3209 = vpow2.f32 %v493_v49  ;;  %v261_v49 = vmul.f32 %v3672_v45, %v4057_v30  ;;  %v245_v50 = vsel %vm4081_vm1, %v3787_v6, %v239_v59  ;;  %v234_v60 = vsel %vm3782_vm10, %v3760_v0, %v228_v56  ;;  %v5381_v0 = vld [vmem:[#allocation10_spill] sm:$0xff] }
 0x2da   :  { %3211 = vpow2.f32 %v495_v16  ;;  %v240_v20 = vsel %vm3799_vm2, %v3775_v3, %v234_v60  ;;  %v262_v60 = vmul.f32 %v3672_v45, %v4141_v13 }
 0x2db   :  { %v246_v28 = vsel %vm4156_vm0, %v3787_v6, %v240_v20 }
 0x2de   :  { %v4240_v32 = vpop.eup %3207 }
 0x2df   :  { %v508_v31 = vsel %vm474_vm14, %v4240_v32, 0.0  ;;  %v4247_v23 = vpop.eup %3209 }
 0x2e0   :  { %509 = vadd.xlane.f32.xlu0 %v508_v31  ;;  %v502_v39 = vsel %vm474_vm14, %v4247_v23, 0.0  ;;  %v4251_v43 = vpop.eup %3211 }
 0x2e1   :  { %v505_v22 = vsel %vm474_vm14, %v4251_v43, 0.0 }
 0x2f8   :  { %503 = vadd.xlane.f32.xlu1 %v502_v39 }
 0x300   :  { %506 = vadd.xlane.f32.xlu1 %v505_v22  ;;  %v267_v22 = vadd.f32 %v3744_v61, %v261_v49 }
 0x302   :  { %v273_v41 = vsel %vm3682_vm8, %v5381_v0, %v267_v22  ;;  %vm5383_vm8 = vnez %v5367_v58 }
 0x303   :  { %v279_v59 = vsel %vm3700_vm15, %v5382_v47, %v273_v41  ;;  %vm5390_vm15 = vmmov %vm5372_vm3 }
 0x308   :  { %v1052_v63 = vpop.f32.mrf.mxu1 }
 0x309   :  { %v4264_v29 = vadd.f32 %v1052_v63, %v3938_v15 }
 0x30b   :  { %v1097_v18 = vsel %vm474_vm14, %v4264_v29, -inf }
 0x30c   :  { %1098 = vmax.xlane.f32.xlu2 %v1097_v18 }
 0x30f   :  { %v676_v31 = vpop.xlane.xlu2 %675  ;;  %v548_v44 = vpop.f32.mrf.mxu2 }
 0x310   :  { %v684_v24 = vsub.f32 %v4191_v4, %v676_v31  ;;  %589 = vst.msk [vmem:[#allocation2] sm:$0xff] %vm5380_vm4, %v548_v44  ;;  %v1055_v14 = vpop.f32.mrf.mxu1  ;;  %v251_v4 = vsel %vm4098_vm5, %v3804_v12, %v245_v50  ;;  %v252_v31 = vsel %vm5383_vm8, %v3804_v12, %v246_v28  ;;  %v5384_v44 = vld [vmem:[#allocation12_spill] sm:$0xff]  ;;  %v5386_v12 = vld [vmem:[#allocation14_spill] sm:$0xff]  ;;  %v268_v28 = vadd.f32 %v3744_v61, %v262_v60 }
 0x311   :  { %v4286_v16 = vadd.f32 %v1055_v14, %v3949_v26  ;;  %v4301_v51 = vadd.f32 %v251_v4, %v4105_v1  ;;  %v285_v6 = vsel %vm3709_vm7, %v5384_v44, %v279_v59  ;;  %v4328_v56 = vadd.f32 %v252_v31, %v4105_v1 }
 0x312   :  { %v689_v39 = vmul.f32 1.442695, %v684_v24  ;;  %v5385_v24 = vld [vmem:[#allocation13_spill] sm:$0xff]  ;;  %v274_v45 = vsel %vm3770_vm11, %v5381_v0, %v268_v28  ;;  %v4419_v60 = vadd.f32 %v343_v35, %v4105_v1  ;;  %vm801_vm7 = vcmask 130112  }
 0x313   :  { %v1100_v30 = vsel %vm474_vm14, %v4286_v16, -inf  ;;  %v291_v14 = vsel %vm4081_vm1, %v5385_v24, %v285_v6  ;;  %v280_v61 = vsel %vm3782_vm10, %v5382_v47, %v274_v45  ;;  %vm1227_vm1 = vcmask 261312  }
 0x314   :  { %3213 = vpow2.f32 %v689_v39  ;;  %1101 = vmax.xlane.f32.xlu2 %v1100_v30  ;;  %v297_v55 = vsel %vm4098_vm5, %v5386_v12, %v291_v14  ;;  %v286_v2 = vsel %vm3799_vm2, %v5384_v44, %v280_v61  ;;  %vm5391_vm5 = vcmask 261120  }
 0x315   :  { %v4342_v39 = vadd.f32 %v297_v55, %v4105_v1 }
 0x317   :  { %v665_v62 = vpop.f32.mrf.mxu2 }
 0x318   :  { %v4307_v63 = vadd.f32 %v665_v62, %v4301_v51 }
 0x31a   :  { %v4312_v18 = vpop.eup %3213  ;;  %v677_v3 = vsel %vm474_vm14, %v4307_v63, -inf }
 0x31b   :  { %678 = vmax.xlane.f32.xlu0 %v677_v3  ;;  %v698_v48 = vsel %vm474_vm14, %v4312_v18, 0.0  ;;  %v314_v3 = vadd.f32 %v3862_v34, %v308_v54  ;;  %v3117_v54 = vpop.permute.xlu0 %3116 }
 0x31c   :  { %699 = vadd.xlane.f32.xlu2 %v698_v48  ;;  %v3118_v42 = vunpack.i.l.bf16 %v3117_v54  ;;  %v3119_v35 = vunpack.i.h.bf16 %v3117_v54 }
 0x31f   :  { %v668_v49 = vpop.f32.mrf.mxu2 }
 0x320   :  { %v4331_v53 = vadd.f32 %v668_v49, %v4328_v56 }
 0x322   :  { %v680_v50 = vsel %vm474_vm14, %v4331_v53, -inf }
 0x323   :  { %681 = vmax.xlane.f32.xlu0 %v680_v50 }
 0x327   :  { %v878_v4 = vpop.f32.mrf.mxu2 }
 0x328   :  { %v886_v30 = vpop.xlane.xlu1 %885  ;;  %v4350_v20 = vadd.f32 %v878_v4, %v4342_v39 }
 0x329   :  { %v896_v22 = vsub.f32 %v4223_v17, %v886_v30  ;;  %v320_v17 = vsel %vm3770_vm11, %v3870_v46, %v314_v3  ;;  %vm5389_vm11 = vmmov %vm5372_vm3 }
 0x32a   :  { %v890_v41 = vsel %vm474_vm14, %v4350_v20, -inf  ;;  %v326_v31 = vsel %vm3782_vm10, %v3880_v57, %v320_v17  ;;  %vm5388_vm10 = vmmov %vm5372_vm3 }
 0x32b   :  { %v900_v62 = vmul.f32 1.442695, %v896_v22  ;;  %891 = vmax.xlane.f32.xlu0 %v890_v41  ;;  %v332_v46 = vsel %vm3799_vm2, %v3888_v7, %v326_v31  ;;  %v5387_v22 = vld [vmem:[#allocation9_spill] sm:$0xff]  ;;  %vm1014_vm2 = vcmask 195712  }
 0x32c   :  { %v338_v5 = vsel %vm4156_vm0, %v3897_v19, %v332_v46 }
 0x32d   :  { %3215 = vpow2.f32 %v900_v62  ;;  %v344_v11 = vsel %vm5383_vm8, %v3905_v25, %v338_v5  ;;  %v3122_v62 = vpop.permute.xlu0 %3121 }
 0x32e   :  { %v4399_v9 = vadd.f32 %v344_v11, %v4105_v1  ;;  %v3124_v17 = vunpack.i.h.bf16 %v3122_v62 }
 0x32f   :  { %v881_v13 = vpop.f32.mrf.mxu2 }
 0x330   :  { %v889_v33 = vpop.xlane.xlu2 %888 }
 0x331   :  { %v897_v59 = vsub.f32 %v4229_v8, %v889_v33  ;;  %v292_v8 = vsel %vm4156_vm0, %v5385_v24, %v286_v2  ;;  %vm5392_vm0 = vmmov %vm5391_vm5 }
 0x332   :  { %v298_v44 = vsel %vm5383_vm8, %v5386_v12, %v292_v8  ;;  %vm5393_vm9 = vmmov %vm5392_vm0 }
 0x333   :  { %v4366_v48 = vpop.eup %3215  ;;  %v902_v34 = vmul.f32 1.442695, %v897_v59  ;;  %v4396_v7 = vadd.f32 %v298_v44, %v4105_v1  ;;  %vm5394_vm12 = vmmov %vm5392_vm0 }
 0x334   :  { %v908_v0 = vsel %vm474_vm14, %v4366_v48, 0.0  ;;  %vm5395_vm6 = vmmov %vm5392_vm0 }
 0x335   :  { %3217 = vpow2.f32 %v902_v34  ;;  %909 = vadd.xlane.f32.xlu2 %v908_v0  ;;  %v4402_v19 = vadd.f32 %v881_v13, %v4396_v7  ;;  %v697_v37 = vpop.xlane.xlu0 %696  ;;  %v3123_v13 = vunpack.i.l.bf16 %v3122_v62  ;;  %vm5396_vm13 = vmmov %vm5392_vm0 }
 0x336   :  { %vm5397_vm4 = vmmov %vm5392_vm0 }
 0x337   :  { %v1091_v47 = vpop.f32.mrf.mxu2  ;;  %v893_v55 = vsel %vm474_vm14, %v4402_v19, -inf  ;;  %vm5398_vm8 = vmmov %vm5392_vm0 }
 0x338   :  { %v4422_v30 = vadd.f32 %v1091_v47, %v4419_v60 }
 0x33a   :  { %v1103_v4 = vsel %vm474_vm14, %v4422_v30, -inf }
 0x33b   :  { %v4385_v57 = vpop.eup %3217 }
 0x33c   :  { %v911_v6 = vsel %vm474_vm14, %v4385_v57, 0.0 }
 0x33d   :  { %912 = vadd.xlane.f32.xlu2 %v911_v6 }
 0x33f   :  { %v1094_v24 = vpop.f32.mrf.mxu2  ;;  %3126 = vrot.lane.b32.xlu0 %v4236_v21, %s5298_s25 }
 0x340   :  { %v3112_v49 = vpop.permute.xlu1 %3111  ;;  %v4407_v14 = vadd.f32 %v1094_v24, %v4399_v9 }
 0x341   :  { %v3113_v58 = vunpack.i.l.bf16 %v3112_v49  ;;  %v3114_v12 = vunpack.i.h.bf16 %v3112_v49 }
 0x342   :  { %v1106_v50 = vsel %vm474_vm14, %v4407_v14, -inf }
 0x343   :  { %580 = vmatpush.msrb.mxu3 %v3113_v58  ;;  %1107 = vmax.xlane.f32.xlu1 %v1106_v50 }
 0x345   :  { %581 = vmatpush.msrb.mxu3 %v3114_v12  ;;  %894 = vmax.xlane.f32.xlu2 %v893_v55 }
 0x34d   :  { %1104 = vmax.xlane.f32.xlu2 %v1103_v4 }
 0x353   :  { %v510_v3 = vpop.xlane.xlu0 %509 }
 0x35c   :  { %3131 = vrot.lane.b32.xlu1 %v5387_v22, %s5294_s17 }
 0x36b   :  { %v504_v41 = vpop.xlane.xlu1 %503 }
 0x36c   :  { %3219 = vrcp.f32 %v504_v41 }
 0x372   :  { %v3220_v28 = vpop.eup %3219 }
 0x373   :  { %v507_v25 = vpop.xlane.xlu1 %506  ;;  %v516_v1 = vmul.f32 %v3220_v28, %v4247_v23 }
 0x374   :  { %3221 = vrcp.f32 %v507_v25 }
 0x375   :  { %2933 = vmatmul.msk.f32.vlgmr.msra.gmra.mxu3 %vm474_vm14, %v516_v1  ;;  %3223 = vrcp.f32 %v510_v3 }
 0x376   :  { %741 = vmatpush.msra.mxu3 %v3118_v42  ;;  %3225 = vrcp.f32 %v697_v37 }
 0x378   :  { %742 = vmatpush.msra.mxu3 %v3119_v35 }
 0x37a   :  { %v3222_v45 = vpop.eup %3221 }
 0x37b   :  { %v517_v33 = vmul.f32 %v3222_v45, %v4251_v43  ;;  %v3224_v59 = vpop.eup %3223 }
 0x37c   :  { %v518_v31 = vmul.f32 %v3224_v59, %v4240_v32  ;;  %v3226_v0 = vpop.eup %3225 }
 0x37d   :  { %2934 = vmatmul.msk.f32.vlgmr.msrb.gmra.mxu3 %vm474_vm14, %v517_v33  ;;  %v711_v8 = vmul.f32 %v3226_v0, %v4122_v38 }
 0x37e   :  { %954 = vmatpush.msrb.mxu3 %v3123_v13 }
 0x37f   :  { %v1099_v23 = vpop.xlane.xlu2 %1098 }
 0x380   :  { %955 = vmatpush.msrb.mxu3 %v3124_v17  ;;  %v1109_v61 = vsub.f32 %v4264_v29, %v1099_v23 }
 0x382   :  { %v1113_v34 = vmul.f32 1.442695, %v1109_v61 }
 0x384   :  { %3227 = vpow2.f32 %v1113_v34 }
 0x385   :  { %2935 = vmatmul.msk.f32.gmra.mxu3 %vm474_vm14, %v518_v31 }
 0x387   :  { %v1102_v2 = vpop.xlane.xlu2 %1101 }
 0x388   :  { %v1110_v43 = vsub.f32 %v4286_v16, %v1102_v2 }
 0x38a   :  { %v4436_v46 = vpop.eup %3227  ;;  %v1115_v47 = vmul.f32 1.442695, %v1110_v43 }
 0x38b   :  { %v1121_v5 = vsel %vm474_vm14, %v4436_v46, 0.0 }
 0x38c   :  { %3229 = vpow2.f32 %v1115_v47  ;;  %1122 = vadd.xlane.f32.xlu0 %v1121_v5 }
 0x38d   :  { %2944 = vmatmul.msk.f32.vlgmr.msra.gmra.mxu3 %vm474_vm14, %v711_v8 }
 0x38e   :  { %v679_v16 = vpop.xlane.xlu0 %678 }
 0x38f   :  { %v700_v32 = vpop.xlane.xlu2 %699  ;;  %v685_v3 = vsub.f32 %v4307_v63, %v679_v16 }
 0x390   :  { %3231 = vrcp.f32 %v700_v32 }
 0x391   :  { %v691_v45 = vmul.f32 1.442695, %v685_v3 }
 0x392   :  { %v4442_v29 = vpop.eup %3229 }
 0x393   :  { %v1124_v44 = vsel %vm474_vm14, %v4442_v29, 0.0 }
 0x394   :  { %1125 = vadd.xlane.f32.xlu2 %v1124_v44 }
 0x396   :  { %v3232_v6 = vpop.eup %3231  ;;  %v682_v11 = vpop.xlane.xlu0 %681 }
 0x397   :  { %v712_v38 = vmul.f32 %v3232_v6, %v4312_v18 }
 0x399   :  { %2945 = vmatmul.msk.f32.gmra.mxu3 %vm474_vm14, %v712_v38 }
 0x39e   :  { %v892_v24 = vpop.xlane.xlu0 %891 }
 0x39f   :  { %v898_v34 = vsub.f32 %v4350_v20, %v892_v24 }
 0x3a1   :  { %v904_v0 = vmul.f32 1.442695, %v898_v34  ;;  %v1237_v34 = vld [vmem:[%s5250_s6 + $0x8] sm:$0xff] }
 0x3a8   :  { %v910_v49 = vpop.xlane.xlu2 %909 }
 0x3a9   :  { %3233 = vrcp.f32 %v910_v49 }
 0x3ac   :  { %3136 = vrot.lane.b32.xlu2 %v4236_v21, %s5296_s26  ;;  %s2880_s26 = sshll.u32 %s5260_s16, 4  ;;  %s2881_s26 = int_to_ptr.hbm [resolvable:$true] %s2880_s26 }
 0x3af   :  { %v3234_v58 = vpop.eup %3233 }
 0x3b0   :  { %v924_v50 = vmul.f32 %v3234_v58, %v4366_v48  ;;  %v913_v12 = vpop.xlane.xlu2 %912 }
 0x3b1   :  { %3235 = vrcp.f32 %v913_v12  ;;  %v3127_v55 = vpop.permute.xlu0 %3126 }
 0x3b2   :  { %2956 = vmatmul.msk.f32.vlgmr.msrb.gmra.mxu3 %vm474_vm14, %v924_v50  ;;  %v3128_v4 = vunpack.i.l.bf16 %v3127_v55  ;;  %v3129_v18 = vunpack.i.h.bf16 %v3127_v55 }
 0x3b4   :  { %776 = vmatpush.msrb.mxu0 %v3128_v4 }
 0x3b6   :  { %777 = vmatpush.msrb.mxu0 %v3129_v18  ;;  %v1108_v48 = vpop.xlane.xlu1 %1107 }
 0x3b7   :  { %v3236_v54 = vpop.eup %3235  ;;  %v1112_v42 = vsub.f32 %v4407_v14, %v1108_v48 }
 0x3b8   :  { %v895_v22 = vpop.xlane.xlu2 %894  ;;  %v925_v62 = vmul.f32 %v3236_v54, %v4385_v57 }
 0x3b9   :  { %v899_v41 = vsub.f32 %v4402_v19, %v895_v22  ;;  %v1119_v19 = vmul.f32 1.442695, %v1112_v42 }
 0x3ba   :  { %2957 = vmatmul.msk.f32.gmra.mxu3 %vm474_vm14, %v925_v62 }
 0x3bb   :  { %v906_v37 = vmul.f32 1.442695, %v899_v41 }
 0x3bd   :  { %3237 = vpow2.f32 %v906_v37 }
 0x3c0   :  { %v1105_v28 = vpop.xlane.xlu2 %1104 }
 0x3c1   :  { %v1111_v25 = vsub.f32 %v4422_v30, %v1105_v28  ;;  %v686_v30 = vsub.f32 %v4331_v53, %v682_v11 }
 0x3c3   :  { %v4456_v1 = vpop.eup %3237  ;;  %v1117_v35 = vmul.f32 1.442695, %v1111_v25  ;;  %v693_v17 = vmul.f32 1.442695, %v686_v30 }
 0x3c4   :  { %v917_v57 = vsel %vm474_vm14, %v4456_v1, 0.0 }
 0x3c5   :  { %3239 = vpow2.f32 %v1117_v35  ;;  %918 = vadd.xlane.f32.xlu1 %v917_v57 }
 0x3c6   :  { %3241 = vpow2.f32 %v1119_v19 }
 0x3c7   :  { %3243 = vpow2.f32 %v691_v45 }
 0x3c8   :  { %3245 = vpow2.f32 %v693_v17 }
 0x3c9   :  { %3247 = vpow2.f32 %v904_v0 }
 0x3cb   :  { %v4462_v33 = vpop.eup %3239 }
 0x3cc   :  { %v1127_v13 = vsel %vm474_vm14, %v4462_v33, 0.0  ;;  %v4467_v59 = vpop.eup %3241 }
 0x3cd   :  { %1128 = vadd.xlane.f32.xlu0 %v1127_v13  ;;  %v3244_v23 = vpop.eup %3243  ;;  %v1130_v31 = vsel %vm474_vm14, %v4467_v59, 0.0 }
 0x3ce   :  { %v3132_v14 = vpop.permute.xlu1 %3131  ;;  %v701_v53 = vsel %vm474_vm14, %v3244_v23, 0.0  ;;  %v3246_v2 = vpop.eup %3245 }
 0x3cf   :  { %v3133_v63 = vunpack.i.l.bf16 %v3132_v14  ;;  %v3134_v61 = vunpack.i.h.bf16 %v3132_v14  ;;  %v704_v43 = vsel %vm474_vm14, %v3246_v2, 0.0  ;;  %v3248_v8 = vpop.eup %3247 }
 0x3d0   :  { %v914_v47 = vsel %vm474_vm14, %v3248_v8, 0.0 }
 0x3d1   :  { %1167 = vmatpush.msra.mxu3 %v3133_v63 }
 0x3d3   :  { %1168 = vmatpush.msra.mxu3 %v3134_v61 }
 0x3d5   :  { %1131 = vadd.xlane.f32.xlu0 %v1130_v31  ;;  %702 = vadd.xlane.f32.xlu2 %v701_v53  ;;  %v1236_v31 = vld [vmem:[%s5250_s6] sm:$0xff] }
 0x3dd   :  { %705 = vadd.xlane.f32.xlu2 %v704_v43 }
 0x3e5   :  { %915 = vadd.xlane.f32.xlu2 %v914_v47 }
 0x3f8   :  { %v551_v5 = vpop.f32.mrf.mxu3 }
 0x3f9   :  { %590 = vst.msk [vmem:[#allocation2 + $0x8] sm:$0xff] %vm5388_vm10, %v551_v5  ;;  %vm5399_vm10 = vmmov %vm5392_vm0 }
 0x3fd   :  { %3141 = vrot.lane.b32.xlu2 %v4236_v21, %s5294_s17  ;;  %s3424_s17 = smov [#allocation6]  }
 0x3fe   :  { %s2878_s0 = sshll.u32 %s3424_s17, 4  ;;  %s2879_s0 = int_to_ptr.vmem [resolvable:$true] %s2878_s0 }
 0x3ff   :  { %v1123_v32 = vpop.xlane.xlu0 %1122 }
 0x400   :  { %v583_v20 = vpop.f32.mrf.mxu3  ;;  %3249 = vrcp.f32 %v1123_v32 }
 0x401   :  { %591 = vst.msk [vmem:[#allocation2 + $0x10] sm:$0xff] %vm5389_vm11, %v583_v20  ;;  %vm5400_vm11 = vmmov %vm5392_vm0 }
 0x406   :  { %v3250_v44 = vpop.eup %3249 }
 0x407   :  { %v1137_v16 = vmul.f32 %v3250_v44, %v4436_v46  ;;  %v1126_v38 = vpop.xlane.xlu2 %1125 }
 0x408   :  { %v586_v6 = vpop.f32.mrf.mxu3  ;;  %3251 = vrcp.f32 %v1126_v38 }
 0x409   :  { %592 = vst.msk [vmem:[#allocation2 + $0x18] sm:$0xff] %vm5390_vm15, %v586_v6  ;;  %2968 = vmatmul.msk.f32.vlgmr.msra.gmra.mxu3 %vm474_vm14, %v1137_v16  ;;  %vm5401_vm15 = vmmov %vm5392_vm0 }
 0x40e   :  { %v3252_v11 = vpop.eup %3251 }
 0x40f   :  { %v3137_v24 = vpop.permute.xlu2 %3136  ;;  %v1138_v21 = vmul.f32 %v3252_v11, %v4442_v29 }
 0x410   :  { %v744_v49 = vpop.f32.mrf.mxu3  ;;  %v3138_v58 = vunpack.i.l.bf16 %v3137_v24  ;;  %v3139_v50 = vunpack.i.h.bf16 %v3137_v24 }
 0x411   :  { %789 = vrot.lane.b32.xlu2 %v744_v49, %s3420_s23  ;;  %2969 = vmatmul.msk.f32.gmra.mxu3 %vm474_vm14, %v1138_v21 }
 0x412   :  { %989 = vmatpush.msra.mxu0 %v3138_v58 }
 0x414   :  { %990 = vmatpush.msra.mxu0 %v3139_v50 }
 0x41c   :  { %v747_v46 = vpop.f32.mrf.mxu3 }
 0x435   :  { %v957_v12 = vpop.f32.mrf.mxu3 }
 0x436   :  { %1002 = vrot.lane.b32.xlu0 %v957_v12, %s3421_s24 }
 0x438   :  { %v919_v37 = vpop.xlane.xlu1 %918 }
 0x43d   :  { %v960_v55 = vpop.f32.mrf.mxu3 }
 0x43e   :  { %1004 = vrot.lane.b32.xlu1 %v960_v55, %s3421_s24 }
 0x440   :  { %v1129_v35 = vpop.xlane.xlu0 %1128 }
 0x448   :  { %v703_v4 = vpop.xlane.xlu2 %702  ;;  %v1132_v30 = vpop.xlane.xlu0 %1131 }
 0x449   :  { %3253 = vrcp.f32 %v703_v4  ;;  %v3363_v4 = vld [vmem:[%s5303_s19] sm:$0xff] }
 0x44f   :  { %v3254_v29 = vpop.eup %3253 }
 0x450   :  { %v706_v18 = vpop.xlane.xlu2 %705  ;;  %v713_v54 = vmul.f32 %v3254_v29, %v3244_v23 }
 0x451   :  { %3255 = vrcp.f32 %v706_v18 }
 0x452   :  { %2946 = vmatmul.msk.f32.vlgmr.msrb.gmra.mxu0 %vm474_vm14, %v713_v54 }
 0x457   :  { %v3256_v22 = vpop.eup %3255 }
 0x458   :  { %v916_v62 = vpop.xlane.xlu2 %915  ;;  %v714_v41 = vmul.f32 %v3256_v22, %v3246_v2 }
 0x459   :  { %3257 = vrcp.f32 %v916_v62 }
 0x45a   :  { %2947 = vmatmul.msk.f32.gmra.mxu0 %vm474_vm14, %v714_v41  ;;  %3259 = vrcp.f32 %v919_v37  ;;  %v3364_v41 = vld [vmem:[%s5303_s19 + $0x8] sm:$0xff] }
 0x45b   :  { %3261 = vrcp.f32 %v1129_v35 }
 0x45c   :  { %3263 = vrcp.f32 %v1132_v30 }
 0x45f   :  { %v3258_v48 = vpop.eup %3257 }
 0x460   :  { %v926_v28 = vmul.f32 %v3258_v48, %v3248_v8  ;;  %v3142_v25 = vpop.permute.xlu2 %3141  ;;  %v3260_v57 = vpop.eup %3259 }
 0x461   :  { %v3143_v42 = vunpack.i.l.bf16 %v3142_v25  ;;  %v3144_v3 = vunpack.i.h.bf16 %v3142_v25  ;;  %v927_v19 = vmul.f32 %v3260_v57, %v4456_v1  ;;  %v3262_v13 = vpop.eup %3261 }
 0x462   :  { %2958 = vmatmul.msk.f32.vlgmr.msra.gmra.mxu0 %vm474_vm14, %v926_v28  ;;  %v1139_v14 = vmul.f32 %v3262_v13, %v4462_v33  ;;  %v3264_v17 = vpop.eup %3263  ;;  %v1239_v33 = vld [vmem:[%s5250_s6 + $0x18] sm:$0xff]  ;;  %v3423_v28 = vmov 32.0  }
 0x463   :  { %1202 = vmatpush.msrb.mxu0 %v3143_v42  ;;  %v1140_v63 = vmul.f32 %v3264_v17, %v4467_v59  ;;  %v1238_v59 = vld [vmem:[%s5250_s6 + $0x10] sm:$0xff]  ;;  %1268 = vmatpush.msrb.mxu1 %v1239_v33  ;;  %3265 = vrcp.f32 %v3423_v28 }
 0x465   :  { %1203 = vmatpush.msrb.mxu0 %v3144_v3  ;;  %1269 = vmatpush.msrb.mxu1 %v1238_v59 }
 0x467   :  { %1270 = vmatpush.msrb.mxu1 %v1237_v34 }
 0x469   :  { %1271 = vmatpush.msrb.mxu1 %v1236_v31  ;;  %v3266_v25 = vpop.eup %3265  ;;  %v3366_v31 = vld [vmem:[%s5303_s19 + $0x18] sm:$0xff] }
 0x46a   :  { %2959 = vmatmul.msk.f32.gmra.mxu0 %vm474_vm14, %v927_v19  ;;  %v1304_v42 = vmul.f32 32.0, %v3266_v25  ;;  %vm1308_vm3 = vweird.f32 %v3266_v25 }
 0x46b   :  { %v790_v45 = vpop.permute.xlu2 %789 }
 0x46c   :  { %802 = vst.msk [vmem:[#allocation2] sm:$0xff] %vm801_vm7, %v790_v45  ;;  %v1305_v35 = vsub.f32 1.0, %v1304_v42  ;;  %v4587_v42 = vld [vmem:[%s5252_s8] ss:$0 sm:$0xff] }
 0x46e   :  { %v1306_v3 = vmul.f32 %v3266_v25, %v1305_v35 }
 0x470   :  { %v1307_v57 = vadd.f32 %v3266_v25, %v1306_v3 }
 0x472   :  { %2970 = vmatmul.msk.f32.vlgmr.msrb.gmra.mxu0 %vm474_vm14, %v1139_v14  ;;  %v4544_v19 = vsel %vm1308_vm3, %v3266_v25, %v1307_v57  ;;  %v4592_v57 = vld [vmem:[%s5253_s9] ss:$0 sm:$0xff] }
 0x47a   :  { %2971 = vmatmul.msk.f32.gmra.mxu0 %vm474_vm14, %v1140_v63  ;;  %v3365_v63 = vld [vmem:[%s5303_s19 + $0x10] sm:$0xff] }
 0x48c   :  { %v1170_v23 = vpop.f32.mrf.mxu3 }
 0x48d   :  { %1215 = vrot.lane.b32.xlu2 %v1170_v23, %s5300_s28 }
 0x494   :  { %v1173_v1 = vpop.f32.mrf.mxu3 }
 0x495   :  { %791 = vrot.lane.b32.xlu2 %v747_v46, %s3420_s23  ;;  %v3186_v46 = vld [vmem:[%s5251_s7] ss:$0 sm:$0xff] }
 0x49d   :  { %1217 = vrot.lane.b32.xlu2 %v1173_v1, %s5300_s28 }
 0x4a8   :  { %v1003_v61 = vpop.permute.xlu0 %1002 }
 0x4a9   :  { %1015 = vst.msk [vmem:[#allocation2] sm:$0xff] %vm1014_vm2, %v1003_v61 }
 0x4b0   :  { %v1005_v32 = vpop.permute.xlu1 %1004 }
 0x4cf   :  { %v779_v53 = vpop.f32.mrf.mxu0 }
 0x4d0   :  { %793 = vrot.lane.b32.xlu0 %v779_v53, %s3420_s23 }
 0x4d7   :  { %v782_v0 = vpop.f32.mrf.mxu0 }
 0x4df   :  { %v992_v2 = vpop.f32.mrf.mxu0 }
 0x4e0   :  { %1006 = vrot.lane.b32.xlu2 %v992_v2, %s3421_s24 }
 0x4e7   :  { %v1216_v43 = vpop.permute.xlu2 %1215  ;;  %v995_v8 = vpop.f32.mrf.mxu0 }
 0x4e8   :  { %1228 = vst.msk [vmem:[#allocation2] sm:$0xff] %vm1227_vm1, %v1216_v43  ;;  %795 = vrot.lane.b32.xlu2 %v782_v0, %s3420_s23 }
 0x4ef   :  { %v792_v47 = vpop.permute.xlu2 %791  ;;  %v1205_v5 = vpop.f32.mrf.mxu0  ;;  %v1232_v20 = vld [vmem:[#allocation2] sm:$0xff] }
 0x4f0   :  { %803 = vst.msk [vmem:[#allocation2 + $0x8] sm:$0xff] %vm801_vm7, %v792_v47  ;;  %1219 = vrot.lane.b32.xlu0 %v1205_v5, %s5300_s28  ;;  %2972 = vmatmul.msk.f32.vlgmr.msrb.gmra.mxu1 %vm5391_vm5, %v1232_v20  ;;  %v1403_v20 = vld [vmem:[%s5254_s10 + $0x18] sm:$0xff]  ;;  %vm5402_vm5 = vmmov %vm5392_vm0 }
 0x4f1   :  { %1016 = vst.msk [vmem:[#allocation2 + $0x8] sm:$0xff] %vm1014_vm2, %v1005_v32  ;;  %1432 = vmatpush.msrb.mxu2 %v1403_v20  ;;  %v1402_v32 = vld [vmem:[%s5254_s10 + $0x10] sm:$0xff]  ;;  %v1460_v20 = vld [vmem:[%s5256_s12 + $0x38] sm:$0xff] }
 0x4f3   :  { %1433 = vmatpush.msrb.mxu2 %v1402_v32  ;;  %v1459_v32 = vld [vmem:[%s5256_s12 + $0x30] sm:$0xff] }
 0x4f7   :  { %v1218_v44 = vpop.permute.xlu2 %1217  ;;  %v1208_v16 = vpop.f32.mrf.mxu0 }
 0x4f8   :  { %1229 = vst.msk [vmem:[#allocation2 + $0x8] sm:$0xff] %vm1227_vm1, %v1218_v44  ;;  %1008 = vrot.lane.b32.xlu0 %v995_v8, %s3421_s24  ;;  %1221 = vrot.lane.b32.xlu1 %v1208_v16, %s5300_s28  ;;  %v1401_v44 = vld [vmem:[%s5254_s10 + $0x8] sm:$0xff]  ;;  %v1400_v16 = vld [vmem:[%s5254_s10] sm:$0xff]  ;;  %s3425_s28 = smov 128  }
 0x4f9   :  { %1434 = vmatpush.msrb.mxu2 %v1401_v44  ;;  %v1458_v44 = vld [vmem:[%s5256_s12 + $0x28] sm:$0xff] }
 0x4fb   :  { %1435 = vmatpush.msrb.mxu2 %v1400_v16 }
 0x4ff   :  { %v1233_v6 = vld [vmem:[#allocation2 + $0x8] sm:$0xff] }
 0x500   :  { %2973 = vmatmul.msk.f32.gmra.mxu1 %vm5392_vm0, %v1233_v6 }
 0x53a   :  { %v1007_v38 = vpop.permute.xlu2 %1006 }
 0x542   :  { %v794_v11 = vpop.permute.xlu0 %793  ;;  %v796_v49 = vpop.permute.xlu2 %795 }
 0x543   :  { %804 = vst.msk [vmem:[#allocation2 + $0x10] sm:$0xff] %vm801_vm7, %v794_v11 }
 0x544   :  { %1017 = vst.msk [vmem:[#allocation2 + $0x10] sm:$0xff] %vm1014_vm2, %v1007_v38 }
 0x545   :  { %805 = vst.msk [vmem:[#allocation2 + $0x18] sm:$0xff] %vm801_vm7, %v796_v49 }
 0x562   :  { %v1220_v24 = vpop.permute.xlu0 %1219 }
 0x563   :  { %1230 = vst.msk [vmem:[#allocation2 + $0x10] sm:$0xff] %vm1227_vm1, %v1220_v24 }
 0x56a   :  { %v1009_v21 = vpop.permute.xlu0 %1008  ;;  %v1222_v58 = vpop.permute.xlu1 %1221  ;;  %v1234_v50 = vld [vmem:[#allocation2 + $0x10] sm:$0xff] }
 0x56b   :  { %1018 = vst.msk [vmem:[#allocation2 + $0x18] sm:$0xff] %vm1014_vm2, %v1009_v21  ;;  %2974 = vmatmul.msk.f32.gmra.mxu1 %vm5393_vm9, %v1234_v50 }
 0x56c   :  { %1231 = vst.msk [vmem:[#allocation2 + $0x18] sm:$0xff] %vm1227_vm1, %v1222_v58 }
 0x56d   :  { %v1273_v12 = vpop.f32.mrf.mxu1 }
 0x56e   :  { %v1274_v55 = vadd.f32 %v3186_v46, %v1273_v12 }
 0x570   :  { %v1285_v29 = vadd.f32 %v3363_v4, %v1274_v55 }
 0x572   :  { %v1291_v18 = vsel %vm5394_vm12, %v1285_v29, 0.0 }
 0x573   :  { %1292 = vadd.xlane.f32.xlu2 %v1291_v18  ;;  %v1235_v54 = vld [vmem:[#allocation2 + $0x18] sm:$0xff] }
 0x574   :  { %2975 = vmatmul.msk.f32.gmra.mxu1 %vm5395_vm6, %v1235_v54  ;;  %vm5403_vm6 = vmmov %vm5397_vm4 }
 0x57d   :  { %v1276_v22 = vpop.f32.mrf.mxu1 }
 0x57e   :  { %v1277_v62 = vadd.f32 %v3186_v46, %v1276_v22 }
 0x580   :  { %v1286_v37 = vadd.f32 %v3364_v41, %v1277_v62 }
 0x582   :  { %v1294_v48 = vsel %vm5396_vm13, %v1286_v37, 0.0 }
 0x583   :  { %1295 = vadd.xlane.f32.xlu0 %v1294_v48 }
 0x5e6   :  { %v1293_v45 = vpop.xlane.xlu2 %1292 }
 0x5e7   :  { %v1310_v30 = vmul.f32 %v4544_v19, %v1293_v45 }
 0x5e8   :  { %v1279_v13 = vpop.f32.mrf.mxu1 }
 0x5e9   :  { %v1314_v14 = vsub.f32 %v1285_v29, %v1310_v30  ;;  %v1280_v17 = vadd.f32 %v3186_v46, %v1279_v13 }
 0x5eb   :  { %v1287_v23 = vadd.f32 %v3365_v63, %v1280_v17  ;;  %v1318_v1 = vmul.f32 %v1314_v14, %v1314_v14 }
 0x5ed   :  { %v1297_v61 = vsel %vm5397_vm4, %v1287_v23, 0.0  ;;  %v1322_v33 = vsel %vm5398_vm8, %v1318_v1, 0.0  ;;  %vm5404_vm8 = vmmov %vm5402_vm5 }
 0x5ee   :  { %1298 = vadd.xlane.f32.xlu1 %v1297_v61  ;;  %1323 = vadd.xlane.f32.xlu0 %v1322_v33 }
 0x5f1   :  { %v1282_v59 = vpop.f32.mrf.mxu1 }
 0x5f2   :  { %v1283_v34 = vadd.f32 %v3186_v46, %v1282_v59 }
 0x5f4   :  { %v1288_v53 = vadd.f32 %v3366_v31, %v1283_v34  ;;  %v1468_v31 = vld [vmem:[%s5256_s12 + $0x78] sm:$0xff] }
 0x5f5   :  { %1473 = vmatpush.msrb.mxu3 %v1468_v31 }
 0x5f6   :  { %v1296_v0 = vpop.xlane.xlu0 %1295  ;;  %v1300_v2 = vsel %vm5399_vm10, %v1288_v53, 0.0 }
 0x5f7   :  { %v1311_v43 = vmul.f32 %v4544_v19, %v1296_v0  ;;  %1301 = vadd.xlane.f32.xlu2 %v1300_v2  ;;  %v1466_v0 = vld [vmem:[%s5256_s12 + $0x68] sm:$0xff]  ;;  %v1465_v2 = vld [vmem:[%s5256_s12 + $0x60] sm:$0xff] }
 0x5f9   :  { %v1315_v8 = vsub.f32 %v1286_v37, %v1311_v43  ;;  %v1464_v43 = vld [vmem:[%s5256_s12 + $0x58] sm:$0xff] }
 0x5fb   :  { %v1319_v47 = vmul.f32 %v1315_v8, %v1315_v8 }
 0x5fd   :  { %v1325_v5 = vsel %vm5400_vm11, %v1319_v47, 0.0  ;;  %v1462_v47 = vld [vmem:[%s5256_s12 + $0x48] sm:$0xff] }
 0x5ff   :  { %1326 = vadd.xlane.f32.xlu2 %v1325_v5  ;;  %v1461_v5 = vld [vmem:[%s5256_s12 + $0x40] sm:$0xff] }
 0x661   :  { %v1299_v6 = vpop.xlane.xlu1 %1298  ;;  %v1324_v38 = vpop.xlane.xlu0 %1323 }
 0x662   :  { %v1312_v11 = vmul.f32 %v4544_v19, %v1299_v6  ;;  %v1334_v49 = vmul.f32 %v1324_v38, %v4544_v19  ;;  %v1457_v6 = vld [vmem:[%s5256_s12 + $0x20] sm:$0xff] }
 0x664   :  { %v4572_v24 = vsub.f32 %v1287_v23, %v1312_v11  ;;  %v1338_v21 = vadd.f32 1e-05, %v1334_v49  ;;  %v1456_v11 = vld [vmem:[%s5256_s12 + $0x18] sm:$0xff] }
 0x666   :  { %3267 = vrsqrt.f32 %v1338_v21  ;;  %v1320_v58 = vmul.f32 %v4572_v24, %v4572_v24  ;;  %vm1348_vm9 = vweird.f32 %v1338_v21 }
 0x668   :  { %v1328_v50 = vsel %vm5401_vm15, %v1320_v58, 0.0  ;;  %v1454_v58 = vld [vmem:[%s5256_s12 + $0x8] sm:$0xff] }
 0x669   :  { %1329 = vadd.xlane.f32.xlu1 %v1328_v50  ;;  %v1453_v50 = vld [vmem:[%s5256_s12] sm:$0xff] }
 0x66a   :  { %v1302_v46 = vpop.xlane.xlu2 %1301 }
 0x66b   :  { %v1313_v12 = vmul.f32 %v4544_v19, %v1302_v46 }
 0x66c   :  { %v3268_v55 = vpop.eup %3267 }
 0x66d   :  { %v1343_v4 = vmul.f32 %v3268_v55, %v1338_v21  ;;  %v4578_v29 = vsub.f32 %v1288_v53, %v1313_v12  ;;  %vm1349_vm0 = vweird.f32 %v3268_v55  ;;  %v1467_v53 = vld [vmem:[%s5256_s12 + $0x70] sm:$0xff] }
 0x66e   :  { %vm1350_vm12 = vmor %vm1348_vm9, %vm1349_vm0  ;;  %1474 = vmatpush.msrb.mxu3 %v1467_v53  ;;  %v1455_v21 = vld [vmem:[%s5256_s12 + $0x10] sm:$0xff] }
 0x66f   :  { %v1344_v18 = vmul.f32 %v3268_v55, %v1343_v4  ;;  %v1321_v54 = vmul.f32 %v4578_v29, %v4578_v29  ;;  %vm5405_vm9 = vmmov %vm5403_vm6 }
 0x670   :  { %1475 = vmatpush.msrb.mxu3 %v1466_v0 }
 0x671   :  { %v1345_v22 = vmul.f32 0.5, %v1344_v18  ;;  %v1331_v62 = vsel %vm5402_vm5, %v1321_v54, 0.0 }
 0x672   :  { %1332 = vadd.xlane.f32.xlu0 %v1331_v62  ;;  %v1327_v41 = vpop.xlane.xlu2 %1326  ;;  %1476 = vmatpush.msrb.mxu3 %v1465_v2 }
 0x673   :  { %v1346_v37 = vsub.f32 1.5, %v1345_v22  ;;  %v1335_v48 = vmul.f32 %v1327_v41, %v4544_v19 }
 0x674   :  { %1477 = vmatpush.msrb.mxu3 %v1464_v43 }
 0x675   :  { %v1347_v28 = vmul.f32 %v3268_v55, %v1346_v37  ;;  %v1339_v25 = vadd.f32 1e-05, %v1335_v48 }
 0x677   :  { %v1351_v35 = vsel %vm1350_vm12, %v3268_v55, %v1347_v28  ;;  %3269 = vrsqrt.f32 %v1339_v25  ;;  %vm1358_vm3 = vweird.f32 %v1339_v25 }
 0x678   :  { %v1382_v3 = vmul.f32 %v1351_v35, %v1314_v14 }
 0x67a   :  { %v1389_v45 = vmul.f32 %v4587_v42, %v1382_v3 }
 0x67c   :  { %v4596_v30 = vadd.f32 %v4592_v57, %v1389_v45 }
 0x67d   :  { %v3270_v13 = vpop.eup %3269 }
 0x67e   :  { %v1353_v17 = vmul.f32 %v3270_v13, %v1339_v25  ;;  %2976 = vmatmul.msk.f32.vlgmr.msrb.gmra.mxu2 %vm5403_vm6, %v4596_v30  ;;  %vm1359_vm13 = vweird.f32 %v3270_v13 }
 0x67f   :  { %vm1360_vm4 = vmor %vm1358_vm3, %vm1359_vm13 }
 0x680   :  { %v1354_v63 = vmul.f32 %v3270_v13, %v1353_v17  ;;  %vm5406_vm13 = vmmov %vm5403_vm6 }
 0x681   :  { %vm5407_vm3 = vmmov %vm5403_vm6 }
 0x682   :  { %v1355_v23 = vmul.f32 0.5, %v1354_v63 }
 0x684   :  { %v1356_v1 = vsub.f32 1.5, %v1355_v23 }
 0x686   :  { %v1357_v14 = vmul.f32 %v3270_v13, %v1356_v1 }
 0x688   :  { %v1361_v61 = vsel %vm1360_vm4, %v3270_v13, %v1357_v14  ;;  %v3189_v14 = vld [vmem:[%s5255_s11] ss:$0 sm:$0xff]  ;;  %vm5408_vm4 = vmmov %vm5407_vm3 }
 0x689   :  { %v1383_v33 = vmul.f32 %v1361_v61, %v1315_v8  ;;  %v1463_v8 = vld [vmem:[%s5256_s12 + $0x50] sm:$0xff] }
 0x68a   :  { %1478 = vmatpush.msrb.mxu3 %v1463_v8 }
 0x68b   :  { %v1390_v59 = vmul.f32 %v4587_v42, %v1383_v33 }
 0x68c   :  { %1479 = vmatpush.msrb.mxu3 %v1462_v47 }
 0x68d   :  { %v4602_v34 = vadd.f32 %v4592_v57, %v1390_v59 }
 0x68e   :  { %1480 = vmatpush.msrb.mxu3 %v1461_v5 }
 0x68f   :  { %2977 = vmatmul.msk.f32.gmra.mxu2 %vm5404_vm8, %v4602_v34  ;;  %vm5409_vm8 = vmmov %vm5407_vm3 }
 0x690   :  { %1481 = vmatpush.msrb.mxu3 %v1460_v20 }
 0x692   :  { %1482 = vmatpush.msrb.mxu3 %v1459_v32 }
 0x694   :  { %1483 = vmatpush.msrb.mxu3 %v1458_v44 }
 0x696   :  { %1484 = vmatpush.msrb.mxu3 %v1457_v6 }
 0x698   :  { %1485 = vmatpush.msrb.mxu3 %v1456_v11 }
 0x69a   :  { %1486 = vmatpush.msrb.mxu3 %v1455_v21 }
 0x69c   :  { %1487 = vmatpush.msrb.mxu3 %v1454_v58 }
 0x69e   :  { %1488 = vmatpush.msrb.mxu3 %v1453_v50 }
 0x6dc   :  { %v1330_v16 = vpop.xlane.xlu1 %1329 }
 0x6dd   :  { %v1336_v38 = vmul.f32 %v1330_v16, %v4544_v19 }
 0x6df   :  { %v1340_v49 = vadd.f32 1e-05, %v1336_v38 }
 0x6e1   :  { %3271 = vrsqrt.f32 %v1340_v49  ;;  %vm1368_vm11 = vweird.f32 %v1340_v49 }
 0x6e5   :  { %v1333_v46 = vpop.xlane.xlu0 %1332 }
 0x6e6   :  { %v1337_v12 = vmul.f32 %v1333_v46, %v4544_v19 }
 0x6e7   :  { %v3272_v55 = vpop.eup %3271 }
 0x6e8   :  { %v1363_v4 = vmul.f32 %v3272_v55, %v1340_v49  ;;  %v1341_v18 = vadd.f32 1e-05, %v1337_v12  ;;  %vm1369_vm10 = vweird.f32 %v3272_v55 }
 0x6e9   :  { %vm1370_vm15 = vmor %vm1368_vm11, %vm1369_vm10 }
 0x6ea   :  { %v1364_v54 = vmul.f32 %v3272_v55, %v1363_v4  ;;  %3273 = vrsqrt.f32 %v1341_v18  ;;  %vm1378_vm0 = vweird.f32 %v1341_v18  ;;  %vm5410_vm10 = vmmov %vm5407_vm3 }
 0x6eb   :  { %vm5411_vm11 = vmmov %vm5407_vm3 }
 0x6ec   :  { %v1365_v22 = vmul.f32 0.5, %v1364_v54 }
 0x6ee   :  { %v1366_v62 = vsub.f32 1.5, %v1365_v22 }
 0x6f0   :  { %v3274_v41 = vpop.eup %3273  ;;  %v1367_v37 = vmul.f32 %v3272_v55, %v1366_v62 }
 0x6f1   :  { %v1373_v48 = vmul.f32 %v3274_v41, %v1341_v18  ;;  %vm1379_vm5 = vweird.f32 %v3274_v41 }
 0x6f2   :  { %v1371_v28 = vsel %vm1370_vm15, %v3272_v55, %v1367_v37  ;;  %vm1380_vm12 = vmor %vm1378_vm0, %vm1379_vm5 }
 0x6f3   :  { %v1374_v25 = vmul.f32 %v3274_v41, %v1373_v48  ;;  %v1384_v35 = vmul.f32 %v1371_v28, %v4572_v24  ;;  %vm5412_vm15 = vmmov %vm5407_vm3 }
 0x6f4   :  { %vm5413_vm5 = vmmov %vm5407_vm3 }
 0x6f5   :  { %v1375_v3 = vmul.f32 0.5, %v1374_v25  ;;  %v1391_v45 = vmul.f32 %v4587_v42, %v1384_v35  ;;  %v2983_v35 = vld [vmem:[%s5248_s4 + $0x38] sm:$0xff] }
 0x6f6   :  { %1644 = vmatpush.msra.mxu0 %v2983_v35 }
 0x6f7   :  { %v1376_v13 = vsub.f32 1.5, %v1375_v3  ;;  %v1398_v17 = vadd.f32 %v4592_v57, %v1391_v45  ;;  %v2982_v3 = vld [vmem:[%s5248_s4 + $0x30] sm:$0xff]  ;;  %v2981_v45 = vld [vmem:[%s5248_s4 + $0x28] sm:$0xff] }
 0x6f8   :  { %1645 = vmatpush.msra.mxu0 %v2982_v3 }
 0x6f9   :  { %v1377_v63 = vmul.f32 %v3274_v41, %v1376_v13  ;;  %2978 = vmatmul.msk.f32.gmra.mxu2 %vm5405_vm9, %v1398_v17  ;;  %v2980_v13 = vld [vmem:[%s5248_s4 + $0x20] sm:$0xff] }
 0x6fa   :  { %1646 = vmatpush.msra.mxu0 %v2981_v45 }
 0x6fb   :  { %v1381_v23 = vsel %vm1380_vm12, %v3274_v41, %v1377_v63 }
 0x6fc   :  { %v1385_v1 = vmul.f32 %v1381_v23, %v4578_v29  ;;  %1647 = vmatpush.msra.mxu0 %v2980_v13 }
 0x6fe   :  { %v1392_v24 = vmul.f32 %v4587_v42, %v1385_v1  ;;  %v3190_v42 = vld [vmem:[%s5257_s13] ss:$0 sm:$0xff] }
 0x700   :  { %v1399_v61 = vadd.f32 %v4592_v57, %v1392_v24 }
 0x701   :  { %v1437_v33 = vpop.f32.mrf.mxu2 }
 0x702   :  { %v1438_v59 = vadd.f32 %v3189_v14, %v1437_v33  ;;  %2979 = vmatmul.msk.f32.gmra.mxu2 %vm5403_vm6, %v1399_v61  ;;  %vm5414_vm6 = vmmov %vm5407_vm3 }
 0x704   :  { %v1449_v31 = vmax.f32 %v1438_v59, 0.0 }
 0x706   :  { %1489 = vmatmul.f32.vlgmr.msrb.gmra.mxu3 %v1449_v31 }
 0x712   :  { %v1440_v53 = vpop.f32.mrf.mxu2 }
 0x713   :  { %v1441_v0 = vadd.f32 %v3189_v14, %v1440_v53 }
 0x715   :  { %v1450_v2 = vmax.f32 %v1441_v0, 0.0 }
 0x717   :  { %1492 = vmatmul.f32.gmra.mxu3 %v1450_v2 }
 0x77c   :  { %v1443_v43 = vpop.f32.mrf.mxu2 }
 0x77d   :  { %v1444_v29 = vadd.f32 %v3189_v14, %v1443_v43 }
 0x77f   :  { %v1451_v8 = vmax.f32 %v1444_v29, 0.0 }
 0x781   :  { %1495 = vmatmul.f32.gmra.mxu3 %v1451_v8 }
 0x785   :  { %v1446_v47 = vpop.f32.mrf.mxu2 }
 0x786   :  { %v1447_v5 = vadd.f32 %v3189_v14, %v1446_v47 }
 0x788   :  { %v1452_v57 = vmax.f32 %v1447_v5, 0.0 }
 0x789   :  { %v1490_v20 = vpop.f32.mrf.mxu3 }
 0x78a   :  { %v1491_v32 = vadd.f32 %v3190_v42, %v1490_v20  ;;  %1498 = vmatmul.f32.gmra.mxu3 %v1452_v57 }
 0x78c   :  { %v1502_v44 = vadd.f32 %v1491_v32, %v4596_v30 }
 0x78e   :  { %v1508_v16 = vsel %vm5406_vm13, %v1502_v44, 0.0 }
 0x78f   :  { %1509 = vadd.xlane.f32.xlu2 %v1508_v16 }
 0x79a   :  { %v1493_v6 = vpop.f32.mrf.mxu3 }
 0x79b   :  { %v1494_v38 = vadd.f32 %v3190_v42, %v1493_v6 }
 0x79d   :  { %v1503_v11 = vadd.f32 %v1494_v38, %v4602_v34  ;;  %v3192_v38 = vld [vmem:[%s5259_s15] ss:$0 sm:$0xff] }
 0x79f   :  { %v1511_v49 = vsel %vm5407_vm3, %v1503_v11, 0.0 }
 0x7a0   :  { %1512 = vadd.xlane.f32.xlu1 %v1511_v49 }
 0x802   :  { %v1510_v21 = vpop.xlane.xlu2 %1509 }
 0x803   :  { %v1520_v58 = vmul.f32 %v1510_v21, %v4544_v19 }
 0x804   :  { %v1496_v50 = vpop.f32.mrf.mxu3 }
 0x805   :  { %v1524_v46 = vsub.f32 %v1502_v44, %v1520_v58  ;;  %v1497_v12 = vadd.f32 %v3190_v42, %v1496_v50  ;;  %v3191_v44 = vld [vmem:[%s5258_s14] ss:$0 sm:$0xff] }
 0x807   :  { %v1504_v55 = vadd.f32 %v1497_v12, %v1398_v17  ;;  %v1528_v4 = vmul.f32 %v1524_v46, %v1524_v46 }
 0x809   :  { %v1514_v30 = vsel %vm5408_vm4, %v1504_v55, 0.0  ;;  %v1532_v18 = vsel %vm5409_vm8, %v1528_v4, 0.0  ;;  %vm5415_vm8 = vmmov %vm5413_vm5 }
 0x80a   :  { %1515 = vadd.xlane.f32.xlu0 %v1514_v30  ;;  %1533 = vadd.xlane.f32.xlu1 %v1532_v18 }
 0x80d   :  { %v1499_v54 = vpop.f32.mrf.mxu3 }
 0x80e   :  { %v1500_v22 = vadd.f32 %v3190_v42, %v1499_v54 }
 0x810   :  { %v1505_v34 = vadd.f32 %v1500_v22, %v1399_v61 }
 0x812   :  { %v1517_v62 = vsel %vm5410_vm10, %v1505_v34, 0.0 }
 0x813   :  { %1518 = vadd.xlane.f32.xlu2 %v1517_v62  ;;  %v1513_v41 = vpop.xlane.xlu1 %1512 }
 0x814   :  { %v1521_v37 = vmul.f32 %v1513_v41, %v4544_v19 }
 0x816   :  { %v1525_v48 = vsub.f32 %v1503_v11, %v1521_v37 }
 0x818   :  { %v1529_v28 = vmul.f32 %v1525_v48, %v1525_v48 }
 0x81a   :  { %v1535_v25 = vsel %vm5411_vm11, %v1529_v28, 0.0 }
 0x81b   :  { %1536 = vadd.xlane.f32.xlu0 %v1535_v25 }
 0x87d   :  { %v1516_v17 = vpop.xlane.xlu0 %1515  ;;  %v1534_v63 = vpop.xlane.xlu1 %1533 }
 0x87e   :  { %v1522_v23 = vmul.f32 %v1516_v17, %v4544_v19  ;;  %v1544_v1 = vmul.f32 %v1534_v63, %v4544_v19 }
 0x880   :  { %v4694_v14 = vsub.f32 %v1504_v55, %v1522_v23  ;;  %v1548_v24 = vadd.f32 1e-05, %v1544_v1 }
 0x882   :  { %3275 = vrsqrt.f32 %v1548_v24  ;;  %v1530_v61 = vmul.f32 %v4694_v14, %v4694_v14  ;;  %vm1558_vm9 = vweird.f32 %v1548_v24 }
 0x884   :  { %v1538_v33 = vsel %vm5412_vm15, %v1530_v61, 0.0 }
 0x885   :  { %1539 = vadd.xlane.f32.xlu2 %v1538_v33 }
 0x886   :  { %v1519_v59 = vpop.xlane.xlu2 %1518 }
 0x887   :  { %v1523_v31 = vmul.f32 %v1519_v59, %v4544_v19 }
 0x888   :  { %v3276_v53 = vpop.eup %3275 }
 0x889   :  { %v1553_v0 = vmul.f32 %v3276_v53, %v1548_v24  ;;  %v4700_v2 = vsub.f32 %v1505_v34, %v1523_v31  ;;  %vm1559_vm0 = vweird.f32 %v3276_v53 }
 0x88a   :  { %vm1560_vm12 = vmor %vm1558_vm9, %vm1559_vm0 }
 0x88b   :  { %v1554_v43 = vmul.f32 %v3276_v53, %v1553_v0  ;;  %v1531_v29 = vmul.f32 %v4700_v2, %v4700_v2  ;;  %vm5416_vm9 = vmmov %vm5414_vm6 }
 0x88d   :  { %v1555_v8 = vmul.f32 0.5, %v1554_v43  ;;  %v1541_v47 = vsel %vm5413_vm5, %v1531_v29, 0.0 }
 0x88e   :  { %v1537_v5 = vpop.xlane.xlu0 %1536  ;;  %1542 = vadd.xlane.f32.xlu1 %v1541_v47  ;;  %v3193_v47 = vld [vmem:[%s5249_s5 + $0x1] ss:$0 sm:$0xff]  ;;  %s5418_s5 = smov 88  }
 0x88f   :  { %v1556_v42 = vsub.f32 1.5, %v1555_v8  ;;  %v1545_v57 = vmul.f32 %v1537_v5, %v4544_v19 }
 0x891   :  { %v1557_v20 = vmul.f32 %v3276_v53, %v1556_v42  ;;  %v1549_v32 = vadd.f32 1e-05, %v1545_v57 }
 0x893   :  { %v1561_v16 = vsel %vm1560_vm12, %v3276_v53, %v1557_v20  ;;  %3277 = vrsqrt.f32 %v1549_v32  ;;  %vm1568_vm3 = vweird.f32 %v1549_v32 }
 0x894   :  { %v1592_v6 = vmul.f32 %v1561_v16, %v1524_v46 }
 0x896   :  { %v1599_v11 = vmul.f32 %v3191_v44, %v1592_v6 }
 0x898   :  { %v4712_v49 = vadd.f32 %v3192_v38, %v1599_v11 }
 0x899   :  { %v3278_v21 = vpop.eup %3277 }
 0x89a   :  { %v1563_v58 = vmul.f32 %v3278_v21, %v1549_v32  ;;  %2985 = vmatmul.msk.f32.vlgmr.msra.gmra.mxu0 %vm5414_vm6, %v4712_v49  ;;  %vm1569_vm13 = vweird.f32 %v3278_v21 }
 0x89b   :  { %vm1570_vm4 = vmor %vm1568_vm3, %vm1569_vm13  ;;  %vm5419_vm13 = vcmask 64512  }
 0x89c   :  { %v1564_v50 = vmul.f32 %v3278_v21, %v1563_v58  ;;  %vm5421_vm3 = vmmov %vm5419_vm13 }
 0x89e   :  { %v1565_v12 = vmul.f32 0.5, %v1564_v50 }
 0x8a0   :  { %v1566_v55 = vsub.f32 1.5, %v1565_v12 }
 0x8a2   :  { %v1567_v4 = vmul.f32 %v3278_v21, %v1566_v55 }
 0x8a4   :  { %v1571_v46 = vsel %vm1570_vm4, %v3278_v21, %v1567_v4  ;;  %vm5422_vm4 = vmmov %vm5421_vm3 }
 0x8a5   :  { %v1593_v30 = vmul.f32 %v1571_v46, %v1525_v48 }
 0x8a7   :  { %v1600_v18 = vmul.f32 %v3191_v44, %v1593_v30 }
 0x8a9   :  { %v4716_v54 = vadd.f32 %v3192_v38, %v1600_v18 }
 0x8ab   :  { %2986 = vmatmul.msk.f32.gmra.mxu0 %vm5415_vm8, %v4716_v54  ;;  %vm5423_vm8 = vmmov %vm5421_vm3 }
 0x8f8   :  { %v1540_v22 = vpop.xlane.xlu2 %1539 }
 0x8f9   :  { %v1546_v34 = vmul.f32 %v1540_v22, %v4544_v19 }
 0x8fb   :  { %v1550_v62 = vadd.f32 1e-05, %v1546_v34 }
 0x8fd   :  { %3279 = vrsqrt.f32 %v1550_v62  ;;  %vm1578_vm11 = vweird.f32 %v1550_v62 }
 0x901   :  { %v1543_v41 = vpop.xlane.xlu1 %1542 }
 0x902   :  { %v1547_v37 = vmul.f32 %v1543_v41, %v4544_v19 }
 0x903   :  { %v3280_v28 = vpop.eup %3279 }
 0x904   :  { %v1573_v25 = vmul.f32 %v3280_v28, %v1550_v62  ;;  %v1551_v35 = vadd.f32 1e-05, %v1547_v37  ;;  %vm1579_vm10 = vweird.f32 %v3280_v28 }
 0x905   :  { %vm1580_vm15 = vmor %vm1578_vm11, %vm1579_vm10 }
 0x906   :  { %v1574_v3 = vmul.f32 %v3280_v28, %v1573_v25  ;;  %3281 = vrsqrt.f32 %v1551_v35  ;;  %vm1588_vm0 = vweird.f32 %v1551_v35  ;;  %vm5424_vm10 = vmmov %vm5421_vm3 }
 0x907   :  { %vm5425_vm11 = vmmov %vm5421_vm3 }
 0x908   :  { %v1575_v48 = vmul.f32 0.5, %v1574_v3 }
 0x90a   :  { %v1576_v45 = vsub.f32 1.5, %v1575_v48 }
 0x90c   :  { %v3282_v13 = vpop.eup %3281  ;;  %v1577_v17 = vmul.f32 %v3280_v28, %v1576_v45 }
 0x90d   :  { %v1583_v63 = vmul.f32 %v3282_v13, %v1551_v35  ;;  %vm1589_vm5 = vweird.f32 %v3282_v13 }
 0x90e   :  { %v1581_v23 = vsel %vm1580_vm15, %v3280_v28, %v1577_v17  ;;  %vm1590_vm12 = vmor %vm1588_vm0, %vm1589_vm5 }
 0x90f   :  { %v1584_v1 = vmul.f32 %v3282_v13, %v1583_v63  ;;  %v1594_v24 = vmul.f32 %v1581_v23, %v4694_v14  ;;  %vm5426_vm15 = vmmov %vm5421_vm3 }
 0x910   :  { %vm5427_vm5 = vmmov %vm5421_vm3 }
 0x911   :  { %v1585_v61 = vmul.f32 0.5, %v1584_v1  ;;  %v1601_v33 = vmul.f32 %v3191_v44, %v1594_v24  ;;  %vm5428_vm0 = vmmov %vm5421_vm3 }
 0x913   :  { %v1586_v59 = vsub.f32 1.5, %v1585_v61  ;;  %v4723_v31 = vadd.f32 %v3192_v38, %v1601_v33 }
 0x915   :  { %v1587_v53 = vmul.f32 %v3282_v13, %v1586_v59  ;;  %2987 = vmatmul.msk.f32.gmra.mxu0 %vm5416_vm9, %v4723_v31  ;;  %vm5429_vm9 = vmmov %vm5428_vm0 }
 0x917   :  { %v1591_v0 = vsel %vm1590_vm12, %v3282_v13, %v1587_v53  ;;  %v1649_v14 = vpop.f32.mrf.mxu0  ;;  %vm5430_vm12 = vmmov %vm5428_vm0 }
 0x918   :  { %v1595_v43 = vmul.f32 %v1591_v0, %v4700_v2  ;;  %v4739_v57 = vadd.f32 %v3193_v47, %v1649_v14 }
 0x91a   :  { %v1602_v29 = vmul.f32 %v3191_v44, %v1595_v43 }
 0x91c   :  { %v4728_v8 = vadd.f32 %v3192_v38, %v1602_v29  ;;  %v5451_v29 = vld [vmem:[#allocation15_spill] sm:$0xff] }
 0x91e   :  { %2988 = vmatmul.msk.f32.gmra.mxu0 %vm5414_vm6, %v4728_v8  ;;  %vm5431_vm6 = vmmov %vm5428_vm0 }
 0x928   :  { %v1652_v5 = vpop.f32.mrf.mxu0 }
 0x929   :  { %v4735_v42 = vadd.f32 %v3193_v47, %v1652_v5 }
 0x92b   :  { %1665 = vrot.lane.b32.xlu1 %v4735_v42, %s5417_s18 }
 0x933   :  { %1853 = vrot.lane.b32.xlu1 %v4739_v57, %s3410_s30 }
 0x93b   :  { %2071 = vrot.lane.b32.xlu1 %v4735_v42, %s3415_s2 }
 0x992   :  { %v1655_v2 = vpop.f32.mrf.mxu0 }
 0x993   :  { %v1656_v20 = vadd.f32 %v3193_v47, %v1655_v2 }
 0x995   :  { %1892 = vrot.lane.b32.xlu1 %v1656_v20, %s3410_s30  ;;  %1700 = vrot.lane.b32.xlu2 %v1656_v20, %s5417_s18 }
 0x99b   :  { %v1658_v32 = vpop.f32.mrf.mxu0 }
 0x99c   :  { %v1659_v44 = vadd.f32 %v3193_v47, %v1658_v32 }
 0x99d   :  { %v1666_v16 = vpop.permute.xlu1 %1665  ;;  %2067 = vrot.lane.b32.xlu1 %v4735_v42, %s5344_s27  ;;  %1857 = vrot.lane.b32.xlu2 %v4739_v57, %s5418_s5 }
 0x99e   :  { %2989 = vmatpush.xpose.msk.msra.mxu1 %vm5419_vm13, %v1666_v16  ;;  %1702 = vrot.lane.b32.xlu0 %v1659_v44, %s5417_s18  ;;  %v4771_v6 = vpack.i.bf16 %v1656_v20, %v1659_v44  ;;  %vm5432_vm13 = vmmov %vm5428_vm0 }
 0x9a5   :  { %2108 = vrot.lane.b32.xlu1 %v1656_v20, %s3415_s2  ;;  %2069 = vrot.lane.b32.xlu2 %v4739_v57, %s3415_s2  ;;  %v1854_v11 = vpop.permute.xlu1 %1853 }
 0x9a6   :  { %1663 = vrot.lane.b32.xlu0 %v4739_v57, %s5417_s18 }
 0x9ad   :  { %2277 = vrot.lane.b32.xlu1 %v4739_v57, %s3418_s3  ;;  %2283 = vrot.lane.b32.xlu2 %v4735_v42, %s5358_s29  ;;  %v2072_v58 = vpop.permute.xlu1 %2071 }
 0x9ae   :  { %1859 = vrot.lane.b32.xlu0 %v4735_v42, %s5418_s5 }
 0x9b5   :  { %2322 = vrot.lane.b32.xlu1 %v1659_v44, %s5358_s29  ;;  %1898 = vrot.lane.b32.xlu2 %v1659_v44, %s5418_s5 }
 0x9b6   :  { %1855 = vrot.lane.b32.xlu0 %v4735_v42, %s3410_s30 }
 0x9bd   :  { %2318 = vrot.lane.b32.xlu1 %v1659_v44, %s3418_s3  ;;  %1894 = vrot.lane.b32.xlu2 %v1659_v44, %s3410_s30  ;;  %s5453_s30 = smov 48  }
 0x9be   :  { %1896 = vrot.lane.b32.xlu0 %v1656_v20, %s5418_s5 }
 0x9c5   :  { %3161 = vrot.lane.b32.xlu1 %v4771_v6, %s5379_s1  ;;  %2104 = vrot.lane.b32.xlu2 %v1656_v20, %s5344_s27 }
 0x9c6   :  { %2065 = vrot.lane.b32.xlu0 %v4739_v57, %s5344_s27 }
 0x9cd   :  { %3166 = vrot.lane.b32.xlu1 %v4771_v6, %s5420_s20  ;;  %2279 = vrot.lane.b32.xlu2 %v4735_v42, %s3418_s3 }
 0x9ce   :  { %2110 = vrot.lane.b32.xlu0 %v1659_v44, %s3415_s2  ;;  %s5455_s2 = smov 40  }
 0x9d5   :  { %2316 = vrot.lane.b32.xlu2 %v1656_v20, %s3418_s3 }
 0x9d6   :  { %2281 = vrot.lane.b32.xlu0 %v4739_v57, %s5358_s29 }
 0x9de   :  { %2106 = vrot.lane.b32.xlu0 %v1659_v44, %s5344_s27  ;;  %s5459_s27 = smov 24  }
 0x9e6   :  { %2320 = vrot.lane.b32.xlu0 %v1656_v20, %s5358_s29 }
 0x9ef   :  { %v1701_v38 = vpop.permute.xlu2 %1700 }
 0x9f7   :  { %v1858_v21 = vpop.permute.xlu2 %1857 }
 0x9ff   :  { %v2070_v50 = vpop.permute.xlu2 %2069 }
 0xa07   :  { %v1893_v12 = vpop.permute.xlu1 %1892  ;;  %v2284_v55 = vpop.permute.xlu2 %2283 }
 0xa0f   :  { %v2068_v4 = vpop.permute.xlu1 %2067  ;;  %v1899_v46 = vpop.permute.xlu2 %1898 }
 0xa10   :  { %v1703_v30 = vpop.permute.xlu0 %1702  ;;  %3005 = vmatpush.xpose.msk.msra.mxu3 %vm5421_vm3, %v1899_v46  ;;  %vm5433_vm3 = vmmov %vm5428_vm0 }
 0xa11   :  { %2993 = vmatpush.xpose.msk.msra.mxu2 %vm5422_vm4, %v1703_v30  ;;  %vm5434_vm4 = vmmov %vm5428_vm0 }
 0xa15   :  { %2994 = vmatpush.xpose.msk.msra.mxu2 %vm5423_vm8, %v1701_v38  ;;  %vm5435_vm8 = vmmov %vm5428_vm0 }
 0xa17   :  { %v2109_v18 = vpop.permute.xlu1 %2108  ;;  %v1895_v13 = vpop.permute.xlu2 %1894 }
 0xa18   :  { %v1664_v22 = vpop.permute.xlu0 %1663  ;;  %2995 = vmatmul.msk.f32.vlgmr.msra.gmra.mxu2 %vm5424_vm10, %v1656_v20  ;;  %vm5436_vm10 = vmmov %vm5428_vm0 }
 0xa19   :  { %2990 = vmatpush.xpose.msk.msra.mxu1 %vm5425_vm11, %v1664_v22  ;;  %vm5437_vm11 = vmmov %vm5428_vm0 }
 0xa1c   :  { %2991 = vmatmul.msk.f32.vlgmr.msra.gmra.mxu1 %vm5426_vm15, %v4739_v57  ;;  %vm5438_vm15 = vmmov %vm5428_vm0 }
 0xa1f   :  { %v2278_v34 = vpop.permute.xlu1 %2277  ;;  %v2105_v24 = vpop.permute.xlu2 %2104 }
 0xa20   :  { %v1860_v62 = vpop.permute.xlu0 %1859  ;;  %2996 = vmatmul.msk.f32.gmra.mxu2 %vm5427_vm5, %v1659_v44  ;;  %vm5439_vm5 = vmmov %vm5428_vm0  ;;  %v5452_v44 = vld [vmem:[#allocation16_spill] sm:$0xff] }
 0xa21   :  { %3001 = vmatpush.xpose.msk.msrb.mxu2 %vm5428_vm0, %v1860_v62 }
 0xa24   :  { %2992 = vmatmul.msk.f32.gmra.mxu1 %vm5429_vm9, %v4735_v42  ;;  %vm5440_vm9 = vmmov %vm5428_vm0 }
 0xa25   :  { %3002 = vmatpush.xpose.msk.msrb.mxu2 %vm5430_vm12, %v1858_v21  ;;  %vm5441_vm12 = vmmov %vm5428_vm0  ;;  %v4832_v21 = vpack.i.bf16 %v4739_v57, %v4735_v42 }
 0xa27   :  { %v2323_v41 = vpop.permute.xlu1 %2322  ;;  %v2280_v59 = vpop.permute.xlu2 %2279 }
 0xa28   :  { %v1856_v37 = vpop.permute.xlu0 %1855  ;;  %3003 = vmatmul.msk.f32.vlgmr.msrb.gmra.mxu2 %vm5432_vm13, %v1854_v11  ;;  %vm5443_vm13 = vmmov %vm5428_vm0 }
 0xa29   :  { %3013 = vmatpush.xpose.msk.msra.mxu2 %vm5431_vm6, %v2072_v58  ;;  %vm5442_vm6 = vmmov %vm5428_vm0 }
 0xa2d   :  { %3014 = vmatpush.xpose.msk.msra.mxu2 %vm5433_vm3, %v2070_v50  ;;  %vm5444_vm3 = vmmov %vm5428_vm0 }
 0xa2f   :  { %v2319_v28 = vpop.permute.xlu1 %2318  ;;  %v2317_v0 = vpop.permute.xlu2 %2316 }
 0xa30   :  { %v1897_v25 = vpop.permute.xlu0 %1896  ;;  %3004 = vmatmul.msk.f32.gmra.mxu2 %vm5435_vm8, %v1856_v37  ;;  %vm5446_vm8 = vmmov %vm5428_vm0 }
 0xa31   :  { %3025 = vmatpush.xpose.msk.msrb.mxu2 %vm5434_vm4, %v2284_v55  ;;  %3006 = vmatpush.xpose.msk.msra.mxu3 %vm5436_vm10, %v1897_v25  ;;  %vm5445_vm4 = vmmov %vm5428_vm0 }
 0xa32   :  { %vm5447_vm10 = vmmov %vm5428_vm0 }
 0xa34   :  { %3007 = vmatmul.msk.f32.vlgmr.msra.gmra.mxu3 %vm5437_vm11, %v1893_v12  ;;  %vm5448_vm11 = vmmov %vm5428_vm0 }
 0xa37   :  { %v3162_v35 = vpop.permute.xlu1 %3161 }
 0xa38   :  { %v3163_v3 = vunpack.i.l.bf16 %v3162_v35  ;;  %v2066_v48 = vpop.permute.xlu0 %2065  ;;  %v3164_v45 = vunpack.i.h.bf16 %v3162_v35 }
 0xa39   :  { %3015 = vmatmul.msk.f32.vlgmr.msra.gmra.mxu2 %vm5438_vm15, %v2066_v48  ;;  %vm5449_vm15 = vmmov %vm5428_vm0 }
 0xa3a   :  { %1840 = vmatpush.msrb.mxu1 %v3163_v3 }
 0xa3c   :  { %1841 = vmatpush.msrb.mxu1 %v3164_v45  ;;  %3008 = vmatmul.msk.f32.gmra.mxu3 %vm5439_vm5, %v1895_v13  ;;  %vm5450_vm5 = vmmov %vm5428_vm0 }
 0xa3f   :  { %v3167_v17 = vpop.permute.xlu1 %3166 }
 0xa40   :  { %v3168_v63 = vunpack.i.l.bf16 %v3167_v17  ;;  %v2111_v23 = vpop.permute.xlu0 %2110  ;;  %v3169_v1 = vunpack.i.h.bf16 %v3167_v17 }
 0xa41   :  { %3016 = vmatmul.msk.f32.gmra.mxu2 %vm5428_vm0, %v2068_v4  ;;  %3017 = vmatpush.xpose.msk.msrb.mxu3 %vm5440_vm9, %v2111_v23  ;;  %vm5456_vm9 = vmmov %vm5428_vm0 }
 0xa42   :  { %2036 = vmatpush.msra.mxu1 %v3168_v63 }
 0xa44   :  { %2037 = vmatpush.msra.mxu1 %v3169_v1 }
 0xa45   :  { %3018 = vmatpush.xpose.msk.msrb.mxu3 %vm5441_vm12, %v2109_v18  ;;  %vm5457_vm12 = vmmov %vm5428_vm0 }
 0xa48   :  { %v2282_v61 = vpop.permute.xlu0 %2281  ;;  %3019 = vmatmul.msk.f32.vlgmr.msrb.gmra.mxu3 %vm5443_vm13, %v2105_v24 }
 0xa49   :  { %3029 = vmatpush.xpose.msk.msra.mxu3 %vm5442_vm6, %v2323_v41  ;;  %3026 = vmatpush.xpose.msk.msrb.mxu2 %vm5444_vm3, %v2282_v61  ;;  %vm5458_vm6 = vmmov %vm5428_vm0 }
 0xa4c   :  { %3027 = vmatmul.msk.f32.vlgmr.msrb.gmra.mxu2 %vm5445_vm4, %v2278_v34 }
 0xa50   :  { %v2107_v33 = vpop.permute.xlu0 %2106 }
 0xa51   :  { %3020 = vmatmul.msk.f32.gmra.mxu3 %vm5446_vm8, %v2107_v33 }
 0xa54   :  { %3028 = vmatmul.msk.f32.gmra.mxu2 %vm5447_vm10, %v2280_v59 }
 0xa58   :  { %v2321_v53 = vpop.permute.xlu0 %2320 }
 0xa59   :  { %3030 = vmatpush.xpose.msk.msra.mxu3 %vm5448_vm11, %v2321_v53 }
 0xa5c   :  { %3031 = vmatmul.msk.f32.vlgmr.msra.gmra.mxu3 %vm5449_vm15, %v2317_v0  ;;  %v5454_v0 = vld [vmem:[#allocation17_spill] sm:$0xff] }
 0xa64   :  { %3032 = vmatmul.msk.f32.gmra.mxu3 %vm5450_vm5, %v2319_v28 }
 0xa99   :  { %v1692_v43 = vpop.f32.mrf.mxu1 }
 0xa9a   :  { %v1693_v14 = vadd.f32 %v1692_v43, %v5451_v29 }
 0xa9b   :  { %v1729_v47 = vpop.f32.mrf.mxu2 }
 0xa9c   :  { %v4823_v5 = vadd.f32 %v1729_v47, %v4111_v40  ;;  %v1735_v2 = vsel %vm474_vm14, %v1693_v14, -inf }
 0xa9d   :  { %1736 = vmax.xlane.f32.xlu0 %v1735_v2 }
 0xa9e   :  { %v1741_v20 = vsel %vm474_vm14, %v4823_v5, -inf }
 0xa9f   :  { %1742 = vmax.xlane.f32.xlu1 %v1741_v20 }
 0xaa1   :  { %v1695_v32 = vpop.f32.mrf.mxu1 }
 0xaa2   :  { %v1696_v16 = vadd.f32 %v1695_v32, %v5452_v44 }
 0xaa3   :  { %v1732_v11 = vpop.f32.mrf.mxu2 }
 0xaa4   :  { %v1738_v38 = vsel %vm474_vm14, %v1696_v16, -inf  ;;  %v4881_v53 = vadd.f32 %v1732_v11, %v4178_v10 }
 0xaa5   :  { %1739 = vmax.xlane.f32.xlu2 %v1738_v38 }
 0xaa6   :  { %v1744_v47 = vsel %vm474_vm14, %v4881_v53, -inf }
 0xaab   :  { %v1886_v58 = vpop.f32.mrf.mxu2 }
 0xab1   :  { %3146 = vrot.lane.b32.xlu0 %v4832_v21, %s5379_s1 }
 0xab3   :  { %v1889_v42 = vpop.f32.mrf.mxu2 }
 0xab4   :  { %v4846_v57 = vadd.f32 %v1889_v42, %v3845_v27 }
 0xab6   :  { %v1934_v4 = vsel %vm474_vm14, %v4846_v57, -inf }
 0xab7   :  { %v1925_v40 = vpop.f32.mrf.mxu3 }
 0xab9   :  { %3151 = vrot.lane.b32.xlu0 %v4832_v21, %s5420_s20 }
 0xabc   :  { %v4850_v30 = vpop.f32.mrf.mxu2 }
 0xabd   :  { %3156 = vrot.lane.b32.xlu2 %v4832_v21, %s5453_s30 }
 0xabf   :  { %v1928_v50 = vpop.f32.mrf.mxu3 }
 0xac0   :  { %v4841_v12 = vadd.f32 %v1928_v50, %v4328_v56 }
 0xac2   :  { %v1940_v55 = vsel %vm474_vm14, %v4841_v12, -inf }
 0xac3   :  { %1941 = vmax.xlane.f32.xlu1 %v1940_v55  ;;  %v4909_v55 = vadd.f32 %v4850_v30, %v3865_v36 }
 0xac4   :  { %v2101_v22 = vpop.f32.mrf.mxu2 }
 0xac5   :  { %v4891_v10 = vadd.f32 %v2101_v22, %v3923_v52 }
 0xac7   :  { %v2146_v44 = vsel %vm474_vm14, %v4891_v10, -inf }
 0xacb   :  { %1935 = vmax.xlane.f32.xlu1 %v1934_v4  ;;  %v2137_v46 = vpop.f32.mrf.mxu3 }
 0xacc   :  { %v4894_v32 = vadd.f32 %v2137_v46, %v4342_v39  ;;  %v2143_v46 = vsel %vm474_vm14, %v4909_v55, -inf }
 0xacf   :  { %v2310_v62 = vpop.f32.mrf.mxu2 }
 0xad0   :  { %v4858_v27 = vadd.f32 %v2310_v62, %v3938_v15 }
 0xad2   :  { %v2355_v37 = vsel %vm474_vm14, %v4858_v27, -inf }
 0xad4   :  { %v2140_v18 = vpop.f32.mrf.mxu3 }
 0xad7   :  { %v2313_v28 = vpop.f32.mrf.mxu2 }
 0xad8   :  { %v4863_v25 = vadd.f32 %v2313_v28, %v3949_v26  ;;  %v4872_v26 = vadd.f32 %v1925_v40, %v4301_v51  ;;  %v4884_v51 = vadd.f32 %v1886_v58, %v5454_v0  ;;  %v4902_v40 = vadd.f32 %v2140_v18, %v4396_v7 }
 0xada   :  { %v1937_v61 = vsel %vm474_vm14, %v4872_v26, -inf  ;;  %v2152_v39 = vsel %vm474_vm14, %v4902_v40, -inf }
 0xadf   :  { %v2349_v34 = vpop.f32.mrf.mxu3 }
 0xae0   :  { %v4853_v56 = vadd.f32 %v2349_v34, %v4419_v60  ;;  %v2358_v60 = vsel %vm474_vm14, %v4863_v25, -inf }
 0xae2   :  { %v2361_v41 = vsel %vm474_vm14, %v4853_v56, -inf }
 0xae3   :  { %2362 = vmax.xlane.f32.xlu1 %v2361_v41 }
 0xae7   :  { %v2352_v18 = vpop.f32.mrf.mxu3 }
 0xae8   :  { %v4919_v22 = vadd.f32 %v2352_v18, %v4399_v9 }
 0xaeb   :  { %2356 = vmax.xlane.f32.xlu1 %v2355_v37 }
 0xaf3   :  { %2359 = vmax.xlane.f32.xlu1 %v2358_v60 }
 0xb10   :  { %v1737_v35 = vpop.xlane.xlu0 %1736 }
 0xb11   :  { %v1747_v3 = vsub.f32 %v1693_v14, %v1737_v35  ;;  %v1931_v14 = vsel %vm474_vm14, %v4884_v51, -inf }
 0xb12   :  { %v1743_v2 = vpop.xlane.xlu1 %1742 }
 0xb13   :  { %v1751_v48 = vmul.f32 1.442695, %v1747_v3 }
 0xb15   :  { %3283 = vpow2.f32 %v1751_v48 }
 0xb18   :  { %v1740_v45 = vpop.xlane.xlu2 %1739 }
 0xb19   :  { %v1748_v13 = vsub.f32 %v1696_v16, %v1740_v45  ;;  %v2149_v16 = vsel %vm474_vm14, %v4894_v32, -inf }
 0xb1b   :  { %v4867_v15 = vpop.eup %3283  ;;  %v1753_v17 = vmul.f32 1.442695, %v1748_v13 }
 0xb1c   :  { %v1759_v63 = vsel %vm474_vm14, %v4867_v15, 0.0 }
 0xb1d   :  { %3285 = vpow2.f32 %v1753_v17  ;;  %1760 = vadd.xlane.f32.xlu0 %v1759_v63 }
 0xb20   :  { %v3157_v9 = vpop.permute.xlu2 %3156 }
 0xb21   :  { %v3158_v3 = vunpack.i.l.bf16 %v3157_v9  ;;  %v3159_v45 = vunpack.i.h.bf16 %v3157_v9 }
 0xb23   :  { %v4874_v23 = vpop.eup %3285  ;;  %v3147_v1 = vpop.permute.xlu0 %3146 }
 0xb24   :  { %v3148_v24 = vunpack.i.l.bf16 %v3147_v1  ;;  %v1762_v33 = vsel %vm474_vm14, %v4874_v23, 0.0  ;;  %v3149_v59 = vunpack.i.h.bf16 %v3147_v1 }
 0xb25   :  { %1938 = vmax.xlane.f32.xlu0 %v1937_v61  ;;  %1763 = vadd.xlane.f32.xlu2 %v1762_v33 }
 0xb26   :  { %1805 = vmatpush.msrb.mxu0 %v3148_v24 }
 0xb28   :  { %1806 = vmatpush.msrb.mxu0 %v3149_v59 }
 0xb2b   :  { %v3152_v43 = vpop.permute.xlu0 %3151 }
 0xb2c   :  { %v3153_v29 = vunpack.i.l.bf16 %v3152_v43  ;;  %v3154_v20 = vunpack.i.h.bf16 %v3152_v43 }
 0xb2d   :  { %1932 = vmax.xlane.f32.xlu0 %v1931_v14  ;;  %1745 = vmax.xlane.f32.xlu2 %v1744_v47 }
 0xb2e   :  { %2001 = vmatpush.msra.mxu0 %v3153_v29 }
 0xb30   :  { %2002 = vmatpush.msra.mxu0 %v3154_v20 }
 0xb35   :  { %2147 = vmax.xlane.f32.xlu0 %v2146_v44  ;;  %2150 = vmax.xlane.f32.xlu2 %v2149_v16 }
 0xb36   :  { %v1942_v38 = vpop.xlane.xlu1 %1941 }
 0xb37   :  { %v1946_v11 = vsub.f32 %v4841_v12, %v1942_v38  ;;  %v1749_v12 = vsub.f32 %v4823_v5, %v1743_v2  ;;  %v2364_v5 = vsel %vm474_vm14, %v4919_v22, -inf }
 0xb39   :  { %v1953_v52 = vmul.f32 1.442695, %v1946_v11 }
 0xb3b   :  { %3287 = vpow2.f32 %v1953_v52 }
 0xb3d   :  { %2153 = vmax.xlane.f32.xlu2 %v2152_v39 }
 0xb3e   :  { %v1936_v58 = vpop.xlane.xlu1 %1935 }
 0xb3f   :  { %v1944_v50 = vsub.f32 %v4846_v57, %v1936_v58  ;;  %v1755_v57 = vmul.f32 1.442695, %v1749_v12 }
 0xb41   :  { %v4911_v42 = vpop.eup %3287  ;;  %v1949_v4 = vmul.f32 1.442695, %v1944_v50 }
 0xb42   :  { %v1964_v7 = vsel %vm474_vm14, %v4911_v42, 0.0 }
 0xb43   :  { %3289 = vpow2.f32 %v1949_v4  ;;  %1965 = vadd.xlane.f32.xlu1 %v1964_v7 }
 0xb44   :  { %3291 = vpow2.f32 %v1755_v57 }
 0xb45   :  { %2144 = vmax.xlane.f32.xlu2 %v2143_v46 }
 0xb49   :  { %v4921_v36 = vpop.eup %3289 }
 0xb4a   :  { %v1958_v30 = vsel %vm474_vm14, %v4921_v36, 0.0  ;;  %v4927_v34 = vpop.eup %3291 }
 0xb4b   :  { %1959 = vadd.xlane.f32.xlu0 %v1958_v30  ;;  %v1765_v62 = vsel %vm474_vm14, %v4927_v34, 0.0 }
 0xb4d   :  { %2365 = vmax.xlane.f32.xlu2 %v2364_v5 }
 0xb55   :  { %1766 = vadd.xlane.f32.xlu2 %v1765_v62 }
 0xb56   :  { %v4936_v17 = vpop.xlane.xlu1 %2362 }
 0xb5e   :  { %v2357_v29 = vpop.xlane.xlu1 %2356 }
 0xb5f   :  { %3171 = vrot.lane.b32.xlu0 %v4771_v6, %s5453_s30  ;;  %v2367_v2 = vsub.f32 %v4858_v27, %v2357_v29 }
 0xb66   :  { %v2360_v7 = vpop.xlane.xlu1 %2359 }
 0xb67   :  { %v2368_v57 = vsub.f32 %v4863_v25, %v2360_v7 }
 0xb69   :  { %v2373_v5 = vmul.f32 1.442695, %v2368_v57 }
 0xb90   :  { %v1761_v41 = vpop.xlane.xlu0 %1760 }
 0xb91   :  { %3293 = vrcp.f32 %v1761_v41 }
 0xb97   :  { %v3294_v37 = vpop.eup %3293 }
 0xb98   :  { %v1775_v28 = vmul.f32 %v3294_v37, %v4867_v15  ;;  %v1939_v60 = vpop.xlane.xlu0 %1938  ;;  %v1764_v35 = vpop.xlane.xlu2 %1763 }
 0xb99   :  { %v1945_v48 = vsub.f32 %v4872_v26, %v1939_v60  ;;  %3295 = vrcp.f32 %v1764_v35 }
 0xb9a   :  { %2997 = vmatmul.msk.f32.vlgmr.msrb.gmra.mxu0 %vm474_vm14, %v1775_v28 }
 0xb9b   :  { %v1951_v13 = vmul.f32 1.442695, %v1945_v48  ;;  %2213 = vmatpush.msrb.mxu0 %v3158_v3 }
 0xb9d   :  { %3297 = vpow2.f32 %v1951_v13  ;;  %2214 = vmatpush.msrb.mxu0 %v3159_v45 }
 0xb9f   :  { %v3296_v63 = vpop.eup %3295 }
 0xba0   :  { %v1933_v1 = vpop.xlane.xlu0 %1932  ;;  %v1746_v24 = vpop.xlane.xlu2 %1745  ;;  %v1776_v15 = vmul.f32 %v3296_v63, %v4874_v23 }
 0xba1   :  { %v1943_v61 = vsub.f32 %v4884_v51, %v1933_v1  ;;  %v1750_v33 = vsub.f32 %v4881_v53, %v1746_v24 }
 0xba2   :  { %2998 = vmatmul.msk.f32.gmra.mxu0 %vm474_vm14, %v1776_v15 }
 0xba3   :  { %v4942_v26 = vpop.eup %3297  ;;  %v1947_v59 = vmul.f32 1.442695, %v1943_v61  ;;  %v1757_v0 = vmul.f32 1.442695, %v1750_v33 }
 0xba4   :  { %v1961_v43 = vsel %vm474_vm14, %v4942_v26, 0.0 }
 0xba5   :  { %3299 = vpow2.f32 %v1947_v59  ;;  %1962 = vadd.xlane.f32.xlu2 %v1961_v43 }
 0xba6   :  { %3301 = vpow2.f32 %v1757_v0 }
 0xba8   :  { %v2148_v14 = vpop.xlane.xlu0 %2147  ;;  %v2151_v47 = vpop.xlane.xlu2 %2150 }
 0xba9   :  { %v2156_v23 = vsub.f32 %v4891_v10, %v2148_v14  ;;  %v2157_v51 = vsub.f32 %v4894_v32, %v2151_v47  ;;  %v2371_v10 = vmul.f32 1.442695, %v2367_v2 }
 0xbab   :  { %v4948_v53 = vpop.eup %3299  ;;  %v2161_v20 = vmul.f32 1.442695, %v2156_v23  ;;  %v2163_v44 = vmul.f32 1.442695, %v2157_v51 }
 0xbac   :  { %v4951_v16 = vpop.eup %3301  ;;  %v1955_v38 = vsel %vm474_vm14, %v4948_v53, 0.0 }
 0xbad   :  { %3303 = vpow2.f32 %v2161_v20  ;;  %1956 = vadd.xlane.f32.xlu1 %v1955_v38  ;;  %v1768_v11 = vsel %vm474_vm14, %v4951_v16, 0.0 }
 0xbae   :  { %3305 = vpow2.f32 %v2163_v44  ;;  %1769 = vadd.xlane.f32.xlu2 %v1768_v11 }
 0xbaf   :  { %3307 = vpow2.f32 %v2371_v10 }
 0xbb0   :  { %v2154_v32 = vpop.xlane.xlu2 %2153 }
 0xbb1   :  { %v2158_v27 = vsub.f32 %v4902_v40, %v2154_v32 }
 0xbb3   :  { %v4957_v52 = vpop.eup %3303  ;;  %v2165_v4 = vmul.f32 1.442695, %v2158_v27 }
 0xbb4   :  { %v4960_v39 = vpop.eup %3305  ;;  %v2170_v58 = vsel %vm474_vm14, %v4957_v52, 0.0 }
 0xbb5   :  { %2171 = vadd.xlane.f32.xlu0 %v2170_v58  ;;  %v2173_v50 = vsel %vm474_vm14, %v4960_v39, 0.0  ;;  %v4966_v46 = vpop.eup %3307  ;;  %3309 = vpow2.f32 %v2165_v4 }
 0xbb6   :  { %2174 = vadd.xlane.f32.xlu2 %v2173_v50  ;;  %v2379_v30 = vsel %vm474_vm14, %v4966_v46, 0.0  ;;  %v1966_v59 = vpop.xlane.xlu1 %1965 }
 0xbb8   :  { %v2145_v12 = vpop.xlane.xlu2 %2144 }
 0xbb9   :  { %v2155_v18 = vsub.f32 %v4909_v55, %v2145_v12 }
 0xbbb   :  { %v2159_v40 = vmul.f32 1.442695, %v2155_v18  ;;  %v4972_v9 = vpop.eup %3309 }
 0xbbc   :  { %v2176_v37 = vsel %vm474_vm14, %v4972_v9, 0.0 }
 0xbbd   :  { %3311 = vpow2.f32 %v2159_v40  ;;  %2380 = vadd.xlane.f32.xlu0 %v2379_v30 }
 0xbbe   :  { %3313 = vpow2.f32 %v2373_v5  ;;  %v1960_v60 = vpop.xlane.xlu0 %1959 }
 0xbc0   :  { %v2366_v62 = vpop.xlane.xlu2 %2365 }
 0xbc1   :  { %v2370_v15 = vsub.f32 %v4919_v22, %v2366_v62 }
 0xbc3   :  { %v4974_v41 = vpop.eup %3311  ;;  %v2377_v61 = vmul.f32 1.442695, %v2370_v15 }
 0xbc4   :  { %v2167_v25 = vsel %vm474_vm14, %v4974_v41, 0.0  ;;  %v4982_v28 = vpop.eup %3313 }
 0xbc5   :  { %2177 = vadd.xlane.f32.xlu0 %v2176_v37  ;;  %2168 = vadd.xlane.f32.xlu2 %v2167_v25  ;;  %v2382_v35 = vsel %vm474_vm14, %v4982_v28, 0.0 }
 0xbc6   :  { %3176 = vrot.lane.b32.xlu1 %v4832_v21, %s5455_s2  ;;  %v2369_v21 = vsub.f32 %v4853_v56, %v4936_v17 }
 0xbc8   :  { %v1767_v55 = vpop.xlane.xlu2 %1766  ;;  %v2375_v1 = vmul.f32 1.442695, %v2369_v21 }
 0xbc9   :  { %3315 = vrcp.f32 %v1767_v55 }
 0xbca   :  { %3317 = vpow2.f32 %v2375_v1 }
 0xbcb   :  { %3319 = vpow2.f32 %v2377_v61 }
 0xbcd   :  { %2383 = vadd.xlane.f32.xlu2 %v2382_v35 }
 0xbcf   :  { %v3316_v3 = vpop.eup %3315 }
 0xbd0   :  { %v1777_v48 = vmul.f32 %v3316_v3, %v4927_v34  ;;  %v4992_v24 = vpop.eup %3317 }
 0xbd1   :  { %v3172_v45 = vpop.permute.xlu0 %3171  ;;  %v2385_v34 = vsel %vm474_vm14, %v4992_v24, 0.0  ;;  %v4997_v33 = vpop.eup %3319 }
 0xbd2   :  { %v3173_v13 = vunpack.i.l.bf16 %v3172_v45  ;;  %2999 = vmatmul.msk.f32.vlgmr.msrb.gmra.mxu1 %vm474_vm14, %v1777_v48  ;;  %v3174_v63 = vunpack.i.h.bf16 %v3172_v45  ;;  %v2388_v56 = vsel %vm474_vm14, %v4997_v33, 0.0 }
 0xbd4   :  { %2248 = vmatpush.msrb.mxu1 %v3173_v13 }
 0xbd6   :  { %2249 = vmatpush.msrb.mxu1 %v3174_v63 }
 0xbe5   :  { %3181 = vrot.lane.b32.xlu2 %v4771_v6, %s5455_s2 }
 0xbf0   :  { %2386 = vadd.xlane.f32.xlu1 %v2385_v34 }
 0xc0e   :  { %2389 = vadd.xlane.f32.xlu2 %v2388_v56 }
 0xc17   :  { %v1808_v17 = vpop.f32.mrf.mxu0 }
 0xc18   :  { %1849 = vst.msk [vmem:[#allocation2] sm:$0xff] %vm5428_vm0, %v1808_v17  ;;  %v1963_v6 = vpop.xlane.xlu2 %1962 }
 0xc1f   :  { %v1811_v0 = vpop.f32.mrf.mxu0 }
 0xc20   :  { %1850 = vst.msk [vmem:[#allocation2 + $0x8] sm:$0xff] %vm5456_vm9, %v1811_v0  ;;  %v1957_v43 = vpop.xlane.xlu1 %1956 }
 0xc21   :  { %3321 = vrcp.f32 %v1957_v43  ;;  %v1770_v29 = vpop.xlane.xlu2 %1769  ;;  %v3040_v43 = vld [vmem:[%s5250_s6 + $0x38] sm:$0xff] }
 0xc22   :  { %3323 = vrcp.f32 %v1770_v29  ;;  %v3039_v29 = vld [vmem:[%s5250_s6 + $0x30] sm:$0xff]  ;;  %2527 = vmatpush.msra.mxu2 %v3040_v43 }
 0xc23   :  { %3325 = vrcp.f32 %v1960_v60 }
 0xc24   :  { %3327 = vrcp.f32 %v1963_v6  ;;  %2528 = vmatpush.msra.mxu2 %v3039_v29 }
 0xc25   :  { %3329 = vrcp.f32 %v1966_v59 }
 0xc27   :  { %v3322_v22 = vpop.eup %3321 }
 0xc28   :  { %v3324_v14 = vpop.eup %3323  ;;  %v1971_v47 = vmul.f32 %v3322_v22, %v4948_v53  ;;  %v2172_v23 = vpop.xlane.xlu0 %2171  ;;  %v3038_v22 = vld [vmem:[%s5250_s6 + $0x28] sm:$0xff] }
 0xc29   :  { %v1778_v51 = vmul.f32 %v3324_v14, %v4951_v16  ;;  %v3326_v2 = vpop.eup %3325  ;;  %v2175_v11 = vpop.xlane.xlu2 %2174  ;;  %v3037_v14 = vld [vmem:[%s5250_s6 + $0x20] sm:$0xff]  ;;  %2529 = vmatpush.msra.mxu2 %v3038_v22 }
 0xc2a   :  { %3009 = vmatmul.msk.f32.vlgmr.msra.gmra.mxu0 %vm474_vm14, %v1971_v47  ;;  %v3328_v20 = vpop.eup %3327  ;;  %v1972_v44 = vmul.f32 %v3326_v2, %v4921_v36  ;;  %3331 = vrcp.f32 %v2175_v11 }
 0xc2b   :  { %3000 = vmatmul.msk.f32.gmra.mxu1 %vm474_vm14, %v1778_v51  ;;  %v1973_v38 = vmul.f32 %v3328_v20, %v4942_v26  ;;  %v3330_v53 = vpop.eup %3329  ;;  %2530 = vmatpush.msra.mxu2 %v3037_v14 }
 0xc2c   :  { %v1974_v58 = vmul.f32 %v3330_v53, %v4911_v42 }
 0xc30   :  { %v2381_v10 = vpop.xlane.xlu0 %2380  ;;  %v3332_v26 = vpop.eup %3331 }
 0xc31   :  { %v2185_v7 = vmul.f32 %v3332_v26, %v4960_v39 }
 0xc32   :  { %3010 = vmatmul.msk.f32.gmra.mxu0 %vm474_vm14, %v1972_v44 }
 0xc33   :  { %3011 = vmatmul.msk.f32.vlgmr.msra.gmra.mxu1 %vm474_vm14, %v1973_v38 }
 0xc38   :  { %v3177_v16 = vpop.permute.xlu1 %3176  ;;  %v2169_v27 = vpop.xlane.xlu2 %2168 }
 0xc39   :  { %v3178_v32 = vunpack.i.l.bf16 %v3177_v16  ;;  %3333 = vrcp.f32 %v2169_v27  ;;  %v3179_v50 = vunpack.i.h.bf16 %v3177_v16  ;;  %v2178_v36 = vpop.xlane.xlu0 %2177 }
 0xc3a   :  { %3335 = vrcp.f32 %v2172_v23 }
 0xc3b   :  { %3012 = vmatmul.msk.f32.gmra.mxu1 %vm474_vm14, %v1974_v58  ;;  %2425 = vmatpush.msra.mxu0 %v3178_v32  ;;  %3337 = vrcp.f32 %v2178_v36  ;;  %v3194_v58 = vld [vmem:[%s5251_s7 + $0x1] ss:$0 sm:$0xff] }
 0xc3c   :  { %3339 = vrcp.f32 %v2381_v10 }
 0xc3d   :  { %2426 = vmatpush.msra.mxu0 %v3179_v50 }
 0xc3f   :  { %v3334_v4 = vpop.eup %3333 }
 0xc40   :  { %v2183_v12 = vmul.f32 %v3334_v4, %v4974_v41  ;;  %v2384_v18 = vpop.xlane.xlu2 %2383  ;;  %v3336_v42 = vpop.eup %3335 }
 0xc41   :  { %v3338_v57 = vpop.eup %3337  ;;  %v2184_v30 = vmul.f32 %v3336_v42, %v4957_v52  ;;  %3341 = vrcp.f32 %v2384_v18 }
 0xc42   :  { %3021 = vmatmul.msk.f32.vlgmr.msrb.gmra.mxu0 %vm474_vm14, %v2183_v12  ;;  %v2186_v5 = vmul.f32 %v3338_v57, %v4972_v9  ;;  %v3340_v41 = vpop.eup %3339 }
 0xc43   :  { %3023 = vmatmul.msk.f32.vlgmr.msrb.gmra.mxu1 %vm474_vm14, %v2185_v7  ;;  %v2395_v25 = vmul.f32 %v3340_v41, %v4966_v46 }
 0xc47   :  { %v3342_v52 = vpop.eup %3341 }
 0xc48   :  { %v3182_v40 = vpop.permute.xlu2 %3181  ;;  %v2396_v9 = vmul.f32 %v3342_v52, %v4982_v28 }
 0xc49   :  { %v3183_v62 = vunpack.i.l.bf16 %v3182_v40  ;;  %v3184_v39 = vunpack.i.h.bf16 %v3182_v40 }
 0xc4a   :  { %3022 = vmatmul.msk.f32.gmra.mxu0 %vm474_vm14, %v2184_v30 }
 0xc4b   :  { %3024 = vmatmul.msk.f32.gmra.mxu1 %vm474_vm14, %v2186_v5 }
 0xc4c   :  { %2460 = vmatpush.msra.mxu1 %v3183_v62 }
 0xc4e   :  { %2461 = vmatpush.msra.mxu1 %v3184_v39 }
 0xc4f   :  { %v1843_v37 = vpop.f32.mrf.mxu1 }
 0xc50   :  { %1851 = vst.msk [vmem:[#allocation2 + $0x10] sm:$0xff] %vm5457_vm12, %v1843_v37 }
 0xc52   :  { %3033 = vmatmul.msk.f32.vlgmr.msra.gmra.mxu0 %vm474_vm14, %v2395_v25 }
 0xc5a   :  { %3034 = vmatmul.msk.f32.gmra.mxu0 %vm474_vm14, %v2396_v9 }
 0xc63   :  { %v2387_v55 = vpop.xlane.xlu1 %2386 }
 0xc64   :  { %3343 = vrcp.f32 %v2387_v55 }
 0xc6a   :  { %v3344_v60 = vpop.eup %3343 }
 0xc6b   :  { %v2397_v35 = vmul.f32 %v3344_v60, %v4992_v24 }
 0xc6d   :  { %3035 = vmatmul.msk.f32.vlgmr.msra.gmra.mxu1 %vm474_vm14, %v2397_v35 }
 0xc81   :  { %v2390_v3 = vpop.xlane.xlu2 %2389 }
 0xc82   :  { %3345 = vrcp.f32 %v2390_v3 }
 0xc88   :  { %v3346_v48 = vpop.eup %3345 }
 0xc89   :  { %v2398_v45 = vmul.f32 %v3346_v48, %v4997_v33 }
 0xc8b   :  { %3036 = vmatmul.msk.f32.gmra.mxu1 %vm474_vm14, %v2398_v45  ;;  %vm5460_vm14 = vcmask 261120  }
 0xc8c   :  { %vm5461_vm13 = vmmov %vm5460_vm14 }
 0xc8d   :  { %vm5462_vm3 = vmmov %vm5461_vm13 }
 0xc8e   :  { %vm5463_vm4 = vmmov %vm5462_vm3 }
 0xca7   :  { %v2004_v46 = vpop.f32.mrf.mxu0 }
 0xca8   :  { %v1846_v13 = vpop.f32.mrf.mxu1  ;;  %2049 = vrot.lane.b32.xlu0 %v2004_v46, %s3420_s23 }
 0xca9   :  { %1852 = vst.msk [vmem:[#allocation2 + $0x18] sm:$0xff] %vm5458_vm6, %v1846_v13 }
 0xcaf   :  { %v2007_v28 = vpop.f32.mrf.mxu0 }
 0xcb0   :  { %v2039_v63 = vpop.f32.mrf.mxu1  ;;  %2051 = vrot.lane.b32.xlu0 %v2007_v28, %s3420_s23 }
 0xcb1   :  { %2053 = vrot.lane.b32.xlu2 %v2039_v63, %s3420_s23 }
 0xcb8   :  { %v2042_v24 = vpop.f32.mrf.mxu1 }
 0xcbf   :  { %v2216_v21 = vpop.f32.mrf.mxu0 }
 0xcc0   :  { %2261 = vrot.lane.b32.xlu1 %v2216_v21, %s3421_s24  ;;  %v2251_v15 = vpop.f32.mrf.mxu1 }
 0xcc7   :  { %v2219_v1 = vpop.f32.mrf.mxu0 }
 0xcc8   :  { %2263 = vrot.lane.b32.xlu0 %v2219_v1, %s3421_s24  ;;  %v2254_v33 = vpop.f32.mrf.mxu1 }
 0xccf   :  { %v2428_v34 = vpop.f32.mrf.mxu0 }
 0xcd0   :  { %2473 = vrot.lane.b32.xlu0 %v2428_v34, %s5459_s27  ;;  %v3051_v34 = vld [vmem:[%s5254_s10 + $0x38] sm:$0xff] }
 0xcd1   :  { %2688 = vmatpush.msrb.mxu3 %v3051_v34 }
 0xcd7   :  { %v2431_v61 = vpop.f32.mrf.mxu0 }
 0xcd8   :  { %2265 = vrot.lane.b32.xlu0 %v2251_v15, %s3421_s24  ;;  %2475 = vrot.lane.b32.xlu1 %v2431_v61, %s5459_s27  ;;  %v3050_v15 = vld [vmem:[%s5254_s10 + $0x30] sm:$0xff]  ;;  %v3049_v61 = vld [vmem:[%s5254_s10 + $0x28] sm:$0xff] }
 0xcd9   :  { %2689 = vmatpush.msrb.mxu3 %v3050_v15  ;;  %v3061_v15 = vld [vmem:[%s5256_s12 + $0xa0] sm:$0xff] }
 0xcdb   :  { %2690 = vmatpush.msrb.mxu3 %v3049_v61 }
 0xce0   :  { %2055 = vrot.lane.b32.xlu0 %v2042_v24, %s3420_s23 }
 0xcea   :  { %v2463_v56 = vpop.f32.mrf.mxu1 }
 0xceb   :  { %2477 = vrot.lane.b32.xlu1 %v2463_v56, %s5459_s27 }
 0xcf3   :  { %2267 = vrot.lane.b32.xlu1 %v2254_v33, %s3421_s24  ;;  %v3048_v33 = vld [vmem:[%s5254_s10 + $0x20] sm:$0xff] }
 0xcf4   :  { %2691 = vmatpush.msrb.mxu3 %v3048_v33  ;;  %v3060_v33 = vld [vmem:[%s5256_s12 + $0x98] sm:$0xff] }
 0xd08   :  { %v2466_v17 = vpop.f32.mrf.mxu1 }
 0xd09   :  { %2479 = vrot.lane.b32.xlu0 %v2466_v17, %s5459_s27 }
 0xd0b   :  { %v2054_v59 = vpop.permute.xlu2 %2053 }
 0xd0c   :  { %2063 = vst.msk [vmem:[#allocation2 + $0x10] sm:$0xff] %vm801_vm7, %v2054_v59 }
 0xd1a   :  { %v2050_v6 = vpop.permute.xlu0 %2049 }
 0xd1b   :  { %2061 = vst.msk [vmem:[#allocation2] sm:$0xff] %vm801_vm7, %v2050_v6 }
 0xd22   :  { %v2052_v0 = vpop.permute.xlu0 %2051 }
 0xd23   :  { %2062 = vst.msk [vmem:[#allocation2 + $0x8] sm:$0xff] %vm801_vm7, %v2052_v0 }
 0xd32   :  { %v2262_v47 = vpop.permute.xlu1 %2261 }
 0xd33   :  { %2273 = vst.msk [vmem:[#allocation2] sm:$0xff] %vm1014_vm2, %v2262_v47 }
 0xd3a   :  { %v2264_v23 = vpop.permute.xlu0 %2263 }
 0xd3b   :  { %2274 = vst.msk [vmem:[#allocation2 + $0x8] sm:$0xff] %vm1014_vm2, %v2264_v23 }
 0xd42   :  { %v2474_v51 = vpop.permute.xlu0 %2473 }
 0xd43   :  { %2485 = vst.msk [vmem:[#allocation2] sm:$0xff] %vm1227_vm1, %v2474_v51 }
 0xd4a   :  { %v2266_v2 = vpop.permute.xlu0 %2265  ;;  %v2476_v20 = vpop.permute.xlu1 %2475  ;;  %v2489_v44 = vld [vmem:[#allocation2] sm:$0xff] }
 0xd4b   :  { %2275 = vst.msk [vmem:[#allocation2 + $0x10] sm:$0xff] %vm1014_vm2, %v2266_v2  ;;  %3042 = vmatmul.msk.f32.vlgmr.msra.gmra.mxu2 %vm5460_vm14, %v2489_v44 }
 0xd4c   :  { %2486 = vst.msk [vmem:[#allocation2 + $0x8] sm:$0xff] %vm1227_vm1, %v2476_v20  ;;  %v5115_v20 = vld [vmem:[%s5252_s8 + $0x1] ss:$0 sm:$0xff] }
 0xd52   :  { %v2056_v38 = vpop.permute.xlu0 %2055 }
 0xd53   :  { %2064 = vst.msk [vmem:[#allocation2 + $0x18] sm:$0xff] %vm801_vm7, %v2056_v38  ;;  %v2490_v11 = vld [vmem:[#allocation2 + $0x8] sm:$0xff]  ;;  %vm5464_vm7 = vmmov %vm5462_vm3 }
 0xd54   :  { %3043 = vmatmul.msk.f32.gmra.mxu2 %vm5461_vm13, %v2490_v11 }
 0xd5d   :  { %v2478_v10 = vpop.permute.xlu1 %2477 }
 0xd5e   :  { %2487 = vst.msk [vmem:[#allocation2 + $0x10] sm:$0xff] %vm1227_vm1, %v2478_v10 }
 0xd65   :  { %v2268_v53 = vpop.permute.xlu1 %2267  ;;  %v2491_v16 = vld [vmem:[#allocation2 + $0x10] sm:$0xff] }
 0xd66   :  { %2276 = vst.msk [vmem:[#allocation2 + $0x18] sm:$0xff] %vm1014_vm2, %v2268_v53  ;;  %3044 = vmatmul.msk.f32.gmra.mxu2 %vm5462_vm3, %v2491_v16  ;;  %vm5465_vm2 = vmmov %vm5462_vm3  ;;  %v5120_v53 = vld [vmem:[%s5253_s9 + $0x1] ss:$0 sm:$0xff] }
 0xd7b   :  { %v2480_v32 = vpop.permute.xlu0 %2479 }
 0xd7c   :  { %2488 = vst.msk [vmem:[#allocation2 + $0x18] sm:$0xff] %vm1227_vm1, %v2480_v32  ;;  %vm5466_vm1 = vmmov %vm5465_vm2 }
 0xd7d   :  { %vm5467_vm8 = vmmov %vm5466_vm1 }
 0xd7e   :  { %vm5468_vm10 = vmmov %vm5466_vm1 }
 0xd7f   :  { %vm5469_vm11 = vmmov %vm5466_vm1 }
 0xd80   :  { %vm5470_vm15 = vmmov %vm5466_vm1 }
 0xd81   :  { %vm5471_vm5 = vmmov %vm5466_vm1 }
 0xd82   :  { %vm5472_vm13 = vmmov %vm5466_vm1 }
 0xd83   :  { %v2492_v27 = vld [vmem:[#allocation2 + $0x18] sm:$0xff] }
 0xd84   :  { %3045 = vmatmul.msk.f32.gmra.mxu2 %vm5463_vm4, %v2492_v27  ;;  %vm5473_vm4 = vmmov %vm5466_vm1 }
 0xdce   :  { %v2532_v50 = vpop.f32.mrf.mxu2 }
 0xdcf   :  { %v2533_v36 = vadd.f32 %v3194_v58, %v2532_v50 }
 0xdd1   :  { %v2544_v26 = vadd.f32 %v2533_v36, %v4712_v49 }
 0xdd3   :  { %v2552_v4 = vsel %vm5464_vm7, %v2544_v26, 0.0 }
 0xdd4   :  { %2553 = vadd.xlane.f32.xlu1 %v2552_v4 }
 0xdd7   :  { %v2535_v7 = vpop.f32.mrf.mxu2 }
 0xdd8   :  { %v2536_v12 = vadd.f32 %v3194_v58, %v2535_v7 }
 0xdda   :  { %v2545_v18 = vadd.f32 %v2536_v12, %v4716_v54 }
 0xddc   :  { %v2555_v42 = vsel %vm5465_vm2, %v2545_v18, 0.0 }
 0xddd   :  { %2556 = vadd.xlane.f32.xlu2 %v2555_v42 }
 0xde9   :  { %v2538_v57 = vpop.f32.mrf.mxu2 }
 0xdea   :  { %v2539_v40 = vadd.f32 %v3194_v58, %v2538_v57 }
 0xdec   :  { %v2546_v30 = vadd.f32 %v2539_v40, %v4723_v31 }
 0xdee   :  { %v2558_v5 = vsel %vm5466_vm1, %v2546_v30, 0.0 }
 0xdef   :  { %2559 = vadd.xlane.f32.xlu0 %v2558_v5 }
 0xe07   :  { %v2541_v62 = vpop.f32.mrf.mxu2 }
 0xe08   :  { %v2542_v39 = vadd.f32 %v3194_v58, %v2541_v62 }
 0xe0a   :  { %v2547_v49 = vadd.f32 %v2542_v39, %v4728_v8 }
 0xe0c   :  { %v2561_v41 = vsel %vm5467_vm8, %v2547_v49, 0.0  ;;  %vm5474_vm8 = vmmov %vm5473_vm4 }
 0xe0d   :  { %2562 = vadd.xlane.f32.xlu2 %v2561_v41 }
 0xe47   :  { %v2554_v37 = vpop.xlane.xlu1 %2553 }
 0xe48   :  { %v2564_v54 = vmul.f32 %v2554_v37, %v4544_v19 }
 0xe4a   :  { %v2568_v25 = vsub.f32 %v2544_v26, %v2564_v54 }
 0xe4c   :  { %v2572_v52 = vmul.f32 %v2568_v25, %v2568_v25 }
 0xe4e   :  { %v2576_v9 = vsel %vm5468_vm10, %v2572_v52, 0.0  ;;  %v3071_v52 = vld [vmem:[%s5256_s12 + $0xf0] sm:$0xff] }
 0xe4f   :  { %2577 = vadd.xlane.f32.xlu1 %v2576_v9  ;;  %v3070_v9 = vld [vmem:[%s5256_s12 + $0xe8] sm:$0xff] }
 0xe50   :  { %v2557_v55 = vpop.xlane.xlu2 %2556 }
 0xe51   :  { %v2565_v31 = vmul.f32 %v2557_v55, %v4544_v19 }
 0xe53   :  { %v2569_v60 = vsub.f32 %v2545_v18, %v2565_v31 }
 0xe55   :  { %v2573_v35 = vmul.f32 %v2569_v60, %v2569_v60 }
 0xe57   :  { %v2579_v3 = vsel %vm5469_vm11, %v2573_v35, 0.0 }
 0xe58   :  { %2580 = vadd.xlane.f32.xlu0 %v2579_v3  ;;  %v3068_v3 = vld [vmem:[%s5256_s12 + $0xd8] sm:$0xff] }
 0xe62   :  { %v2560_v8 = vpop.xlane.xlu0 %2559 }
 0xe63   :  { %v2566_v48 = vmul.f32 %v2560_v8, %v4544_v19  ;;  %v3067_v8 = vld [vmem:[%s5256_s12 + $0xd0] sm:$0xff] }
 0xe65   :  { %v5087_v45 = vsub.f32 %v2546_v30, %v2566_v48  ;;  %v3066_v48 = vld [vmem:[%s5256_s12 + $0xc8] sm:$0xff] }
 0xe67   :  { %v2574_v46 = vmul.f32 %v5087_v45, %v5087_v45 }
 0xe69   :  { %v2582_v13 = vsel %vm5470_vm15, %v2574_v46, 0.0 }
 0xe6a   :  { %2583 = vadd.xlane.f32.xlu2 %v2582_v13  ;;  %v3064_v13 = vld [vmem:[%s5256_s12 + $0xb8] sm:$0xff] }
 0xe80   :  { %v2563_v28 = vpop.xlane.xlu2 %2562 }
 0xe81   :  { %v2567_v63 = vmul.f32 %v2563_v28, %v4544_v19 }
 0xe83   :  { %v5093_v21 = vsub.f32 %v2547_v49, %v2567_v63  ;;  %v3063_v63 = vld [vmem:[%s5256_s12 + $0xb0] sm:$0xff] }
 0xe85   :  { %v2575_v1 = vmul.f32 %v5093_v21, %v5093_v21 }
 0xe87   :  { %v2585_v24 = vsel %vm5471_vm5, %v2575_v1, 0.0  ;;  %vm5475_vm5 = vmmov %vm5473_vm4 }
 0xe88   :  { %2586 = vadd.xlane.f32.xlu1 %v2585_v24  ;;  %v3062_v24 = vld [vmem:[%s5256_s12 + $0xa8] sm:$0xff] }
 0xec2   :  { %v2578_v56 = vpop.xlane.xlu1 %2577 }
 0xec3   :  { %v2588_v17 = vmul.f32 %v2578_v56, %v4544_v19 }
 0xec5   :  { %v2592_v59 = vadd.f32 1e-05, %v2588_v17 }
 0xec7   :  { %3347 = vrsqrt.f32 %v2592_v59  ;;  %vm2602_vm9 = vweird.f32 %v2592_v59 }
 0xecb   :  { %v2581_v6 = vpop.xlane.xlu0 %2580 }
 0xecc   :  { %v2589_v0 = vmul.f32 %v2581_v6, %v4544_v19 }
 0xecd   :  { %v3348_v43 = vpop.eup %3347 }
 0xece   :  { %v2597_v29 = vmul.f32 %v3348_v43, %v2592_v59  ;;  %v2593_v22 = vadd.f32 1e-05, %v2589_v0  ;;  %vm2603_vm0 = vweird.f32 %v3348_v43 }
 0xecf   :  { %vm2604_vm12 = vmor %vm2602_vm9, %vm2603_vm0 }
 0xed0   :  { %v2598_v14 = vmul.f32 %v3348_v43, %v2597_v29  ;;  %3349 = vrsqrt.f32 %v2593_v22  ;;  %vm2612_vm14 = vweird.f32 %v2593_v22  ;;  %v3058_v29 = vld [vmem:[%s5256_s12 + $0x88] sm:$0xff]  ;;  %vm5476_vm0 = vmmov %vm5473_vm4 }
 0xed1   :  { %vm5477_vm9 = vmmov %vm5476_vm0 }
 0xed2   :  { %v2599_v47 = vmul.f32 0.5, %v2598_v14 }
 0xed4   :  { %v2600_v23 = vsub.f32 1.5, %v2599_v47 }
 0xed6   :  { %v3350_v51 = vpop.eup %3349  ;;  %v2601_v2 = vmul.f32 %v3348_v43, %v2600_v23 }
 0xed7   :  { %v2607_v44 = vmul.f32 %v3350_v51, %v2593_v22  ;;  %vm2613_vm6 = vweird.f32 %v3350_v51  ;;  %v3197_v22 = vld [vmem:[%s5255_s11 + $0x1] ss:$0 sm:$0xff] }
 0xed8   :  { %v2605_v38 = vsel %vm2604_vm12, %v3348_v43, %v2601_v2  ;;  %vm2614_vm3 = vmor %vm2612_vm14, %vm2613_vm6  ;;  %v3059_v43 = vld [vmem:[%s5256_s12 + $0x90] sm:$0xff] }
 0xed9   :  { %v2636_v11 = vmul.f32 %v2605_v38, %v2568_v25  ;;  %v2608_v10 = vmul.f32 %v3350_v51, %v2607_v44  ;;  %v3072_v25 = vld [vmem:[%s5256_s12 + $0xf8] sm:$0xff]  ;;  %vm5478_vm12 = vmmov %vm5476_vm0 }
 0xeda   :  { %2731 = vmatpush.msrb.mxu0 %v3072_v25  ;;  %vm5479_vm6 = vmmov %vm5476_vm0 }
 0xedb   :  { %v2643_v16 = vmul.f32 %v5115_v20, %v2636_v11  ;;  %v2609_v32 = vmul.f32 0.5, %v2608_v10  ;;  %vm5480_vm14 = vmmov %vm5476_vm0 }
 0xedc   :  { %2732 = vmatpush.msrb.mxu0 %v3071_v52 }
 0xedd   :  { %v2584_v27 = vpop.xlane.xlu2 %2583  ;;  %v2610_v58 = vsub.f32 1.5, %v2609_v32  ;;  %v5125_v36 = vadd.f32 %v5120_v53, %v2643_v16  ;;  %v3198_v32 = vld [vmem:[%s5257_s13 + $0x1] ss:$0 sm:$0xff] }
 0xede   :  { %v2590_v50 = vmul.f32 %v2584_v27, %v4544_v19  ;;  %2733 = vmatpush.msrb.mxu0 %v3070_v9 }
 0xedf   :  { %v2611_v26 = vmul.f32 %v3350_v51, %v2610_v58  ;;  %3053 = vmatmul.msk.f32.vlgmr.msrb.gmra.mxu3 %vm5472_vm13, %v5125_v36  ;;  %vm5481_vm13 = vmmov %vm5476_vm0 }
 0xee0   :  { %v2594_v4 = vadd.f32 1e-05, %v2590_v50 }
 0xee1   :  { %v2615_v7 = vsel %vm2614_vm3, %v3350_v51, %v2611_v26  ;;  %vm5482_vm3 = vmmov %vm5476_vm0 }
 0xee2   :  { %3351 = vrsqrt.f32 %v2594_v4  ;;  %v2637_v12 = vmul.f32 %v2615_v7, %v2569_v60  ;;  %vm2622_vm2 = vweird.f32 %v2594_v4  ;;  %v3069_v60 = vld [vmem:[%s5256_s12 + $0xe0] sm:$0xff] }
 0xee3   :  { %2734 = vmatpush.msrb.mxu0 %v3069_v60 }
 0xee4   :  { %v2644_v18 = vmul.f32 %v5115_v20, %v2637_v12 }
 0xee5   :  { %2735 = vmatpush.msrb.mxu0 %v3068_v3 }
 0xee6   :  { %v5131_v42 = vadd.f32 %v5120_v53, %v2644_v18 }
 0xee7   :  { %2736 = vmatpush.msrb.mxu0 %v3067_v8 }
 0xee8   :  { %v3352_v57 = vpop.eup %3351  ;;  %3054 = vmatmul.msk.f32.gmra.mxu3 %vm5473_vm4, %v5131_v42  ;;  %vm5483_vm4 = vmmov %vm5476_vm0 }
 0xee9   :  { %v2617_v40 = vmul.f32 %v3352_v57, %v2594_v4  ;;  %vm2623_vm7 = vweird.f32 %v3352_v57  ;;  %2737 = vmatpush.msrb.mxu0 %v3066_v48 }
 0xeea   :  { %vm2624_vm1 = vmor %vm2622_vm2, %vm2623_vm7 }
 0xeeb   :  { %v2618_v30 = vmul.f32 %v3352_v57, %v2617_v40 }
 0xeed   :  { %v2619_v5 = vmul.f32 0.5, %v2618_v30 }
 0xeef   :  { %v2620_v62 = vsub.f32 1.5, %v2619_v5 }
 0xef1   :  { %v2621_v39 = vmul.f32 %v3352_v57, %v2620_v62 }
 0xef3   :  { %v2625_v49 = vsel %vm2624_vm1, %v3352_v57, %v2621_v39 }
 0xef4   :  { %v2638_v41 = vmul.f32 %v2625_v49, %v5087_v45  ;;  %v3065_v45 = vld [vmem:[%s5256_s12 + $0xc0] sm:$0xff] }
 0xef5   :  { %2738 = vmatpush.msrb.mxu0 %v3065_v45 }
 0xef6   :  { %v2645_v37 = vmul.f32 %v5115_v20, %v2638_v41 }
 0xef7   :  { %2739 = vmatpush.msrb.mxu0 %v3064_v13 }
 0xef8   :  { %v5138_v54 = vadd.f32 %v5120_v53, %v2645_v37 }
 0xef9   :  { %2740 = vmatpush.msrb.mxu0 %v3063_v63 }
 0xefa   :  { %3055 = vmatmul.msk.f32.gmra.mxu3 %vm5474_vm8, %v5138_v54 }
 0xefb   :  { %v2587_v55 = vpop.xlane.xlu1 %2586  ;;  %2741 = vmatpush.msrb.mxu0 %v3062_v24 }
 0xefc   :  { %v2591_v31 = vmul.f32 %v2587_v55, %v4544_v19 }
 0xefd   :  { %2742 = vmatpush.msrb.mxu0 %v3061_v15 }
 0xefe   :  { %v2595_v35 = vadd.f32 1e-05, %v2591_v31 }
 0xeff   :  { %2743 = vmatpush.msrb.mxu0 %v3060_v33 }
 0xf00   :  { %3353 = vrsqrt.f32 %v2595_v35  ;;  %vm2632_vm11 = vweird.f32 %v2595_v35 }
 0xf01   :  { %2744 = vmatpush.msrb.mxu0 %v3059_v43 }
 0xf03   :  { %2745 = vmatpush.msrb.mxu0 %v3058_v29 }
 0xf06   :  { %v3354_v46 = vpop.eup %3353 }
 0xf07   :  { %v2627_v28 = vmul.f32 %v3354_v46, %v2595_v35  ;;  %vm2633_vm10 = vweird.f32 %v3354_v46 }
 0xf08   :  { %vm2634_vm15 = vmor %vm2632_vm11, %vm2633_vm10 }
 0xf09   :  { %v2628_v1 = vmul.f32 %v3354_v46, %v2627_v28  ;;  %vm5484_vm10 = vmmov %vm5476_vm0 }
 0xf0b   :  { %v2629_v34 = vmul.f32 0.5, %v2628_v1 }
 0xf0d   :  { %v2630_v61 = vsub.f32 1.5, %v2629_v34 }
 0xf0f   :  { %v2631_v56 = vmul.f32 %v3354_v46, %v2630_v61 }
 0xf11   :  { %v2635_v17 = vsel %vm2634_vm15, %v3354_v46, %v2631_v56 }
 0xf12   :  { %v2639_v59 = vmul.f32 %v2635_v17, %v5093_v21  ;;  %v3057_v21 = vld [vmem:[%s5256_s12 + $0x80] sm:$0xff] }
 0xf13   :  { %2746 = vmatpush.msrb.mxu0 %v3057_v21 }
 0xf14   :  { %v2646_v6 = vmul.f32 %v5115_v20, %v2639_v59 }
 0xf16   :  { %v2653_v0 = vadd.f32 %v5120_v53, %v2646_v6 }
 0xf18   :  { %3056 = vmatmul.msk.f32.gmra.mxu3 %vm5475_vm5, %v2653_v0  ;;  %vm5485_vm5 = vmmov %vm5476_vm0 }
 0xf62   :  { %v2693_v14 = vpop.f32.mrf.mxu3 }
 0xf63   :  { %v2694_v47 = vadd.f32 %v3197_v22, %v2693_v14 }
 0xf65   :  { %v2705_v23 = vmax.f32 %v2694_v47, 0.0 }
 0xf67   :  { %2747 = vmatmul.f32.vlgmr.msrb.gmra.mxu0 %v2705_v23  ;;  %v3200_v23 = vld [vmem:[%s5259_s15 + $0x1] ss:$0 sm:$0xff] }
 0xf6b   :  { %v2696_v51 = vpop.f32.mrf.mxu3 }
 0xf6c   :  { %v2697_v2 = vadd.f32 %v3197_v22, %v2696_v51 }
 0xf6e   :  { %v2706_v20 = vmax.f32 %v2697_v2, 0.0 }
 0xf70   :  { %2750 = vmatmul.f32.gmra.mxu0 %v2706_v20 }
 0xf7d   :  { %v2699_v44 = vpop.f32.mrf.mxu3 }
 0xf7e   :  { %v2700_v38 = vadd.f32 %v3197_v22, %v2699_v44 }
 0xf80   :  { %v2707_v11 = vmax.f32 %v2700_v38, 0.0 }
 0xf82   :  { %2753 = vmatmul.f32.gmra.mxu0 %v2707_v11 }
 0xf9b   :  { %v2702_v10 = vpop.f32.mrf.mxu3 }
 0xf9c   :  { %v2703_v53 = vadd.f32 %v3197_v22, %v2702_v10  ;;  %v3199_v22 = vld [vmem:[%s5258_s14 + $0x1] ss:$0 sm:$0xff] }
 0xf9e   :  { %v2708_v16 = vmax.f32 %v2703_v53, 0.0 }
 0xfa0   :  { %2756 = vmatmul.f32.gmra.mxu0 %v2708_v16 }
 0xfe4   :  { %v2748_v27 = vpop.f32.mrf.mxu0 }
 0xfe5   :  { %v2749_v58 = vadd.f32 %v3198_v32, %v2748_v27 }
 0xfe7   :  { %v2760_v50 = vadd.f32 %v2749_v58, %v5125_v36 }
 0xfe9   :  { %v2768_v26 = vsel %vm5476_vm0, %v2760_v50, 0.0 }
 0xfea   :  { %2769 = vadd.xlane.f32.xlu0 %v2768_v26 }
 0xfed   :  { %v2751_v4 = vpop.f32.mrf.mxu0 }
 0xfee   :  { %v2752_v7 = vadd.f32 %v3198_v32, %v2751_v4 }
 0xff0   :  { %v2761_v12 = vadd.f32 %v2752_v7, %v5131_v42 }
 0xff2   :  { %v2771_v18 = vsel %vm5477_vm9, %v2761_v12, 0.0 }
 0xff3   :  { %2772 = vadd.xlane.f32.xlu2 %v2771_v18 }
 0xfff   :  { %v2754_v57 = vpop.f32.mrf.mxu0 }
0x1000   :  { %v2755_v40 = vadd.f32 %v3198_v32, %v2754_v57 }
0x1002   :  { %v2762_v30 = vadd.f32 %v2755_v40, %v5138_v54 }
0x1004   :  { %v2774_v5 = vsel %vm5478_vm12, %v2762_v30, 0.0 }
0x1005   :  { %2775 = vadd.xlane.f32.xlu1 %v2774_v5 }
0x101d   :  { %v2757_v62 = vpop.f32.mrf.mxu0 }
0x101e   :  { %v2758_v39 = vadd.f32 %v3198_v32, %v2757_v62 }
0x1020   :  { %v2763_v36 = vadd.f32 %v2758_v39, %v2653_v0 }
0x1022   :  { %v2777_v49 = vsel %vm5479_vm6, %v2763_v36, 0.0  ;;  %vm5486_vm6 = vmmov %vm5482_vm3 }
0x1023   :  { %2778 = vadd.xlane.f32.xlu0 %v2777_v49 }
0x105d   :  { %v2770_v41 = vpop.xlane.xlu0 %2769 }
0x105e   :  { %v2780_v37 = vmul.f32 %v2770_v41, %v4544_v19 }
0x1060   :  { %v2784_v42 = vsub.f32 %v2760_v50, %v2780_v37 }
0x1062   :  { %v2788_v25 = vmul.f32 %v2784_v42, %v2784_v42 }
0x1064   :  { %v2792_v52 = vsel %vm5480_vm14, %v2788_v25, 0.0 }
0x1065   :  { %2793 = vadd.xlane.f32.xlu2 %v2792_v52 }
0x1066   :  { %v2773_v9 = vpop.xlane.xlu2 %2772 }
0x1067   :  { %v2781_v54 = vmul.f32 %v2773_v9, %v4544_v19 }
0x1069   :  { %v2785_v55 = vsub.f32 %v2761_v12, %v2781_v54 }
0x106b   :  { %v2789_v31 = vmul.f32 %v2785_v55, %v2785_v55 }
0x106d   :  { %v2795_v60 = vsel %vm5481_vm13, %v2789_v31, 0.0 }
0x106e   :  { %2796 = vadd.xlane.f32.xlu1 %v2795_v60 }
0x1078   :  { %v2776_v35 = vpop.xlane.xlu1 %2775 }
0x1079   :  { %v2782_v3 = vmul.f32 %v2776_v35, %v4544_v19 }
0x107b   :  { %v5213_v8 = vsub.f32 %v2762_v30, %v2782_v3 }
0x107d   :  { %v2790_v48 = vmul.f32 %v5213_v8, %v5213_v8 }
0x107f   :  { %v2798_v45 = vsel %vm5482_vm3, %v2790_v48, 0.0 }
0x1080   :  { %2799 = vadd.xlane.f32.xlu0 %v2798_v45 }
0x1096   :  { %v2779_v46 = vpop.xlane.xlu0 %2778 }
0x1097   :  { %v2783_v13 = vmul.f32 %v2779_v46, %v4544_v19 }
0x1099   :  { %v5219_v28 = vsub.f32 %v2763_v36, %v2783_v13 }
0x109b   :  { %v2791_v63 = vmul.f32 %v5219_v28, %v5219_v28 }
0x109d   :  { %v2801_v1 = vsel %vm5483_vm4, %v2791_v63, 0.0 }
0x109e   :  { %2802 = vadd.xlane.f32.xlu2 %v2801_v1 }
0x10d8   :  { %v2794_v24 = vpop.xlane.xlu2 %2793 }
0x10d9   :  { %v2804_v34 = vmul.f32 %v2794_v24, %v4544_v19 }
0x10db   :  { %v2808_v15 = vadd.f32 1e-05, %v2804_v34 }
0x10dd   :  { %3355 = vrsqrt.f32 %v2808_v15  ;;  %vm2818_vm2 = vweird.f32 %v2808_v15 }
0x10e1   :  { %v2797_v61 = vpop.xlane.xlu1 %2796 }
0x10e2   :  { %v2805_v33 = vmul.f32 %v2797_v61, %v4544_v19 }
0x10e3   :  { %v3356_v56 = vpop.eup %3355 }
0x10e4   :  { %v2813_v17 = vmul.f32 %v3356_v56, %v2808_v15  ;;  %v2809_v59 = vadd.f32 1e-05, %v2805_v33  ;;  %vm2819_vm7 = vweird.f32 %v3356_v56 }
0x10e5   :  { %vm2820_vm1 = vmor %vm2818_vm2, %vm2819_vm7 }
0x10e6   :  { %v2814_v6 = vmul.f32 %v3356_v56, %v2813_v17  ;;  %3357 = vrsqrt.f32 %v2809_v59  ;;  %vm2828_vm11 = vweird.f32 %v2809_v59 }
0x10e8   :  { %v2815_v0 = vmul.f32 0.5, %v2814_v6 }
0x10ea   :  { %v2816_v43 = vsub.f32 1.5, %v2815_v0 }
0x10ec   :  { %v3358_v29 = vpop.eup %3357  ;;  %v2817_v21 = vmul.f32 %v3356_v56, %v2816_v43 }
0x10ed   :  { %v2823_v14 = vmul.f32 %v3358_v29, %v2809_v59  ;;  %vm2829_vm8 = vweird.f32 %v3358_v29 }
0x10ee   :  { %v2821_v47 = vsel %vm2820_vm1, %v3356_v56, %v2817_v21  ;;  %vm2830_vm15 = vmor %vm2828_vm11, %vm2829_vm8 }
0x10ef   :  { %v2852_v51 = vmul.f32 %v2821_v47, %v2784_v42  ;;  %v2824_v2 = vmul.f32 %v3358_v29, %v2823_v14 }
0x10f1   :  { %v2859_v20 = vmul.f32 %v3199_v22, %v2852_v51  ;;  %v2825_v44 = vmul.f32 0.5, %v2824_v2 }
0x10f3   :  { %v2800_v38 = vpop.xlane.xlu0 %2799  ;;  %v2866_v11 = vadd.f32 %v3200_v23, %v2859_v20  ;;  %v2826_v10 = vsub.f32 1.5, %v2825_v44 }
0x10f4   :  { %v2806_v53 = vmul.f32 %v2800_v38, %v4544_v19 }
0x10f5   :  { %2870 = vst.msk [vmem:[#allocation6] sm:$0xff] %vm5484_vm10, %v2866_v11  ;;  %v2827_v16 = vmul.f32 %v3358_v29, %v2826_v10 }
0x10f6   :  { %v2810_v32 = vadd.f32 1e-05, %v2806_v53 }
0x10f7   :  { %v2831_v27 = vsel %vm2830_vm15, %v3358_v29, %v2827_v16 }
0x10f8   :  { %3359 = vrsqrt.f32 %v2810_v32  ;;  %v2853_v58 = vmul.f32 %v2831_v27, %v2785_v55  ;;  %vm2838_vm9 = vweird.f32 %v2810_v32 }
0x10fa   :  { %v2860_v50 = vmul.f32 %v3199_v22, %v2853_v58 }
0x10fc   :  { %v2867_v26 = vadd.f32 %v3200_v23, %v2860_v50 }
0x10fe   :  { %v3360_v4 = vpop.eup %3359  ;;  %2871 = vst.msk [vmem:[#allocation6 + $0x8] sm:$0xff] %vm5485_vm5, %v2867_v26 }
0x10ff   :  { %v2833_v7 = vmul.f32 %v3360_v4, %v2810_v32  ;;  %vm2839_vm0 = vweird.f32 %v3360_v4 }
0x1100   :  { %vm2840_vm12 = vmor %vm2838_vm9, %vm2839_vm0 }
0x1101   :  { %v2834_v12 = vmul.f32 %v3360_v4, %v2833_v7 }
0x1103   :  { %v2835_v18 = vmul.f32 0.5, %v2834_v12 }
0x1105   :  { %v2836_v57 = vsub.f32 1.5, %v2835_v18 }
0x1107   :  { %v2837_v40 = vmul.f32 %v3360_v4, %v2836_v57 }
0x1109   :  { %v2841_v30 = vsel %vm2840_vm12, %v3360_v4, %v2837_v40 }
0x110a   :  { %v2854_v5 = vmul.f32 %v2841_v30, %v5213_v8 }
0x110c   :  { %v2861_v62 = vmul.f32 %v3199_v22, %v2854_v5 }
0x110e   :  { %v2868_v39 = vadd.f32 %v3200_v23, %v2861_v62 }
0x1110   :  { %2872 = vst.msk [vmem:[#allocation6 + $0x10] sm:$0xff] %vm5486_vm6, %v2868_v39 }
0x1111   :  { %v2803_v36 = vpop.xlane.xlu2 %2802 }
0x1112   :  { %v2807_v49 = vmul.f32 %v2803_v36, %v4544_v19 }
0x1114   :  { %v2811_v41 = vadd.f32 1e-05, %v2807_v49 }
0x1116   :  { %3361 = vrsqrt.f32 %v2811_v41  ;;  %vm2848_vm13 = vweird.f32 %v2811_v41 }
0x111c   :  { %v3362_v37 = vpop.eup %3361 }
0x111d   :  { %v2843_v42 = vmul.f32 %v3362_v37, %v2811_v41  ;;  %vm2849_vm14 = vweird.f32 %v3362_v37 }
0x111e   :  { %vm2850_vm3 = vmor %vm2848_vm13, %vm2849_vm14 }
0x111f   :  { %v2844_v25 = vmul.f32 %v3362_v37, %v2843_v42 }
0x1121   :  { %v2845_v52 = vmul.f32 0.5, %v2844_v25 }
0x1123   :  { %v2846_v9 = vsub.f32 1.5, %v2845_v52 }
0x1125   :  { %v2847_v54 = vmul.f32 %v3362_v37, %v2846_v9 }
0x1127   :  { %v2851_v55 = vsel %vm2850_vm3, %v3362_v37, %v2847_v54 }
0x1128   :  { %v2855_v31 = vmul.f32 %v2851_v55, %v5219_v28 }
0x112a   :  { %v2862_v19 = vmul.f32 %v3199_v22, %v2855_v31 }
0x112c   :  { %v2869_v60 = vadd.f32 %v3200_v23, %v2862_v19 }
0x112e   :  { %2873 = vst.msk [vmem:[#allocation6 + $0x18] sm:$0xff] %vm5483_vm4, %v2869_v60 }
0x112f   :  { %2886 = dma.vmem_to_hbm [thread:$0]  %s2879_s0, 512, %s2881_s26, [#allocation4], %s3425_s28, %s3425_s28, %s3420_s23  }
0x1130   :  { %3405 = dma.done.wait [#allocation4], 512  }
0x1131   :  { %3406 = vsyncadd [#allocation4], 4294966784 }
0x1132   :  { %2891 = vsyncpa [#allocation4], 1 }
0x1133   :  { %2892 = vsyncpa [#allocation5], 1 }

</bundles_post_ra>
